<compile_context>
chip_gen: v7x
topology: tpu7x:2x2x1
jax: 0.10.0
libtpu: 0.0.40
codegen_flags: <defaults>
</compile_context>

<pallas_src>
import functools

import jax
import jax.numpy as jnp
from jax.experimental import pallas as pl
from jax.experimental.pallas import tpu as pltpu

K = 7            # kernel_size (7 -> "same" padding of 3)
PAD = 3

_LANE = 128
_SUBLANE = 8


def _round_up(v, m):
    return (v + m - 1) // m * m


def _vmem_capacity_bytes():
    """Per-core VMEM capacity (v7x: 64 MiB, v5e/v6e: 128 MiB); safe fallback."""
    try:
        return int(pltpu.get_tpu_info().vmem_capacity_bytes)
    except Exception:
        return 64 * 1024 * 1024


# ---------------------------------------------------------------------------
# shared 7x7 conv (2 -> 1 channel, no bias) + sigmoid on the padded scratch
# ---------------------------------------------------------------------------
def _conv7x7_sigmoid(acc_ref, w_ref, *, H, W, Hp, Wp):
    """acc_ref: VMEM f32[2, Hp, Wp]; plane c holds the (mean, max) map at
    rows [PAD:PAD+H], cols [:W]; zeros everywhere else (== the conv's zero
    padding).  w_ref: SMEM f32[2*K*K], flattened (c, kh, kw) row-major.
    Returns sigmoid(conv7x7) as f32[H, W]."""
    NACC = 4                     # independent partial accumulators -> VALU ILP
    accs = [None] * NACC
    for c in range(2):
        plane = acc_ref[c]                                   # (Hp, Wp) f32
        for j in range(K):
            # Hoisted lane shift: one roll per (c, kw), reused for all 7 rows.
            # The circular wrap lands in the zeroed columns >= W, reproducing
            # the conv's zero padding on the left/right borders.
            s = (PAD - j) % Wp
            shifted = plane if s == 0 else pltpu.roll(plane, shift=s, axis=1)
            for i in range(K):                               # kernel rows
                wv = w_ref[c * K * K + i * K + j]            # scalar (SMEM)
                term = shifted[i:i + H, :W] * wv             # sublane slice
                k = i % NACC
                accs[k] = term if accs[k] is None else accs[k] + term
    out = (accs[0] + accs[1]) + (accs[2] + accs[3])
    return jax.nn.sigmoid(out)


def _zero_halo(acc_ref, *, H, W, Hp, Wp):
    """Zero only the halo of the padded scratch; the interior [PAD:PAD+H, :W]
    is always fully overwritten by the caller (no full-buffer zero store)."""
    for c in range(2):
        acc_ref[c, :PAD, :] = jnp.zeros((PAD, Wp), jnp.float32)
        acc_ref[c, PAD + H:, :] = jnp.zeros((Hp - PAD - H, Wp), jnp.float32)
        acc_ref[c, PAD:PAD + H, W:] = jnp.zeros((H, Wp - W), jnp.float32)


# ---------------------------------------------------------------------------
# fused single-pass kernel: one (1, C, H, W) slab per grid step
# ---------------------------------------------------------------------------
def _fused_kernel(w_ref, x_ref, o_ref, acc_ref, *, C, H, W, Hp, Wp):
    x = x_ref[0]                                             # (C, H, W) native dtype
    mean = jnp.sum(x, axis=0, dtype=jnp.float32) * (1.0 / C)  # f32 accumulate
    mx = jnp.max(x, axis=0).astype(jnp.float32)              # exact in native dtype

    _zero_halo(acc_ref, H=H, W=W, Hp=Hp, Wp=Wp)
    acc_ref[0, PAD:PAD + H, :W] = mean
    acc_ref[1, PAD:PAD + H, :W] = mx

    att = _conv7x7_sigmoid(acc_ref, w_ref, H=H, W=W, Hp=Hp, Wp=Wp)
    o_ref[0] = x * att.astype(o_ref.dtype)                   # x stays native dtype


# ---------------------------------------------------------------------------
# two-pass channel-tiled path
# ---------------------------------------------------------------------------
def _reduce_conv_kernel(w_ref, x_ref, att_ref, acc_ref, *, C, TC, H, W, Hp, Wp):
    """Pass 1: channel-tiled mean/max reduction, then conv+sigmoid at the last
    channel tile.  grid = (N, CT), channel axis is the 'arbitrary' axis."""
    t = pl.program_id(1)
    nt = pl.num_programs(1)
    xb = x_ref[0]                                            # (TC, H, W)

    if C % TC == 0:
        psum = jnp.sum(xb, axis=0, dtype=jnp.float32)
        pmax = jnp.max(xb, axis=0).astype(jnp.float32)
    else:
        # Ragged last tile: mask the out-of-range channels.
        base = t * TC
        psum = jnp.zeros((H, W), jnp.float32)
        pmax = jnp.full((H, W), -jnp.inf, jnp.float32)
        for cc in range(TC):
            ok = (base + cc) < C
            xc = xb[cc].astype(jnp.float32)
            psum = psum + jnp.where(ok, xc, 0.0)
            pmax = jnp.maximum(pmax, jnp.where(ok, xc, -jnp.inf))

    @pl.when(t == 0)
    def _init():
        _zero_halo(acc_ref, H=H, W=W, Hp=Hp, Wp=Wp)          # once per batch
        acc_ref[0, PAD:PAD + H, :W] = psum
        acc_ref[1, PAD:PAD + H, :W] = pmax

    @pl.when(t != 0)
    def _accumulate():
        acc_ref[0, PAD:PAD + H, :W] = acc_ref[0, PAD:PAD + H, :W] + psum
        acc_ref[1, PAD:PAD + H, :W] = jnp.maximum(acc_ref[1, PAD:PAD + H, :W], pmax)

    @pl.when(t == nt - 1)
    def _finalize():
        acc_ref[0, PAD:PAD + H, :W] = acc_ref[0, PAD:PAD + H, :W] * (1.0 / C)
        att_ref[0] = _conv7x7_sigmoid(acc_ref, w_ref, H=H, W=W, Hp=Hp, Wp=Wp)


def _apply_kernel(att_ref, x_ref, o_ref):
    """Pass 2: out = att * x over channel tiles.  grid = (N, CT), both parallel."""
    o_ref[0] = x_ref[0] * att_ref[0].astype(o_ref.dtype)


# ---------------------------------------------------------------------------
# wrapper
# ---------------------------------------------------------------------------
def spatial_attention(x, conv_w, *, channel_tile=None):
    """x: [N, C, H, W], conv_w: [1, 2, 7, 7] (no bias) -> [N, C, H, W]."""
    N, C, H, W = x.shape
    assert conv_w.shape == (1, 2, K, K), conv_w.shape

    Hp = _round_up(H + 2 * PAD, _SUBLANE)     # sublane-aligned padded height
    Wp = _round_up(W + 2 * PAD, _LANE)        # lane-dense padded width
    w_flat = conv_w.reshape(-1).astype(jnp.float32)          # (2*K*K,)

    itemsize = jnp.dtype(x.dtype).itemsize
    # Per-block budget re-derived from this chip's VMEM, capped so the
    # double-buffered working set stays well below the explicit limit below.
    block_budget = min(_vmem_capacity_bytes() // 8, 8 * 1024 * 1024)
    vmem_limit = 48 * 1024 * 1024             # > 16/32 MiB scoped defaults

    slab_bytes = C * H * W * itemsize
    if channel_tile is None and slab_bytes <= block_budget:
        # ------------------- fused single-pass path -------------------------
        kernel = functools.partial(_fused_kernel, C=C, H=H, W=W, Hp=Hp, Wp=Wp)
        return pl.pallas_call(
            kernel,
            out_shape=jax.ShapeDtypeStruct((N, C, H, W), x.dtype),
            grid_spec=pltpu.PrefetchScalarGridSpec(
                num_scalar_prefetch=0,
                grid=(N,),
                in_specs=[
                    pl.BlockSpec(memory_space=pltpu.MemorySpace.SMEM),   # weights
                    pl.BlockSpec((1, C, H, W), lambda b: (b, 0, 0, 0)),  # x
                ],
                out_specs=pl.BlockSpec((1, C, H, W), lambda b: (b, 0, 0, 0)),
                scratch_shapes=[pltpu.VMEM((2, Hp, Wp), jnp.float32)],
            ),
            compiler_params=pltpu.CompilerParams(
                dimension_semantics=("parallel",),
                vmem_limit_bytes=vmem_limit),
            cost_estimate=pl.CostEstimate(
                flops=N * (3 * C * H * W + 2 * 2 * K * K * H * W),
                transcendentals=N * H * W,
                bytes_accessed=2 * N * C * H * W * itemsize),
        )(w_flat, x)

    # --------------- two-pass channel-tiled path (large slabs) --------------
    if channel_tile is not None:
        TC = int(channel_tile)
    else:
        TC = block_budget // (H * W * itemsize)
    TC = max(1, min(TC, C))
    CT = pl.cdiv(C, TC)

    k1 = functools.partial(_reduce_conv_kernel,
                           C=C, TC=TC, H=H, W=W, Hp=Hp, Wp=Wp)
    att = pl.pallas_call(
        k1,
        out_shape=jax.ShapeDtypeStruct((N, H, W), jnp.float32),
        grid_spec=pltpu.PrefetchScalarGridSpec(
            num_scalar_prefetch=0,
            grid=(N, CT),
            in_specs=[
                pl.BlockSpec(memory_space=pltpu.MemorySpace.SMEM),       # weights
                pl.BlockSpec((1, TC, H, W), lambda b, t: (b, t, 0, 0)),  # x
            ],
            out_specs=pl.BlockSpec((1, H, W), lambda b, t: (b, 0, 0)),
            scratch_shapes=[pltpu.VMEM((2, Hp, Wp), jnp.float32)],
        ),
        compiler_params=pltpu.CompilerParams(
            dimension_semantics=("parallel", "arbitrary"),
            vmem_limit_bytes=vmem_limit),
        cost_estimate=pl.CostEstimate(
            flops=N * (2 * C * H * W + 2 * 2 * K * K * H * W),
            transcendentals=N * H * W,
            bytes_accessed=N * C * H * W * itemsize + N * H * W * 4),
    )(w_flat, x)

    return pl.pallas_call(
        _apply_kernel,
        out_shape=jax.ShapeDtypeStruct((N, C, H, W), x.dtype),
        grid_spec=pltpu.PrefetchScalarGridSpec(
            num_scalar_prefetch=0,
            grid=(N, CT),
            in_specs=[
                pl.BlockSpec((1, H, W), lambda b, t: (b, 0, 0)),         # att
                pl.BlockSpec((1, TC, H, W), lambda b, t: (b, t, 0, 0)),  # x
            ],
            out_specs=pl.BlockSpec((1, TC, H, W), lambda b, t: (b, t, 0, 0)),
        ),
        compiler_params=pltpu.CompilerParams(
            dimension_semantics=("parallel", "parallel"),
            vmem_limit_bytes=vmem_limit),
        cost_estimate=pl.CostEstimate(
            flops=N * C * H * W,
            transcendentals=0,
            bytes_accessed=2 * N * C * H * W * itemsize + N * H * W * 4),
    )(att, x)


# ---------------------------------------------------------------------------
# pure-JAX reference (matches the PyTorch forward)
# ---------------------------------------------------------------------------
def spatial_attention_ref(x, conv_w):
    avg = jnp.mean(x, axis=1, keepdims=True)
    mx = jnp.max(x, axis=1, keepdims=True)
    cat = jnp.concatenate([avg, mx], axis=1)
    conv = jax.lax.conv_general_dilated(
        cat, conv_w, window_strides=(1, 1),
        padding=((PAD, PAD), (PAD, PAD)),
        dimension_numbers=("NCHW", "OIHW", "NCHW"))
    return jax.nn.sigmoid(conv) * x


if __name__ == "__main__":
    key = jax.random.PRNGKey(0)
    kx, kw = jax.random.split(key)

    N, C, H, W = 2, 4, 16, 16
    x = jax.random.normal(kx, (N, C, H, W), dtype=jnp.float32)

    # Deterministic conv weight, PyTorch-default-style U(-sqrt(k), sqrt(k))
    # with k = 1 / (in_channels * kH * kW) = 1 / (2*7*7).
    bound = (1.0 / (2 * K * K)) ** 0.5
    conv_w = jax.random.uniform(kw, (1, 2, K, K), dtype=jnp.float32,
                                minval=-bound, maxval=bound)

    ref = spatial_attention_ref(x, conv_w)

    # Fused single-pass path (default for small C*H*W slabs).
    out = jax.block_until_ready(spatial_attention(x, conv_w))
    assert out.shape == (N, C, H, W)
    err = float(jnp.max(jnp.abs(out - ref)))
    assert jnp.allclose(out, ref, atol=1e-5, rtol=1e-5), err

    # Channel-tiled two-pass path (taken automatically for large slabs /
    # small-VMEM chips); TC=3 with C=4 also exercises the ragged-tile masking.
    out2 = jax.block_until_ready(spatial_attention(x, conv_w, channel_tile=3))
    err2 = float(jnp.max(jnp.abs(out2 - ref)))
    assert jnp.allclose(out2, ref, atol=1e-5, rtol=1e-5), err2

    print("KERNEL_OK")
</pallas_src>

<mosaic_0001>
module attributes {stable_mosaic.version = 11 : i64} {
  func.func @_fused_kernel(%arg0: i32, %arg1: memref<98xf32, #tpu.memory_space<smem>>, %arg2: memref<1x4x16x16xf32, #tpu.memory_space<vmem>>, %arg3: memref<1x4x16x16xf32, #tpu.memory_space<vmem>>, %arg4: memref<2x24x128xf32, #tpu.memory_space<vmem>>) attributes {dimension_semantics = [#tpu.dimension_semantics<parallel>], iteration_bounds = array<i64: 2>, scalar_prefetch = 0 : i64, scratch_operands = 1 : i64, tpu.core_type = #tpu.core_type<tc>, window_params = [{transform_indices = @transform_0, window_bounds = array<i64: 98>}, {transform_indices = @transform_1, window_bounds = array<i64: 1, 4, 16, 16>}, {transform_indices = @transform_2, window_bounds = array<i64: 1, 4, 16, 16>}]} {
    %c0 = arith.constant 0 : index
    %c0_0 = arith.constant 0 : index
    %c0_1 = arith.constant 0 : index
    %c0_2 = arith.constant 0 : index
    %0 = vector.load %arg2[%c0, %c0_0, %c0_1, %c0_2] : memref<1x4x16x16xf32, #tpu.memory_space<vmem>>, vector<1x4x16x16xf32>
    %1 = vector.shape_cast %0 : vector<1x4x16x16xf32> to vector<4x16x16xf32>
    %cst = arith.constant dense<0.000000e+00> : vector<16x16xf32>
    %2 = vector.multi_reduction <add>, %1, %cst [0] : vector<4x16x16xf32> to vector<16x16xf32>
    %cst_3 = arith.constant 2.500000e-01 : f32
    %3 = vector.broadcast %cst_3 : f32 to vector<16x16xf32>
    %4 = arith.mulf %2, %3 : vector<16x16xf32>
    %cst_4 = arith.constant dense<0xFF800000> : vector<16x16xf32>
    %5 = vector.multi_reduction <maximumf>, %1, %cst_4 [0] : vector<4x16x16xf32> to vector<16x16xf32>
    %cst_5 = arith.constant 0.000000e+00 : f32
    %6 = vector.broadcast %cst_5 : f32 to vector<3x128xf32>
    %c0_6 = arith.constant 0 : index
    %c0_7 = arith.constant 0 : index
    %c0_8 = arith.constant 0 : index
    %7 = vector.load %arg4[%c0_6, %c0_7, %c0_8] : memref<2x24x128xf32, #tpu.memory_space<vmem>>, vector<1x3x128xf32>
    %8 = vector.shape_cast %7 : vector<1x3x128xf32> to vector<3x128xf32>
    %9 = vector.shape_cast %6 : vector<3x128xf32> to vector<1x3x128xf32>
    tpu.vector_store %arg4[%c0_6, %c0_7, %c0_8], %9 {strides = array<i32>} : memref<2x24x128xf32, #tpu.memory_space<vmem>>, vector<1x3x128xf32>,
    %cst_9 = arith.constant 0.000000e+00 : f32
    %10 = vector.broadcast %cst_9 : f32 to vector<5x128xf32>
    %c0_10 = arith.constant 0 : index
    %c19 = arith.constant 19 : index
    %c0_11 = arith.constant 0 : index
    %11 = vector.load %arg4[%c0_10, %c19, %c0_11] : memref<2x24x128xf32, #tpu.memory_space<vmem>>, vector<1x5x128xf32>
    %12 = vector.shape_cast %11 : vector<1x5x128xf32> to vector<5x128xf32>
    %13 = vector.shape_cast %10 : vector<5x128xf32> to vector<1x5x128xf32>
    tpu.vector_store %arg4[%c0_10, %c19, %c0_11], %13 {strides = array<i32>} : memref<2x24x128xf32, #tpu.memory_space<vmem>>, vector<1x5x128xf32>,
    %cst_12 = arith.constant 0.000000e+00 : f32
    %14 = vector.broadcast %cst_12 : f32 to vector<16x112xf32>
    %c0_13 = arith.constant 0 : index
    %c3 = arith.constant 3 : index
    %c16 = arith.constant 16 : index
    %15 = vector.load %arg4[%c0_13, %c3, %c16] : memref<2x24x128xf32, #tpu.memory_space<vmem>>, vector<1x16x112xf32>
    %16 = vector.shape_cast %15 : vector<1x16x112xf32> to vector<16x112xf32>
    %17 = vector.shape_cast %14 : vector<16x112xf32> to vector<1x16x112xf32>
    tpu.vector_store %arg4[%c0_13, %c3, %c16], %17 {strides = array<i32>} : memref<2x24x128xf32, #tpu.memory_space<vmem>>, vector<1x16x112xf32>,
    %cst_14 = arith.constant 0.000000e+00 : f32
    %18 = vector.broadcast %cst_14 : f32 to vector<3x128xf32>
    %c1 = arith.constant 1 : index
    %c0_15 = arith.constant 0 : index
    %c0_16 = arith.constant 0 : index
    %19 = vector.load %arg4[%c1, %c0_15, %c0_16] : memref<2x24x128xf32, #tpu.memory_space<vmem>>, vector<1x3x128xf32>
    %20 = vector.shape_cast %19 : vector<1x3x128xf32> to vector<3x128xf32>
    %21 = vector.shape_cast %18 : vector<3x128xf32> to vector<1x3x128xf32>
    tpu.vector_store %arg4[%c1, %c0_15, %c0_16], %21 {strides = array<i32>} : memref<2x24x128xf32, #tpu.memory_space<vmem>>, vector<1x3x128xf32>,
    %cst_17 = arith.constant 0.000000e+00 : f32
    %22 = vector.broadcast %cst_17 : f32 to vector<5x128xf32>
    %c1_18 = arith.constant 1 : index
    %c19_19 = arith.constant 19 : index
    %c0_20 = arith.constant 0 : index
    %23 = vector.load %arg4[%c1_18, %c19_19, %c0_20] : memref<2x24x128xf32, #tpu.memory_space<vmem>>, vector<1x5x128xf32>
    %24 = vector.shape_cast %23 : vector<1x5x128xf32> to vector<5x128xf32>
    %25 = vector.shape_cast %22 : vector<5x128xf32> to vector<1x5x128xf32>
    tpu.vector_store %arg4[%c1_18, %c19_19, %c0_20], %25 {strides = array<i32>} : memref<2x24x128xf32, #tpu.memory_space<vmem>>, vector<1x5x128xf32>,
    %cst_21 = arith.constant 0.000000e+00 : f32
    %26 = vector.broadcast %cst_21 : f32 to vector<16x112xf32>
    %c1_22 = arith.constant 1 : index
    %c3_23 = arith.constant 3 : index
    %c16_24 = arith.constant 16 : index
    %27 = vector.load %arg4[%c1_22, %c3_23, %c16_24] : memref<2x24x128xf32, #tpu.memory_space<vmem>>, vector<1x16x112xf32>
    %28 = vector.shape_cast %27 : vector<1x16x112xf32> to vector<16x112xf32>
    %29 = vector.shape_cast %26 : vector<16x112xf32> to vector<1x16x112xf32>
    tpu.vector_store %arg4[%c1_22, %c3_23, %c16_24], %29 {strides = array<i32>} : memref<2x24x128xf32, #tpu.memory_space<vmem>>, vector<1x16x112xf32>,
    %c0_25 = arith.constant 0 : index
    %c3_26 = arith.constant 3 : index
    %c0_27 = arith.constant 0 : index
    %30 = vector.load %arg4[%c0_25, %c3_26, %c0_27] : memref<2x24x128xf32, #tpu.memory_space<vmem>>, vector<1x16x16xf32>
    %31 = vector.shape_cast %30 : vector<1x16x16xf32> to vector<16x16xf32>
    %32 = vector.shape_cast %4 : vector<16x16xf32> to vector<1x16x16xf32>
    tpu.vector_store %arg4[%c0_25, %c3_26, %c0_27], %32 {strides = array<i32>} : memref<2x24x128xf32, #tpu.memory_space<vmem>>, vector<1x16x16xf32>,
    %c1_28 = arith.constant 1 : index
    %c3_29 = arith.constant 3 : index
    %c0_30 = arith.constant 0 : index
    %33 = vector.load %arg4[%c1_28, %c3_29, %c0_30] : memref<2x24x128xf32, #tpu.memory_space<vmem>>, vector<1x16x16xf32>
    %34 = vector.shape_cast %33 : vector<1x16x16xf32> to vector<16x16xf32>
    %35 = vector.shape_cast %5 : vector<16x16xf32> to vector<1x16x16xf32>
    tpu.vector_store %arg4[%c1_28, %c3_29, %c0_30], %35 {strides = array<i32>} : memref<2x24x128xf32, #tpu.memory_space<vmem>>, vector<1x16x16xf32>,
    %c0_31 = arith.constant 0 : index
    %c0_32 = arith.constant 0 : index
    %c0_33 = arith.constant 0 : index
    %36 = vector.load %arg4[%c0_31, %c0_32, %c0_33] : memref<2x24x128xf32, #tpu.memory_space<vmem>>, vector<1x24x128xf32>
    %37 = vector.shape_cast %36 : vector<1x24x128xf32> to vector<24x128xf32>
    %c3_i32 = arith.constant 3 : i32
    %38 = tpu.dynamic_rotate %37 by %c3_i32 dim 1 : vector<24x128xf32>, i32 -> vector<24x128xf32>
    %c0_34 = arith.constant 0 : index
    %39 = memref.load %arg1[%c0_34] : memref<98xf32, #tpu.memory_space<smem>>
    %40 = vector.extract_strided_slice %38 {offsets = [0, 0], sizes = [16, 16], strides = [1, 1]} : vector<24x128xf32> to vector<16x16xf32>
    %41 = vector.broadcast %39 : f32 to vector<16x16xf32>
    %42 = arith.mulf %40, %41 : vector<16x16xf32>
    %c7 = arith.constant 7 : index
    %43 = memref.load %arg1[%c7] : memref<98xf32, #tpu.memory_space<smem>>
    %44 = vector.extract_strided_slice %38 {offsets = [1, 0], sizes = [16, 16], strides = [1, 1]} : vector<24x128xf32> to vector<16x16xf32>
    %45 = vector.broadcast %43 : f32 to vector<16x16xf32>
    %46 = arith.mulf %44, %45 : vector<16x16xf32>
    %c14 = arith.constant 14 : index
    %47 = memref.load %arg1[%c14] : memref<98xf32, #tpu.memory_space<smem>>
    %48 = vector.extract_strided_slice %38 {offsets = [2, 0], sizes = [16, 16], strides = [1, 1]} : vector<24x128xf32> to vector<16x16xf32>
    %49 = vector.broadcast %47 : f32 to vector<16x16xf32>
    %50 = arith.mulf %48, %49 : vector<16x16xf32>
    %c21 = arith.constant 21 : index
    %51 = memref.load %arg1[%c21] : memref<98xf32, #tpu.memory_space<smem>>
    %52 = vector.extract_strided_slice %38 {offsets = [3, 0], sizes = [16, 16], strides = [1, 1]} : vector<24x128xf32> to vector<16x16xf32>
    %53 = vector.broadcast %51 : f32 to vector<16x16xf32>
    %54 = arith.mulf %52, %53 : vector<16x16xf32>
    %c28 = arith.constant 28 : index
    %55 = memref.load %arg1[%c28] : memref<98xf32, #tpu.memory_space<smem>>
    %56 = vector.extract_strided_slice %38 {offsets = [4, 0], sizes = [16, 16], strides = [1, 1]} : vector<24x128xf32> to vector<16x16xf32>
    %57 = vector.broadcast %55 : f32 to vector<16x16xf32>
    %58 = arith.mulf %56, %57 : vector<16x16xf32>
    %59 = arith.addf %42, %58 : vector<16x16xf32>
    %c35 = arith.constant 35 : index
    %60 = memref.load %arg1[%c35] : memref<98xf32, #tpu.memory_space<smem>>
    %61 = vector.extract_strided_slice %38 {offsets = [5, 0], sizes = [16, 16], strides = [1, 1]} : vector<24x128xf32> to vector<16x16xf32>
    %62 = vector.broadcast %60 : f32 to vector<16x16xf32>
    %63 = arith.mulf %61, %62 : vector<16x16xf32>
    %64 = arith.addf %46, %63 : vector<16x16xf32>
    %c42 = arith.constant 42 : index
    %65 = memref.load %arg1[%c42] : memref<98xf32, #tpu.memory_space<smem>>
    %66 = vector.extract_strided_slice %38 {offsets = [6, 0], sizes = [16, 16], strides = [1, 1]} : vector<24x128xf32> to vector<16x16xf32>
    %67 = vector.broadcast %65 : f32 to vector<16x16xf32>
    %68 = arith.mulf %66, %67 : vector<16x16xf32>
    %69 = arith.addf %50, %68 : vector<16x16xf32>
    %c2_i32 = arith.constant 2 : i32
    %70 = tpu.dynamic_rotate %37 by %c2_i32 dim 1 : vector<24x128xf32>, i32 -> vector<24x128xf32>
    %c1_35 = arith.constant 1 : index
    %71 = memref.load %arg1[%c1_35] : memref<98xf32, #tpu.memory_space<smem>>
    %72 = vector.extract_strided_slice %70 {offsets = [0, 0], sizes = [16, 16], strides = [1, 1]} : vector<24x128xf32> to vector<16x16xf32>
    %73 = vector.broadcast %71 : f32 to vector<16x16xf32>
    %74 = arith.mulf %72, %73 : vector<16x16xf32>
    %75 = arith.addf %59, %74 : vector<16x16xf32>
    %c8 = arith.constant 8 : index
    %76 = memref.load %arg1[%c8] : memref<98xf32, #tpu.memory_space<smem>>
    %77 = vector.extract_strided_slice %70 {offsets = [1, 0], sizes = [16, 16], strides = [1, 1]} : vector<24x128xf32> to vector<16x16xf32>
    %78 = vector.broadcast %76 : f32 to vector<16x16xf32>
    %79 = arith.mulf %77, %78 : vector<16x16xf32>
    %80 = arith.addf %64, %79 : vector<16x16xf32>
    %c15 = arith.constant 15 : index
    %81 = memref.load %arg1[%c15] : memref<98xf32, #tpu.memory_space<smem>>
    %82 = vector.extract_strided_slice %70 {offsets = [2, 0], sizes = [16, 16], strides = [1, 1]} : vector<24x128xf32> to vector<16x16xf32>
    %83 = vector.broadcast %81 : f32 to vector<16x16xf32>
    %84 = arith.mulf %82, %83 : vector<16x16xf32>
    %85 = arith.addf %69, %84 : vector<16x16xf32>
    %c22 = arith.constant 22 : index
    %86 = memref.load %arg1[%c22] : memref<98xf32, #tpu.memory_space<smem>>
    %87 = vector.extract_strided_slice %70 {offsets = [3, 0], sizes = [16, 16], strides = [1, 1]} : vector<24x128xf32> to vector<16x16xf32>
    %88 = vector.broadcast %86 : f32 to vector<16x16xf32>
    %89 = arith.mulf %87, %88 : vector<16x16xf32>
    %90 = arith.addf %54, %89 : vector<16x16xf32>
    %c29 = arith.constant 29 : index
    %91 = memref.load %arg1[%c29] : memref<98xf32, #tpu.memory_space<smem>>
    %92 = vector.extract_strided_slice %70 {offsets = [4, 0], sizes = [16, 16], strides = [1, 1]} : vector<24x128xf32> to vector<16x16xf32>
    %93 = vector.broadcast %91 : f32 to vector<16x16xf32>
    %94 = arith.mulf %92, %93 : vector<16x16xf32>
    %95 = arith.addf %75, %94 : vector<16x16xf32>
    %c36 = arith.constant 36 : index
    %96 = memref.load %arg1[%c36] : memref<98xf32, #tpu.memory_space<smem>>
    %97 = vector.extract_strided_slice %70 {offsets = [5, 0], sizes = [16, 16], strides = [1, 1]} : vector<24x128xf32> to vector<16x16xf32>
    %98 = vector.broadcast %96 : f32 to vector<16x16xf32>
    %99 = arith.mulf %97, %98 : vector<16x16xf32>
    %100 = arith.addf %80, %99 : vector<16x16xf32>
    %c43 = arith.constant 43 : index
    %101 = memref.load %arg1[%c43] : memref<98xf32, #tpu.memory_space<smem>>
    %102 = vector.extract_strided_slice %70 {offsets = [6, 0], sizes = [16, 16], strides = [1, 1]} : vector<24x128xf32> to vector<16x16xf32>
    %103 = vector.broadcast %101 : f32 to vector<16x16xf32>
    %104 = arith.mulf %102, %103 : vector<16x16xf32>
    %105 = arith.addf %85, %104 : vector<16x16xf32>
    %c1_i32 = arith.constant 1 : i32
    %106 = tpu.dynamic_rotate %37 by %c1_i32 dim 1 : vector<24x128xf32>, i32 -> vector<24x128xf32>
    %c2 = arith.constant 2 : index
    %107 = memref.load %arg1[%c2] : memref<98xf32, #tpu.memory_space<smem>>
    %108 = vector.extract_strided_slice %106 {offsets = [0, 0], sizes = [16, 16], strides = [1, 1]} : vector<24x128xf32> to vector<16x16xf32>
    %109 = vector.broadcast %107 : f32 to vector<16x16xf32>
    %110 = arith.mulf %108, %109 : vector<16x16xf32>
    %111 = arith.addf %95, %110 : vector<16x16xf32>
    %c9 = arith.constant 9 : index
    %112 = memref.load %arg1[%c9] : memref<98xf32, #tpu.memory_space<smem>>
    %113 = vector.extract_strided_slice %106 {offsets = [1, 0], sizes = [16, 16], strides = [1, 1]} : vector<24x128xf32> to vector<16x16xf32>
    %114 = vector.broadcast %112 : f32 to vector<16x16xf32>
    %115 = arith.mulf %113, %114 : vector<16x16xf32>
    %116 = arith.addf %100, %115 : vector<16x16xf32>
    %c16_36 = arith.constant 16 : index
    %117 = memref.load %arg1[%c16_36] : memref<98xf32, #tpu.memory_space<smem>>
    %118 = vector.extract_strided_slice %106 {offsets = [2, 0], sizes = [16, 16], strides = [1, 1]} : vector<24x128xf32> to vector<16x16xf32>
    %119 = vector.broadcast %117 : f32 to vector<16x16xf32>
    %120 = arith.mulf %118, %119 : vector<16x16xf32>
    %121 = arith.addf %105, %120 : vector<16x16xf32>
    %c23 = arith.constant 23 : index
    %122 = memref.load %arg1[%c23] : memref<98xf32, #tpu.memory_space<smem>>
    %123 = vector.extract_strided_slice %106 {offsets = [3, 0], sizes = [16, 16], strides = [1, 1]} : vector<24x128xf32> to vector<16x16xf32>
    %124 = vector.broadcast %122 : f32 to vector<16x16xf32>
    %125 = arith.mulf %123, %124 : vector<16x16xf32>
    %126 = arith.addf %90, %125 : vector<16x16xf32>
    %c30 = arith.constant 30 : index
    %127 = memref.load %arg1[%c30] : memref<98xf32, #tpu.memory_space<smem>>
    %128 = vector.extract_strided_slice %106 {offsets = [4, 0], sizes = [16, 16], strides = [1, 1]} : vector<24x128xf32> to vector<16x16xf32>
    %129 = vector.broadcast %127 : f32 to vector<16x16xf32>
    %130 = arith.mulf %128, %129 : vector<16x16xf32>
    %131 = arith.addf %111, %130 : vector<16x16xf32>
    %c37 = arith.constant 37 : index
    %132 = memref.load %arg1[%c37] : memref<98xf32, #tpu.memory_space<smem>>
    %133 = vector.extract_strided_slice %106 {offsets = [5, 0], sizes = [16, 16], strides = [1, 1]} : vector<24x128xf32> to vector<16x16xf32>
    %134 = vector.broadcast %132 : f32 to vector<16x16xf32>
    %135 = arith.mulf %133, %134 : vector<16x16xf32>
    %136 = arith.addf %116, %135 : vector<16x16xf32>
    %c44 = arith.constant 44 : index
    %137 = memref.load %arg1[%c44] : memref<98xf32, #tpu.memory_space<smem>>
    %138 = vector.extract_strided_slice %106 {offsets = [6, 0], sizes = [16, 16], strides = [1, 1]} : vector<24x128xf32> to vector<16x16xf32>
    %139 = vector.broadcast %137 : f32 to vector<16x16xf32>
    %140 = arith.mulf %138, %139 : vector<16x16xf32>
    %141 = arith.addf %121, %140 : vector<16x16xf32>
    %c3_37 = arith.constant 3 : index
    %142 = memref.load %arg1[%c3_37] : memref<98xf32, #tpu.memory_space<smem>>
    %143 = vector.extract_strided_slice %37 {offsets = [0, 0], sizes = [16, 16], strides = [1, 1]} : vector<24x128xf32> to vector<16x16xf32>
    %144 = vector.broadcast %142 : f32 to vector<16x16xf32>
    %145 = arith.mulf %143, %144 : vector<16x16xf32>
    %146 = arith.addf %131, %145 : vector<16x16xf32>
    %c10 = arith.constant 10 : index
    %147 = memref.load %arg1[%c10] : memref<98xf32, #tpu.memory_space<smem>>
    %148 = vector.extract_strided_slice %37 {offsets = [1, 0], sizes = [16, 16], strides = [1, 1]} : vector<24x128xf32> to vector<16x16xf32>
    %149 = vector.broadcast %147 : f32 to vector<16x16xf32>
    %150 = arith.mulf %148, %149 : vector<16x16xf32>
    %151 = arith.addf %136, %150 : vector<16x16xf32>
    %c17 = arith.constant 17 : index
    %152 = memref.load %arg1[%c17] : memref<98xf32, #tpu.memory_space<smem>>
    %153 = vector.extract_strided_slice %37 {offsets = [2, 0], sizes = [16, 16], strides = [1, 1]} : vector<24x128xf32> to vector<16x16xf32>
    %154 = vector.broadcast %152 : f32 to vector<16x16xf32>
    %155 = arith.mulf %153, %154 : vector<16x16xf32>
    %156 = arith.addf %141, %155 : vector<16x16xf32>
    %c24 = arith.constant 24 : index
    %157 = memref.load %arg1[%c24] : memref<98xf32, #tpu.memory_space<smem>>
    %158 = vector.extract_strided_slice %37 {offsets = [3, 0], sizes = [16, 16], strides = [1, 1]} : vector<24x128xf32> to vector<16x16xf32>
    %159 = vector.broadcast %157 : f32 to vector<16x16xf32>
    %160 = arith.mulf %158, %159 : vector<16x16xf32>
    %161 = arith.addf %126, %160 : vector<16x16xf32>
    %c31 = arith.constant 31 : index
    %162 = memref.load %arg1[%c31] : memref<98xf32, #tpu.memory_space<smem>>
    %163 = vector.extract_strided_slice %37 {offsets = [4, 0], sizes = [16, 16], strides = [1, 1]} : vector<24x128xf32> to vector<16x16xf32>
    %164 = vector.broadcast %162 : f32 to vector<16x16xf32>
    %165 = arith.mulf %163, %164 : vector<16x16xf32>
    %166 = arith.addf %146, %165 : vector<16x16xf32>
    %c38 = arith.constant 38 : index
    %167 = memref.load %arg1[%c38] : memref<98xf32, #tpu.memory_space<smem>>
    %168 = vector.extract_strided_slice %37 {offsets = [5, 0], sizes = [16, 16], strides = [1, 1]} : vector<24x128xf32> to vector<16x16xf32>
    %169 = vector.broadcast %167 : f32 to vector<16x16xf32>
    %170 = arith.mulf %168, %169 : vector<16x16xf32>
    %171 = arith.addf %151, %170 : vector<16x16xf32>
    %c45 = arith.constant 45 : index
    %172 = memref.load %arg1[%c45] : memref<98xf32, #tpu.memory_space<smem>>
    %173 = vector.extract_strided_slice %37 {offsets = [6, 0], sizes = [16, 16], strides = [1, 1]} : vector<24x128xf32> to vector<16x16xf32>
    %174 = vector.broadcast %172 : f32 to vector<16x16xf32>
    %175 = arith.mulf %173, %174 : vector<16x16xf32>
    %176 = arith.addf %156, %175 : vector<16x16xf32>
    %c127_i32 = arith.constant 127 : i32
    %177 = tpu.dynamic_rotate %37 by %c127_i32 dim 1 : vector<24x128xf32>, i32 -> vector<24x128xf32>
    %c4 = arith.constant 4 : index
    %178 = memref.load %arg1[%c4] : memref<98xf32, #tpu.memory_space<smem>>
    %179 = vector.extract_strided_slice %177 {offsets = [0, 0], sizes = [16, 16], strides = [1, 1]} : vector<24x128xf32> to vector<16x16xf32>
    %180 = vector.broadcast %178 : f32 to vector<16x16xf32>
    %181 = arith.mulf %179, %180 : vector<16x16xf32>
    %182 = arith.addf %166, %181 : vector<16x16xf32>
    %c11 = arith.constant 11 : index
    %183 = memref.load %arg1[%c11] : memref<98xf32, #tpu.memory_space<smem>>
    %184 = vector.extract_strided_slice %177 {offsets = [1, 0], sizes = [16, 16], strides = [1, 1]} : vector<24x128xf32> to vector<16x16xf32>
    %185 = vector.broadcast %183 : f32 to vector<16x16xf32>
    %186 = arith.mulf %184, %185 : vector<16x16xf32>
    %187 = arith.addf %171, %186 : vector<16x16xf32>
    %c18 = arith.constant 18 : index
    %188 = memref.load %arg1[%c18] : memref<98xf32, #tpu.memory_space<smem>>
    %189 = vector.extract_strided_slice %177 {offsets = [2, 0], sizes = [16, 16], strides = [1, 1]} : vector<24x128xf32> to vector<16x16xf32>
    %190 = vector.broadcast %188 : f32 to vector<16x16xf32>
    %191 = arith.mulf %189, %190 : vector<16x16xf32>
    %192 = arith.addf %176, %191 : vector<16x16xf32>
    %c25 = arith.constant 25 : index
    %193 = memref.load %arg1[%c25] : memref<98xf32, #tpu.memory_space<smem>>
    %194 = vector.extract_strided_slice %177 {offsets = [3, 0], sizes = [16, 16], strides = [1, 1]} : vector<24x128xf32> to vector<16x16xf32>
    %195 = vector.broadcast %193 : f32 to vector<16x16xf32>
    %196 = arith.mulf %194, %195 : vector<16x16xf32>
    %197 = arith.addf %161, %196 : vector<16x16xf32>
    %c32 = arith.constant 32 : index
    %198 = memref.load %arg1[%c32] : memref<98xf32, #tpu.memory_space<smem>>
    %199 = vector.extract_strided_slice %177 {offsets = [4, 0], sizes = [16, 16], strides = [1, 1]} : vector<24x128xf32> to vector<16x16xf32>
    %200 = vector.broadcast %198 : f32 to vector<16x16xf32>
    %201 = arith.mulf %199, %200 : vector<16x16xf32>
    %202 = arith.addf %182, %201 : vector<16x16xf32>
    %c39 = arith.constant 39 : index
    %203 = memref.load %arg1[%c39] : memref<98xf32, #tpu.memory_space<smem>>
    %204 = vector.extract_strided_slice %177 {offsets = [5, 0], sizes = [16, 16], strides = [1, 1]} : vector<24x128xf32> to vector<16x16xf32>
    %205 = vector.broadcast %203 : f32 to vector<16x16xf32>
    %206 = arith.mulf %204, %205 : vector<16x16xf32>
    %207 = arith.addf %187, %206 : vector<16x16xf32>
    %c46 = arith.constant 46 : index
    %208 = memref.load %arg1[%c46] : memref<98xf32, #tpu.memory_space<smem>>
    %209 = vector.extract_strided_slice %177 {offsets = [6, 0], sizes = [16, 16], strides = [1, 1]} : vector<24x128xf32> to vector<16x16xf32>
    %210 = vector.broadcast %208 : f32 to vector<16x16xf32>
    %211 = arith.mulf %209, %210 : vector<16x16xf32>
    %212 = arith.addf %192, %211 : vector<16x16xf32>
    %c126_i32 = arith.constant 126 : i32
    %213 = tpu.dynamic_rotate %37 by %c126_i32 dim 1 : vector<24x128xf32>, i32 -> vector<24x128xf32>
    %c5 = arith.constant 5 : index
    %214 = memref.load %arg1[%c5] : memref<98xf32, #tpu.memory_space<smem>>
    %215 = vector.extract_strided_slice %213 {offsets = [0, 0], sizes = [16, 16], strides = [1, 1]} : vector<24x128xf32> to vector<16x16xf32>
    %216 = vector.broadcast %214 : f32 to vector<16x16xf32>
    %217 = arith.mulf %215, %216 : vector<16x16xf32>
    %218 = arith.addf %202, %217 : vector<16x16xf32>
    %c12 = arith.constant 12 : index
    %219 = memref.load %arg1[%c12] : memref<98xf32, #tpu.memory_space<smem>>
    %220 = vector.extract_strided_slice %213 {offsets = [1, 0], sizes = [16, 16], strides = [1, 1]} : vector<24x128xf32> to vector<16x16xf32>
    %221 = vector.broadcast %219 : f32 to vector<16x16xf32>
    %222 = arith.mulf %220, %221 : vector<16x16xf32>
    %223 = arith.addf %207, %222 : vector<16x16xf32>
    %c19_38 = arith.constant 19 : index
    %224 = memref.load %arg1[%c19_38] : memref<98xf32, #tpu.memory_space<smem>>
    %225 = vector.extract_strided_slice %213 {offsets = [2, 0], sizes = [16, 16], strides = [1, 1]} : vector<24x128xf32> to vector<16x16xf32>
    %226 = vector.broadcast %224 : f32 to vector<16x16xf32>
    %227 = arith.mulf %225, %226 : vector<16x16xf32>
    %228 = arith.addf %212, %227 : vector<16x16xf32>
    %c26 = arith.constant 26 : index
    %229 = memref.load %arg1[%c26] : memref<98xf32, #tpu.memory_space<smem>>
    %230 = vector.extract_strided_slice %213 {offsets = [3, 0], sizes = [16, 16], strides = [1, 1]} : vector<24x128xf32> to vector<16x16xf32>
    %231 = vector.broadcast %229 : f32 to vector<16x16xf32>
    %232 = arith.mulf %230, %231 : vector<16x16xf32>
    %233 = arith.addf %197, %232 : vector<16x16xf32>
    %c33 = arith.constant 33 : index
    %234 = memref.load %arg1[%c33] : memref<98xf32, #tpu.memory_space<smem>>
    %235 = vector.extract_strided_slice %213 {offsets = [4, 0], sizes = [16, 16], strides = [1, 1]} : vector<24x128xf32> to vector<16x16xf32>
    %236 = vector.broadcast %234 : f32 to vector<16x16xf32>
    %237 = arith.mulf %235, %236 : vector<16x16xf32>
    %238 = arith.addf %218, %237 : vector<16x16xf32>
    %c40 = arith.constant 40 : index
    %239 = memref.load %arg1[%c40] : memref<98xf32, #tpu.memory_space<smem>>
    %240 = vector.extract_strided_slice %213 {offsets = [5, 0], sizes = [16, 16], strides = [1, 1]} : vector<24x128xf32> to vector<16x16xf32>
    %241 = vector.broadcast %239 : f32 to vector<16x16xf32>
    %242 = arith.mulf %240, %241 : vector<16x16xf32>
    %243 = arith.addf %223, %242 : vector<16x16xf32>
    %c47 = arith.constant 47 : index
    %244 = memref.load %arg1[%c47] : memref<98xf32, #tpu.memory_space<smem>>
    %245 = vector.extract_strided_slice %213 {offsets = [6, 0], sizes = [16, 16], strides = [1, 1]} : vector<24x128xf32> to vector<16x16xf32>
    %246 = vector.broadcast %244 : f32 to vector<16x16xf32>
    %247 = arith.mulf %245, %246 : vector<16x16xf32>
    %248 = arith.addf %228, %247 : vector<16x16xf32>
    %c125_i32 = arith.constant 125 : i32
    %249 = tpu.dynamic_rotate %37 by %c125_i32 dim 1 : vector<24x128xf32>, i32 -> vector<24x128xf32>
    %c6 = arith.constant 6 : index
    %250 = memref.load %arg1[%c6] : memref<98xf32, #tpu.memory_space<smem>>
    %251 = vector.extract_strided_slice %249 {offsets = [0, 0], sizes = [16, 16], strides = [1, 1]} : vector<24x128xf32> to vector<16x16xf32>
    %252 = vector.broadcast %250 : f32 to vector<16x16xf32>
    %253 = arith.mulf %251, %252 : vector<16x16xf32>
    %254 = arith.addf %238, %253 : vector<16x16xf32>
    %c13 = arith.constant 13 : index
    %255 = memref.load %arg1[%c13] : memref<98xf32, #tpu.memory_space<smem>>
    %256 = vector.extract_strided_slice %249 {offsets = [1, 0], sizes = [16, 16], strides = [1, 1]} : vector<24x128xf32> to vector<16x16xf32>
    %257 = vector.broadcast %255 : f32 to vector<16x16xf32>
    %258 = arith.mulf %256, %257 : vector<16x16xf32>
    %259 = arith.addf %243, %258 : vector<16x16xf32>
    %c20 = arith.constant 20 : index
    %260 = memref.load %arg1[%c20] : memref<98xf32, #tpu.memory_space<smem>>
    %261 = vector.extract_strided_slice %249 {offsets = [2, 0], sizes = [16, 16], strides = [1, 1]} : vector<24x128xf32> to vector<16x16xf32>
    %262 = vector.broadcast %260 : f32 to vector<16x16xf32>
    %263 = arith.mulf %261, %262 : vector<16x16xf32>
    %264 = arith.addf %248, %263 : vector<16x16xf32>
    %c27 = arith.constant 27 : index
    %265 = memref.load %arg1[%c27] : memref<98xf32, #tpu.memory_space<smem>>
    %266 = vector.extract_strided_slice %249 {offsets = [3, 0], sizes = [16, 16], strides = [1, 1]} : vector<24x128xf32> to vector<16x16xf32>
    %267 = vector.broadcast %265 : f32 to vector<16x16xf32>
    %268 = arith.mulf %266, %267 : vector<16x16xf32>
    %269 = arith.addf %233, %268 : vector<16x16xf32>
    %c34 = arith.constant 34 : index
    %270 = memref.load %arg1[%c34] : memref<98xf32, #tpu.memory_space<smem>>
    %271 = vector.extract_strided_slice %249 {offsets = [4, 0], sizes = [16, 16], strides = [1, 1]} : vector<24x128xf32> to vector<16x16xf32>
    %272 = vector.broadcast %270 : f32 to vector<16x16xf32>
    %273 = arith.mulf %271, %272 : vector<16x16xf32>
    %274 = arith.addf %254, %273 : vector<16x16xf32>
    %c41 = arith.constant 41 : index
    %275 = memref.load %arg1[%c41] : memref<98xf32, #tpu.memory_space<smem>>
    %276 = vector.extract_strided_slice %249 {offsets = [5, 0], sizes = [16, 16], strides = [1, 1]} : vector<24x128xf32> to vector<16x16xf32>
    %277 = vector.broadcast %275 : f32 to vector<16x16xf32>
    %278 = arith.mulf %276, %277 : vector<16x16xf32>
    %279 = arith.addf %259, %278 : vector<16x16xf32>
    %c48 = arith.constant 48 : index
    %280 = memref.load %arg1[%c48] : memref<98xf32, #tpu.memory_space<smem>>
    %281 = vector.extract_strided_slice %249 {offsets = [6, 0], sizes = [16, 16], strides = [1, 1]} : vector<24x128xf32> to vector<16x16xf32>
    %282 = vector.broadcast %280 : f32 to vector<16x16xf32>
    %283 = arith.mulf %281, %282 : vector<16x16xf32>
    %284 = arith.addf %264, %283 : vector<16x16xf32>
    %c1_39 = arith.constant 1 : index
    %c0_40 = arith.constant 0 : index
    %c0_41 = arith.constant 0 : index
    %285 = vector.load %arg4[%c1_39, %c0_40, %c0_41] : memref<2x24x128xf32, #tpu.memory_space<vmem>>, vector<1x24x128xf32>
    %286 = vector.shape_cast %285 : vector<1x24x128xf32> to vector<24x128xf32>
    %c3_i32_42 = arith.constant 3 : i32
    %287 = tpu.dynamic_rotate %286 by %c3_i32_42 dim 1 : vector<24x128xf32>, i32 -> vector<24x128xf32>
    %c49 = arith.constant 49 : index
    %288 = memref.load %arg1[%c49] : memref<98xf32, #tpu.memory_space<smem>>
    %289 = vector.extract_strided_slice %287 {offsets = [0, 0], sizes = [16, 16], strides = [1, 1]} : vector<24x128xf32> to vector<16x16xf32>
    %290 = vector.broadcast %288 : f32 to vector<16x16xf32>
    %291 = arith.mulf %289, %290 : vector<16x16xf32>
    %292 = arith.addf %274, %291 : vector<16x16xf32>
    %c56 = arith.constant 56 : index
    %293 = memref.load %arg1[%c56] : memref<98xf32, #tpu.memory_space<smem>>
    %294 = vector.extract_strided_slice %287 {offsets = [1, 0], sizes = [16, 16], strides = [1, 1]} : vector<24x128xf32> to vector<16x16xf32>
    %295 = vector.broadcast %293 : f32 to vector<16x16xf32>
    %296 = arith.mulf %294, %295 : vector<16x16xf32>
    %297 = arith.addf %279, %296 : vector<16x16xf32>
    %c63 = arith.constant 63 : index
    %298 = memref.load %arg1[%c63] : memref<98xf32, #tpu.memory_space<smem>>
    %299 = vector.extract_strided_slice %287 {offsets = [2, 0], sizes = [16, 16], strides = [1, 1]} : vector<24x128xf32> to vector<16x16xf32>
    %300 = vector.broadcast %298 : f32 to vector<16x16xf32>
    %301 = arith.mulf %299, %300 : vector<16x16xf32>
    %302 = arith.addf %284, %301 : vector<16x16xf32>
    %c70 = arith.constant 70 : index
    %303 = memref.load %arg1[%c70] : memref<98xf32, #tpu.memory_space<smem>>
    %304 = vector.extract_strided_slice %287 {offsets = [3, 0], sizes = [16, 16], strides = [1, 1]} : vector<24x128xf32> to vector<16x16xf32>
    %305 = vector.broadcast %303 : f32 to vector<16x16xf32>
    %306 = arith.mulf %304, %305 : vector<16x16xf32>
    %307 = arith.addf %269, %306 : vector<16x16xf32>
    %c77 = arith.constant 77 : index
    %308 = memref.load %arg1[%c77] : memref<98xf32, #tpu.memory_space<smem>>
    %309 = vector.extract_strided_slice %287 {offsets = [4, 0], sizes = [16, 16], strides = [1, 1]} : vector<24x128xf32> to vector<16x16xf32>
    %310 = vector.broadcast %308 : f32 to vector<16x16xf32>
    %311 = arith.mulf %309, %310 : vector<16x16xf32>
    %312 = arith.addf %292, %311 : vector<16x16xf32>
    %c84 = arith.constant 84 : index
    %313 = memref.load %arg1[%c84] : memref<98xf32, #tpu.memory_space<smem>>
    %314 = vector.extract_strided_slice %287 {offsets = [5, 0], sizes = [16, 16], strides = [1, 1]} : vector<24x128xf32> to vector<16x16xf32>
    %315 = vector.broadcast %313 : f32 to vector<16x16xf32>
    %316 = arith.mulf %314, %315 : vector<16x16xf32>
    %317 = arith.addf %297, %316 : vector<16x16xf32>
    %c91 = arith.constant 91 : index
    %318 = memref.load %arg1[%c91] : memref<98xf32, #tpu.memory_space<smem>>
    %319 = vector.extract_strided_slice %287 {offsets = [6, 0], sizes = [16, 16], strides = [1, 1]} : vector<24x128xf32> to vector<16x16xf32>
    %320 = vector.broadcast %318 : f32 to vector<16x16xf32>
    %321 = arith.mulf %319, %320 : vector<16x16xf32>
    %322 = arith.addf %302, %321 : vector<16x16xf32>
    %c2_i32_43 = arith.constant 2 : i32
    %323 = tpu.dynamic_rotate %286 by %c2_i32_43 dim 1 : vector<24x128xf32>, i32 -> vector<24x128xf32>
    %c50 = arith.constant 50 : index
    %324 = memref.load %arg1[%c50] : memref<98xf32, #tpu.memory_space<smem>>
    %325 = vector.extract_strided_slice %323 {offsets = [0, 0], sizes = [16, 16], strides = [1, 1]} : vector<24x128xf32> to vector<16x16xf32>
    %326 = vector.broadcast %324 : f32 to vector<16x16xf32>
    %327 = arith.mulf %325, %326 : vector<16x16xf32>
    %328 = arith.addf %312, %327 : vector<16x16xf32>
    %c57 = arith.constant 57 : index
    %329 = memref.load %arg1[%c57] : memref<98xf32, #tpu.memory_space<smem>>
    %330 = vector.extract_strided_slice %323 {offsets = [1, 0], sizes = [16, 16], strides = [1, 1]} : vector<24x128xf32> to vector<16x16xf32>
    %331 = vector.broadcast %329 : f32 to vector<16x16xf32>
    %332 = arith.mulf %330, %331 : vector<16x16xf32>
    %333 = arith.addf %317, %332 : vector<16x16xf32>
    %c64 = arith.constant 64 : index
    %334 = memref.load %arg1[%c64] : memref<98xf32, #tpu.memory_space<smem>>
    %335 = vector.extract_strided_slice %323 {offsets = [2, 0], sizes = [16, 16], strides = [1, 1]} : vector<24x128xf32> to vector<16x16xf32>
    %336 = vector.broadcast %334 : f32 to vector<16x16xf32>
    %337 = arith.mulf %335, %336 : vector<16x16xf32>
    %338 = arith.addf %322, %337 : vector<16x16xf32>
    %c71 = arith.constant 71 : index
    %339 = memref.load %arg1[%c71] : memref<98xf32, #tpu.memory_space<smem>>
    %340 = vector.extract_strided_slice %323 {offsets = [3, 0], sizes = [16, 16], strides = [1, 1]} : vector<24x128xf32> to vector<16x16xf32>
    %341 = vector.broadcast %339 : f32 to vector<16x16xf32>
    %342 = arith.mulf %340, %341 : vector<16x16xf32>
    %343 = arith.addf %307, %342 : vector<16x16xf32>
    %c78 = arith.constant 78 : index
    %344 = memref.load %arg1[%c78] : memref<98xf32, #tpu.memory_space<smem>>
    %345 = vector.extract_strided_slice %323 {offsets = [4, 0], sizes = [16, 16], strides = [1, 1]} : vector<24x128xf32> to vector<16x16xf32>
    %346 = vector.broadcast %344 : f32 to vector<16x16xf32>
    %347 = arith.mulf %345, %346 : vector<16x16xf32>
    %348 = arith.addf %328, %347 : vector<16x16xf32>
    %c85 = arith.constant 85 : index
    %349 = memref.load %arg1[%c85] : memref<98xf32, #tpu.memory_space<smem>>
    %350 = vector.extract_strided_slice %323 {offsets = [5, 0], sizes = [16, 16], strides = [1, 1]} : vector<24x128xf32> to vector<16x16xf32>
    %351 = vector.broadcast %349 : f32 to vector<16x16xf32>
    %352 = arith.mulf %350, %351 : vector<16x16xf32>
    %353 = arith.addf %333, %352 : vector<16x16xf32>
    %c92 = arith.constant 92 : index
    %354 = memref.load %arg1[%c92] : memref<98xf32, #tpu.memory_space<smem>>
    %355 = vector.extract_strided_slice %323 {offsets = [6, 0], sizes = [16, 16], strides = [1, 1]} : vector<24x128xf32> to vector<16x16xf32>
    %356 = vector.broadcast %354 : f32 to vector<16x16xf32>
    %357 = arith.mulf %355, %356 : vector<16x16xf32>
    %358 = arith.addf %338, %357 : vector<16x16xf32>
    %c1_i32_44 = arith.constant 1 : i32
    %359 = tpu.dynamic_rotate %286 by %c1_i32_44 dim 1 : vector<24x128xf32>, i32 -> vector<24x128xf32>
    %c51 = arith.constant 51 : index
    %360 = memref.load %arg1[%c51] : memref<98xf32, #tpu.memory_space<smem>>
    %361 = vector.extract_strided_slice %359 {offsets = [0, 0], sizes = [16, 16], strides = [1, 1]} : vector<24x128xf32> to vector<16x16xf32>
    %362 = vector.broadcast %360 : f32 to vector<16x16xf32>
    %363 = arith.mulf %361, %362 : vector<16x16xf32>
    %364 = arith.addf %348, %363 : vector<16x16xf32>
    %c58 = arith.constant 58 : index
    %365 = memref.load %arg1[%c58] : memref<98xf32, #tpu.memory_space<smem>>
    %366 = vector.extract_strided_slice %359 {offsets = [1, 0], sizes = [16, 16], strides = [1, 1]} : vector<24x128xf32> to vector<16x16xf32>
    %367 = vector.broadcast %365 : f32 to vector<16x16xf32>
    %368 = arith.mulf %366, %367 : vector<16x16xf32>
    %369 = arith.addf %353, %368 : vector<16x16xf32>
    %c65 = arith.constant 65 : index
    %370 = memref.load %arg1[%c65] : memref<98xf32, #tpu.memory_space<smem>>
    %371 = vector.extract_strided_slice %359 {offsets = [2, 0], sizes = [16, 16], strides = [1, 1]} : vector<24x128xf32> to vector<16x16xf32>
    %372 = vector.broadcast %370 : f32 to vector<16x16xf32>
    %373 = arith.mulf %371, %372 : vector<16x16xf32>
    %374 = arith.addf %358, %373 : vector<16x16xf32>
    %c72 = arith.constant 72 : index
    %375 = memref.load %arg1[%c72] : memref<98xf32, #tpu.memory_space<smem>>
    %376 = vector.extract_strided_slice %359 {offsets = [3, 0], sizes = [16, 16], strides = [1, 1]} : vector<24x128xf32> to vector<16x16xf32>
    %377 = vector.broadcast %375 : f32 to vector<16x16xf32>
    %378 = arith.mulf %376, %377 : vector<16x16xf32>
    %379 = arith.addf %343, %378 : vector<16x16xf32>
    %c79 = arith.constant 79 : index
    %380 = memref.load %arg1[%c79] : memref<98xf32, #tpu.memory_space<smem>>
    %381 = vector.extract_strided_slice %359 {offsets = [4, 0], sizes = [16, 16], strides = [1, 1]} : vector<24x128xf32> to vector<16x16xf32>
    %382 = vector.broadcast %380 : f32 to vector<16x16xf32>
    %383 = arith.mulf %381, %382 : vector<16x16xf32>
    %384 = arith.addf %364, %383 : vector<16x16xf32>
    %c86 = arith.constant 86 : index
    %385 = memref.load %arg1[%c86] : memref<98xf32, #tpu.memory_space<smem>>
    %386 = vector.extract_strided_slice %359 {offsets = [5, 0], sizes = [16, 16], strides = [1, 1]} : vector<24x128xf32> to vector<16x16xf32>
    %387 = vector.broadcast %385 : f32 to vector<16x16xf32>
    %388 = arith.mulf %386, %387 : vector<16x16xf32>
    %389 = arith.addf %369, %388 : vector<16x16xf32>
    %c93 = arith.constant 93 : index
    %390 = memref.load %arg1[%c93] : memref<98xf32, #tpu.memory_space<smem>>
    %391 = vector.extract_strided_slice %359 {offsets = [6, 0], sizes = [16, 16], strides = [1, 1]} : vector<24x128xf32> to vector<16x16xf32>
    %392 = vector.broadcast %390 : f32 to vector<16x16xf32>
    %393 = arith.mulf %391, %392 : vector<16x16xf32>
    %394 = arith.addf %374, %393 : vector<16x16xf32>
    %c52 = arith.constant 52 : index
    %395 = memref.load %arg1[%c52] : memref<98xf32, #tpu.memory_space<smem>>
    %396 = vector.extract_strided_slice %286 {offsets = [0, 0], sizes = [16, 16], strides = [1, 1]} : vector<24x128xf32> to vector<16x16xf32>
    %397 = vector.broadcast %395 : f32 to vector<16x16xf32>
    %398 = arith.mulf %396, %397 : vector<16x16xf32>
    %399 = arith.addf %384, %398 : vector<16x16xf32>
    %c59 = arith.constant 59 : index
    %400 = memref.load %arg1[%c59] : memref<98xf32, #tpu.memory_space<smem>>
    %401 = vector.extract_strided_slice %286 {offsets = [1, 0], sizes = [16, 16], strides = [1, 1]} : vector<24x128xf32> to vector<16x16xf32>
    %402 = vector.broadcast %400 : f32 to vector<16x16xf32>
    %403 = arith.mulf %401, %402 : vector<16x16xf32>
    %404 = arith.addf %389, %403 : vector<16x16xf32>
    %c66 = arith.constant 66 : index
    %405 = memref.load %arg1[%c66] : memref<98xf32, #tpu.memory_space<smem>>
    %406 = vector.extract_strided_slice %286 {offsets = [2, 0], sizes = [16, 16], strides = [1, 1]} : vector<24x128xf32> to vector<16x16xf32>
    %407 = vector.broadcast %405 : f32 to vector<16x16xf32>
    %408 = arith.mulf %406, %407 : vector<16x16xf32>
    %409 = arith.addf %394, %408 : vector<16x16xf32>
    %c73 = arith.constant 73 : index
    %410 = memref.load %arg1[%c73] : memref<98xf32, #tpu.memory_space<smem>>
    %411 = vector.extract_strided_slice %286 {offsets = [3, 0], sizes = [16, 16], strides = [1, 1]} : vector<24x128xf32> to vector<16x16xf32>
    %412 = vector.broadcast %410 : f32 to vector<16x16xf32>
    %413 = arith.mulf %411, %412 : vector<16x16xf32>
    %414 = arith.addf %379, %413 : vector<16x16xf32>
    %c80 = arith.constant 80 : index
    %415 = memref.load %arg1[%c80] : memref<98xf32, #tpu.memory_space<smem>>
    %416 = vector.extract_strided_slice %286 {offsets = [4, 0], sizes = [16, 16], strides = [1, 1]} : vector<24x128xf32> to vector<16x16xf32>
    %417 = vector.broadcast %415 : f32 to vector<16x16xf32>
    %418 = arith.mulf %416, %417 : vector<16x16xf32>
    %419 = arith.addf %399, %418 : vector<16x16xf32>
    %c87 = arith.constant 87 : index
    %420 = memref.load %arg1[%c87] : memref<98xf32, #tpu.memory_space<smem>>
    %421 = vector.extract_strided_slice %286 {offsets = [5, 0], sizes = [16, 16], strides = [1, 1]} : vector<24x128xf32> to vector<16x16xf32>
    %422 = vector.broadcast %420 : f32 to vector<16x16xf32>
    %423 = arith.mulf %421, %422 : vector<16x16xf32>
    %424 = arith.addf %404, %423 : vector<16x16xf32>
    %c94 = arith.constant 94 : index
    %425 = memref.load %arg1[%c94] : memref<98xf32, #tpu.memory_space<smem>>
    %426 = vector.extract_strided_slice %286 {offsets = [6, 0], sizes = [16, 16], strides = [1, 1]} : vector<24x128xf32> to vector<16x16xf32>
    %427 = vector.broadcast %425 : f32 to vector<16x16xf32>
    %428 = arith.mulf %426, %427 : vector<16x16xf32>
    %429 = arith.addf %409, %428 : vector<16x16xf32>
    %c127_i32_45 = arith.constant 127 : i32
    %430 = tpu.dynamic_rotate %286 by %c127_i32_45 dim 1 : vector<24x128xf32>, i32 -> vector<24x128xf32>
    %c53 = arith.constant 53 : index
    %431 = memref.load %arg1[%c53] : memref<98xf32, #tpu.memory_space<smem>>
    %432 = vector.extract_strided_slice %430 {offsets = [0, 0], sizes = [16, 16], strides = [1, 1]} : vector<24x128xf32> to vector<16x16xf32>
    %433 = vector.broadcast %431 : f32 to vector<16x16xf32>
    %434 = arith.mulf %432, %433 : vector<16x16xf32>
    %435 = arith.addf %419, %434 : vector<16x16xf32>
    %c60 = arith.constant 60 : index
    %436 = memref.load %arg1[%c60] : memref<98xf32, #tpu.memory_space<smem>>
    %437 = vector.extract_strided_slice %430 {offsets = [1, 0], sizes = [16, 16], strides = [1, 1]} : vector<24x128xf32> to vector<16x16xf32>
    %438 = vector.broadcast %436 : f32 to vector<16x16xf32>
    %439 = arith.mulf %437, %438 : vector<16x16xf32>
    %440 = arith.addf %424, %439 : vector<16x16xf32>
    %c67 = arith.constant 67 : index
    %441 = memref.load %arg1[%c67] : memref<98xf32, #tpu.memory_space<smem>>
    %442 = vector.extract_strided_slice %430 {offsets = [2, 0], sizes = [16, 16], strides = [1, 1]} : vector<24x128xf32> to vector<16x16xf32>
    %443 = vector.broadcast %441 : f32 to vector<16x16xf32>
    %444 = arith.mulf %442, %443 : vector<16x16xf32>
    %445 = arith.addf %429, %444 : vector<16x16xf32>
    %c74 = arith.constant 74 : index
    %446 = memref.load %arg1[%c74] : memref<98xf32, #tpu.memory_space<smem>>
    %447 = vector.extract_strided_slice %430 {offsets = [3, 0], sizes = [16, 16], strides = [1, 1]} : vector<24x128xf32> to vector<16x16xf32>
    %448 = vector.broadcast %446 : f32 to vector<16x16xf32>
    %449 = arith.mulf %447, %448 : vector<16x16xf32>
    %450 = arith.addf %414, %449 : vector<16x16xf32>
    %c81 = arith.constant 81 : index
    %451 = memref.load %arg1[%c81] : memref<98xf32, #tpu.memory_space<smem>>
    %452 = vector.extract_strided_slice %430 {offsets = [4, 0], sizes = [16, 16], strides = [1, 1]} : vector<24x128xf32> to vector<16x16xf32>
    %453 = vector.broadcast %451 : f32 to vector<16x16xf32>
    %454 = arith.mulf %452, %453 : vector<16x16xf32>
    %455 = arith.addf %435, %454 : vector<16x16xf32>
    %c88 = arith.constant 88 : index
    %456 = memref.load %arg1[%c88] : memref<98xf32, #tpu.memory_space<smem>>
    %457 = vector.extract_strided_slice %430 {offsets = [5, 0], sizes = [16, 16], strides = [1, 1]} : vector<24x128xf32> to vector<16x16xf32>
    %458 = vector.broadcast %456 : f32 to vector<16x16xf32>
    %459 = arith.mulf %457, %458 : vector<16x16xf32>
    %460 = arith.addf %440, %459 : vector<16x16xf32>
    %c95 = arith.constant 95 : index
    %461 = memref.load %arg1[%c95] : memref<98xf32, #tpu.memory_space<smem>>
    %462 = vector.extract_strided_slice %430 {offsets = [6, 0], sizes = [16, 16], strides = [1, 1]} : vector<24x128xf32> to vector<16x16xf32>
    %463 = vector.broadcast %461 : f32 to vector<16x16xf32>
    %464 = arith.mulf %462, %463 : vector<16x16xf32>
    %465 = arith.addf %445, %464 : vector<16x16xf32>
    %c126_i32_46 = arith.constant 126 : i32
    %466 = tpu.dynamic_rotate %286 by %c126_i32_46 dim 1 : vector<24x128xf32>, i32 -> vector<24x128xf32>
    %c54 = arith.constant 54 : index
    %467 = memref.load %arg1[%c54] : memref<98xf32, #tpu.memory_space<smem>>
    %468 = vector.extract_strided_slice %466 {offsets = [0, 0], sizes = [16, 16], strides = [1, 1]} : vector<24x128xf32> to vector<16x16xf32>
    %469 = vector.broadcast %467 : f32 to vector<16x16xf32>
    %470 = arith.mulf %468, %469 : vector<16x16xf32>
    %471 = arith.addf %455, %470 : vector<16x16xf32>
    %c61 = arith.constant 61 : index
    %472 = memref.load %arg1[%c61] : memref<98xf32, #tpu.memory_space<smem>>
    %473 = vector.extract_strided_slice %466 {offsets = [1, 0], sizes = [16, 16], strides = [1, 1]} : vector<24x128xf32> to vector<16x16xf32>
    %474 = vector.broadcast %472 : f32 to vector<16x16xf32>
    %475 = arith.mulf %473, %474 : vector<16x16xf32>
    %476 = arith.addf %460, %475 : vector<16x16xf32>
    %c68 = arith.constant 68 : index
    %477 = memref.load %arg1[%c68] : memref<98xf32, #tpu.memory_space<smem>>
    %478 = vector.extract_strided_slice %466 {offsets = [2, 0], sizes = [16, 16], strides = [1, 1]} : vector<24x128xf32> to vector<16x16xf32>
    %479 = vector.broadcast %477 : f32 to vector<16x16xf32>
    %480 = arith.mulf %478, %479 : vector<16x16xf32>
    %481 = arith.addf %465, %480 : vector<16x16xf32>
    %c75 = arith.constant 75 : index
    %482 = memref.load %arg1[%c75] : memref<98xf32, #tpu.memory_space<smem>>
    %483 = vector.extract_strided_slice %466 {offsets = [3, 0], sizes = [16, 16], strides = [1, 1]} : vector<24x128xf32> to vector<16x16xf32>
    %484 = vector.broadcast %482 : f32 to vector<16x16xf32>
    %485 = arith.mulf %483, %484 : vector<16x16xf32>
    %486 = arith.addf %450, %485 : vector<16x16xf32>
    %c82 = arith.constant 82 : index
    %487 = memref.load %arg1[%c82] : memref<98xf32, #tpu.memory_space<smem>>
    %488 = vector.extract_strided_slice %466 {offsets = [4, 0], sizes = [16, 16], strides = [1, 1]} : vector<24x128xf32> to vector<16x16xf32>
    %489 = vector.broadcast %487 : f32 to vector<16x16xf32>
    %490 = arith.mulf %488, %489 : vector<16x16xf32>
    %491 = arith.addf %471, %490 : vector<16x16xf32>
    %c89 = arith.constant 89 : index
    %492 = memref.load %arg1[%c89] : memref<98xf32, #tpu.memory_space<smem>>
    %493 = vector.extract_strided_slice %466 {offsets = [5, 0], sizes = [16, 16], strides = [1, 1]} : vector<24x128xf32> to vector<16x16xf32>
    %494 = vector.broadcast %492 : f32 to vector<16x16xf32>
    %495 = arith.mulf %493, %494 : vector<16x16xf32>
    %496 = arith.addf %476, %495 : vector<16x16xf32>
    %c96 = arith.constant 96 : index
    %497 = memref.load %arg1[%c96] : memref<98xf32, #tpu.memory_space<smem>>
    %498 = vector.extract_strided_slice %466 {offsets = [6, 0], sizes = [16, 16], strides = [1, 1]} : vector<24x128xf32> to vector<16x16xf32>
    %499 = vector.broadcast %497 : f32 to vector<16x16xf32>
    %500 = arith.mulf %498, %499 : vector<16x16xf32>
    %501 = arith.addf %481, %500 : vector<16x16xf32>
    %c125_i32_47 = arith.constant 125 : i32
    %502 = tpu.dynamic_rotate %286 by %c125_i32_47 dim 1 : vector<24x128xf32>, i32 -> vector<24x128xf32>
    %c55 = arith.constant 55 : index
    %503 = memref.load %arg1[%c55] : memref<98xf32, #tpu.memory_space<smem>>
    %504 = vector.extract_strided_slice %502 {offsets = [0, 0], sizes = [16, 16], strides = [1, 1]} : vector<24x128xf32> to vector<16x16xf32>
    %505 = vector.broadcast %503 : f32 to vector<16x16xf32>
    %506 = arith.mulf %504, %505 : vector<16x16xf32>
    %507 = arith.addf %491, %506 : vector<16x16xf32>
    %c62 = arith.constant 62 : index
    %508 = memref.load %arg1[%c62] : memref<98xf32, #tpu.memory_space<smem>>
    %509 = vector.extract_strided_slice %502 {offsets = [1, 0], sizes = [16, 16], strides = [1, 1]} : vector<24x128xf32> to vector<16x16xf32>
    %510 = vector.broadcast %508 : f32 to vector<16x16xf32>
    %511 = arith.mulf %509, %510 : vector<16x16xf32>
    %512 = arith.addf %496, %511 : vector<16x16xf32>
    %c69 = arith.constant 69 : index
    %513 = memref.load %arg1[%c69] : memref<98xf32, #tpu.memory_space<smem>>
    %514 = vector.extract_strided_slice %502 {offsets = [2, 0], sizes = [16, 16], strides = [1, 1]} : vector<24x128xf32> to vector<16x16xf32>
    %515 = vector.broadcast %513 : f32 to vector<16x16xf32>
    %516 = arith.mulf %514, %515 : vector<16x16xf32>
    %517 = arith.addf %501, %516 : vector<16x16xf32>
    %c76 = arith.constant 76 : index
    %518 = memref.load %arg1[%c76] : memref<98xf32, #tpu.memory_space<smem>>
    %519 = vector.extract_strided_slice %502 {offsets = [3, 0], sizes = [16, 16], strides = [1, 1]} : vector<24x128xf32> to vector<16x16xf32>
    %520 = vector.broadcast %518 : f32 to vector<16x16xf32>
    %521 = arith.mulf %519, %520 : vector<16x16xf32>
    %522 = arith.addf %486, %521 : vector<16x16xf32>
    %c83 = arith.constant 83 : index
    %523 = memref.load %arg1[%c83] : memref<98xf32, #tpu.memory_space<smem>>
    %524 = vector.extract_strided_slice %502 {offsets = [4, 0], sizes = [16, 16], strides = [1, 1]} : vector<24x128xf32> to vector<16x16xf32>
    %525 = vector.broadcast %523 : f32 to vector<16x16xf32>
    %526 = arith.mulf %524, %525 : vector<16x16xf32>
    %527 = arith.addf %507, %526 : vector<16x16xf32>
    %c90 = arith.constant 90 : index
    %528 = memref.load %arg1[%c90] : memref<98xf32, #tpu.memory_space<smem>>
    %529 = vector.extract_strided_slice %502 {offsets = [5, 0], sizes = [16, 16], strides = [1, 1]} : vector<24x128xf32> to vector<16x16xf32>
    %530 = vector.broadcast %528 : f32 to vector<16x16xf32>
    %531 = arith.mulf %529, %530 : vector<16x16xf32>
    %532 = arith.addf %512, %531 : vector<16x16xf32>
    %c97 = arith.constant 97 : index
    %533 = memref.load %arg1[%c97] : memref<98xf32, #tpu.memory_space<smem>>
    %534 = vector.extract_strided_slice %502 {offsets = [6, 0], sizes = [16, 16], strides = [1, 1]} : vector<24x128xf32> to vector<16x16xf32>
    %535 = vector.broadcast %533 : f32 to vector<16x16xf32>
    %536 = arith.mulf %534, %535 : vector<16x16xf32>
    %537 = arith.addf %517, %536 : vector<16x16xf32>
    %538 = arith.addf %527, %532 : vector<16x16xf32>
    %539 = arith.addf %537, %522 : vector<16x16xf32>
    %540 = arith.addf %538, %539 : vector<16x16xf32>
    %541 = arith.negf %540 : vector<16x16xf32>
    %542 = math.exp %541 : vector<16x16xf32>
    %cst_48 = arith.constant 1.000000e+00 : f32
    %543 = vector.broadcast %cst_48 : f32 to vector<16x16xf32>
    %544 = arith.addf %543, %542 : vector<16x16xf32>
    %545 = arith.divf %543, %544 : vector<16x16xf32>
    %546 = vector.shape_cast %545 : vector<16x16xf32> to vector<1x16x16xf32>
    %547 = vector.broadcast %546 : vector<1x16x16xf32> to vector<4x16x16xf32>
    %548 = arith.mulf %1, %547 : vector<4x16x16xf32>
    %c0_49 = arith.constant 0 : index
    %c0_50 = arith.constant 0 : index
    %c0_51 = arith.constant 0 : index
    %c0_52 = arith.constant 0 : index
    %549 = vector.load %arg3[%c0_49, %c0_50, %c0_51, %c0_52] : memref<1x4x16x16xf32, #tpu.memory_space<vmem>>, vector<1x4x16x16xf32>
    %550 = vector.shape_cast %549 : vector<1x4x16x16xf32> to vector<4x16x16xf32>
    %551 = vector.shape_cast %548 : vector<4x16x16xf32> to vector<1x4x16x16xf32>
    tpu.vector_store %arg3[%c0_49, %c0_50, %c0_51, %c0_52], %551 {strides = array<i32>} : memref<1x4x16x16xf32, #tpu.memory_space<vmem>>, vector<1x4x16x16xf32>,
    return
  }
  func.func @transform_0(%arg0: i32) -> i32 {
    %c0_i32 = arith.constant 0 : i32
    %c0_i32_0 = arith.constant 0 : i32
    return %c0_i32 : i32
  }
  func.func @transform_1(%arg0: i32) -> (i32, i32, i32, i32) {
    %c0_i32 = arith.constant 0 : i32
    %c0_i32_0 = arith.constant 0 : i32
    %c0_i32_1 = arith.constant 0 : i32
    %c0_i32_2 = arith.constant 0 : i32
    return %arg0, %c0_i32, %c0_i32_0, %c0_i32_1 : i32, i32, i32, i32
  }
  func.func @transform_2(%arg0: i32) -> (i32, i32, i32, i32) {
    %c0_i32 = arith.constant 0 : i32
    %c0_i32_0 = arith.constant 0 : i32
    %c0_i32_1 = arith.constant 0 : i32
    %c0_i32_2 = arith.constant 0 : i32
    return %arg0, %c0_i32, %c0_i32_0, %c0_i32_1 : i32, i32, i32, i32
  }
}

</mosaic_0001>

<bundles_post_ra>
// kernel: tpu_custom_call.1
= control target key start
LH: loop header
LB: loop body
LE: loop exit
PB: predicated region body
PF: predicated region fallthrough
CT: control target
= control target key end

     0   :  { %s3435_s0 = inlined_call_operand.hbm [shape: f32[98], index: 0, kind: input, shape index: {}]   ;;  %s3436_s1 = inlined_call_operand.hbm [shape: f32[2,4,16,16], index: 1, kind: input, shape index: {}]   ;;  %s3437_s2 = inlined_call_operand.hbm [shape: f32[2,4,16,16], index: 2, kind: output, shape index: {}]  }
   0x1   :  { %3515 = sst [smem:[#allocation114_spill]] %s3435_s0 }
   0x2   :  { %3516 = sst [smem:[#allocation115_spill]] %s3436_s1 }
   0x3   :  { %3517 = sst [smem:[#allocation116_spill]] %s3437_s2 }
   0x4   :  { %7 = vsyncpa [#allocation6], 0 }
   0x5   :  { %8 = vsyncpa [#allocation4], 0 }
   0x6   :  { %10 = vsyncpa [#allocation4 + $0x1], 0 }
   0x7   :  { %11 = vsyncpa [#allocation5], 0 }
   0x8   :  { %13 = vsyncpa [#allocation5 + $0x1], 0  ;;  %s2000_s9 = smov 0   ;;  %s2002_s10 = smov 0  }
   0x9   :  { %s2004_s11 = smov 0   ;;  %s2006_s12 = smov 0  }
   0xa LB: > { %3518 = sst [smem:[#allocation12_spill]] %s1957_s9  ;;  %s2021_s13 = sadd.s32 4294967295, %s1969_s12   ;;  %s1969_s12 = sphi %s2006_s12, %s3774_s12   ;;  %s1965_s11 = sphi %s2004_s11, %s3777_s11   ;;  %s1961_s10 = sphi %s2002_s10, %s3776_s10   ;;  %s1957_s9 = sphi %s2000_s9, %s3775_s9  }
   0xb   : > { %3519 = sst [smem:[#allocation13_spill]] %s1961_s10  ;;  %s1652_s14 = sadd.s32 4294967294, %s1969_s12  }
   0xc   : > { %3520 = sst [smem:[#allocation14_spill]] %s1965_s11  ;;  %s2025_s15 = sadd.s32 1, %s1969_s12  }
   0xd   : > { %3521 = sst [smem:[#allocation15_spill]] %s1969_s12  ;;  %s47_s16 = sadd.s32 1, %s1965_s11 }
   0xe   : > { %3522 = sst [smem:[#allocation16_spill]] %s2021_s13  ;;  %s44_s17 = ssub.s32 %s1969_s12, %s2025_s15 }
   0xf   : > { %3523 = sst [smem:[#allocation17_spill]] %s2025_s15  ;;  %p54_p0 = scmp.ne.s32.totalorder %s1965_s11, %s1961_s10 }
  0x10   : > { %p45_p1 = scmp.eq.s32.totalorder %s44_s17, 0  ;;  %p55_p2 = scmp.eq.s32.totalorder %s1969_s12, 0 }
  0x11   : > { %p60_p3 = scmp.ne.s32.totalorder %s1961_s10, %s1957_s9  ;;  %p3438_p4 = scmp.eq.s32.totalorder %s2021_s13, 0 }
  0x12   : > { %s2037_s18 = scalar_select %p45_p1, %s1965_s11, %s47_s16  }
  0x13   : > { %p2039_p5 = por %p55_p2, %p54_p0  ;;  %p2045_p6 = por %p3438_p4, %p60_p3 }
  0x14   : > { %3524 = sst [smem:[#allocation18_spill]] %s2037_s18  ;;  %p84_p7 = scmp.eq.s32.totalorder %s2021_s13, 1 }
  0x15   : > { %s3526_s20 = scalar_select %p2045_p6, 1, 0 }
  0x16   : > { %p90_p8 = scmp.eq.s32.totalorder %s1652_s14, 1  ;;  %p1653_p9 = scmp.ge.s32.totalorder %s1969_s12, 1 }
  0x17   : > { %p97_p10 = scmp.lt.s32.totalorder %s1969_s12, 3  ;;  %p2052_p11 = por %p84_p7, %p54_p0 }
  0x18   : > { %p2056_p12 = por %p90_p8, %p60_p3  ;;  %p1790_p4 = scmp.lt.s32.totalorder %s1969_s12, 2 }
  0x19   : > { %s3527_s21 = scalar_select %p2052_p11, 1, 0 }
  0x1a   : > { %s3529_s22 = scalar_select %p2056_p12, 1, 0 }
  0x1b   : > { %3528 = sst [smem:[#allocation19_spill]] %s3527_s21  ;;  %p2060_p13 = pnand %p1653_p9, %p97_p10 }
  0x1c   : > { %3530 = sst [smem:[#allocation20_spill]] %s3529_s22  ;;  %s119_s24 = sand.u32 1, %s1965_s11  }
  0x1d   : > { %p1777_p2 = pneg %p2060_p13  ;;  %s1767_s25 = sshll.u32 %s1969_s12, 10 }
  0x1e   : > { %p3532_p6 = scmp.eq.s32.totalorder %s2021_s13, 0  ;;  %p2074_p7 = pnand %p1790_p4, %p2039_p5 }
  0x1f   : > { %s1656_s27 = sshll.u32 %s119_s24, 6  ;;  %s3534_s0 = sld [smem:[#allocation114_spill]] }
  0x20   : > { %p1778_p0 = pnand %p1777_p2, %p3532_p6 }
  0x22   : > { %p1858_p8 = pneg %p1778_p0 }
  0x25   : > { %s1856_s30 = scalar_lea.hbm %s3534_s0, 16 }
  0x26   : > { %p1857_p3 = scmp.ne.s32.totalorder %s3534_s0, %s1856_s30  ;;  %p1863_p6 = scmp.lt.u32.totalorder %s1856_s30, %s3534_s0 }
  0x28   : > { %p1859_p9 = pnand %p1858_p8, %p1857_p3 }
  0x2a   : > { %p1860_p10 = pneg %p1859_p9 }
  0x2c   : > { %p1865_p4 = pnand %p1863_p6, %p1860_p10 }
  0x2e   : > { %1868 = shalt.err (!%p1865_p4)
}
  0x2f   : > { %s1971_s7 = smov [#allocation3]   ;;  %s3535_s1 = sld [smem:[#allocation115_spill]] }
  0x30   : > { %1780 = dma.hbm_to_smem (!%p1778_p0), %s3534_s0, 16, %s1971_s7, [#allocation6]  }
  0x31   : > { %s123_s28 = scalar_lea.vmem [#allocation7], %s1656_s27  ;;  %s2097_s30 = scalar_lea.sflag [#allocation4], %s119_s24 }
  0x32   : > { %s130_s29 = sshll.u32 %s123_s28, 4  ;;  %p1871_p2 = pneg %p2074_p7  ;;  %s2095_s29 = int_to_ptr.vmem [resolvable:$true] %s130_s29 }
  0x35   : > { %s2093_s19 = scalar_lea.hbm %s3535_s1, %s1767_s25  ;;  %s1874_s5 = scalar_lea.hbm %s3535_s1, 2048 }
  0x36   : > { %s1869_s3 = scalar_lea.hbm %s2093_s19, 1024  ;;  %p1875_p8 = scmp.lt.u32.totalorder %s2093_s19, %s3535_s1 }
  0x37   : > { %p1870_p5 = scmp.ne.s32.totalorder %s2093_s19, %s1869_s3  ;;  %p1876_p9 = scmp.lt.u32.totalorder %s1874_s5, %s1869_s3 }
  0x38   : > { %p1878_p6 = scmp.lt.u32.totalorder %s1869_s3, %s2093_s19 }
  0x39   : > { %p1872_p0 = pnand %p1871_p2, %p1870_p5  ;;  %p1877_p10 = por %p1876_p9, %p1875_p8 }
  0x3b   : > { %p1873_p3 = pneg %p1872_p0  ;;  %p1879_p4 = por %p1878_p6, %p1877_p10 }
  0x3d   : > { %p1880_p1 = pnand %p1879_p4, %p1873_p3 }
  0x3f   : > { %1883 = shalt.err (!%p1880_p1)
}
  0x40   : > { %s1884_s24 = scalar_lea.vmem %s2095_s29, 1024  ;;  %s1972_s27 = smov [#allocation7]  }
  0x41   : > { %p1885_p5 = scmp.ne.s32.totalorder %s2095_s29, %s1884_s24  ;;  %s1889_s8 = sshll.u32 %s1972_s27, 4  ;;  %s1890_s8 = int_to_ptr.vmem [resolvable:$false] %s1889_s8 }
  0x42   : > { %s1891_s14 = scalar_lea.vmem %s1890_s8, 2048  ;;  %p1892_p11 = scmp.lt.s32.totalorder %s2095_s29, %s1890_s8 }
  0x43   : > { %p1887_p0 = pnand %p1885_p5, %p1871_p2  ;;  %p1893_p8 = scmp.lt.s32.totalorder %s1891_s14, %s1884_s24 }
  0x45   : > { %p1888_p12 = pneg %p1887_p0  ;;  %p1894_p9 = por %p1893_p8, %p1892_p11 }
  0x47   : > { %p1895_p10 = pnand %p1894_p9, %p1888_p12 }
  0x49   : > { %1898 = shalt.err (!%p1895_p10)
}
  0x4a   : > { %s1973_s16 = smov 128   ;;  %s1974_s17 = smov 8  }
  0x4b   : > { %1784 = dma.hbm_to_vmem [thread:$0]  (!%p2074_p7), %s2093_s19, 1024, %s2095_s29, %s2097_s30, %s1973_s16, %s1973_s16, %s1974_s17  }
  0x4c   : > { %142 = sbr.rel (%p2060_p13) target bundleno = 465 (0x1d1), region = 28 }
  0x53   : > { %p3536_p1 = scmp.eq.s32.totalorder %s2021_s13, 0 }
  0x55   : > { %1944 = dma.done.wait (%p3536_p1), [#allocation6], 16   ;;  %p3537_p2 = pmov %p3536_p1 }
  0x56   : > { %s2132_s28 = sand.u32 1, %s1961_s10   ;;  %p3540_p11 = scmp.ne.s32.totalorder %s3526_s20, 0 }
  0x57   : > { %1946 = vsyncadd (%p3537_p2), [#allocation6], 4294967280  ;;  %3538 = sst [smem:[#allocation21_spill]] %s2132_s28  ;;  %s3441_s3 = sshll.u32 %s2132_s28, 6 }
  0x58   : > { %s149_s25 = scalar_lea.sflag [#allocation4], %s2132_s28  ;;  %s2138_s26 = scalar_lea.vmem [#allocation7], %s3441_s3 }
  0x59   : > { %3539 = sst [smem:[#allocation22_spill]] %s2138_s26 }
  0x5a   : > { %1948 = dma.done.wait (%p3540_p11), %s149_s25, 1024  }
  0x5b   : > { %1950 = vsyncadd (%p3540_p11), %s149_s25, 4294966272 }
  0x5c   : > { %157 = sfence }
  0x5d   : > { %v175_v0 = vld [vmem:[%s2138_s26 + $0x8] sm:$0xff]  ;;  %v177_v1 = vld [vmem:[%s2138_s26 + $0x18] sm:$0xff]  ;;  %vm182_vm0 = vcmask 130048   ;;  %vm215_vm1 = vcmask 1047680   ;;  %v1975_v8 = vmov 0.0   ;;  %v174_v13 = vld [vmem:[%s2138_s26] sm:$0xff] }
  0x5e   : > { %v179_v2 = vld [vmem:[%s2138_s26 + $0x28] sm:$0xff]  ;;  %v181_v3 = vld [vmem:[%s2138_s26 + $0x38] sm:$0xff]  ;;  %v190_v4 = vsel %vm182_vm0, %v175_v0, 0.0  ;;  %v191_v5 = vsel %vm182_vm0, %v177_v1, 0.0  ;;  %v207_v7 = vsel %vm182_vm0, %v177_v1, -inf  ;;  %217 = vst.msk [vmem:[#allocation2 + $0xb] sm:$0xff] %vm215_vm1, %v1975_v8 }
  0x5f   : > { %v193_v6 = vsel %vm182_vm0, %v179_v2, 0.0  ;;  %214 = vst [vmem:[#allocation2 + $0x13] sm:$0x1f] %v1975_v8  ;;  %213 = vst [vmem:[#allocation2] sm:$0x7] %v1975_v8  ;;  %v192_v9 = vadd.f32 %v191_v5, %v190_v4  ;;  %v195_v10 = vsel %vm182_vm0, %v181_v3, 0.0 }
  0x60   : > { %216 = vst.msk [vmem:[#allocation2 + $0x3] sm:$0xff] %vm215_vm1, %v1975_v8  ;;  %219 = vst [vmem:[#allocation2 + $0x18] sm:$0x7] %v1975_v8  ;;  %v208_v11 = vsel %vm182_vm0, %v179_v2, -inf  ;;  %v210_v12 = vsel %vm182_vm0, %v181_v3, -inf  ;;  %v176_v14 = vld [vmem:[%s2138_s26 + $0x10] sm:$0xff] }
  0x61   : > { %220 = vst [vmem:[#allocation2 + $0x2b] sm:$0x1f] %v1975_v8  ;;  %221 = vst.msk [vmem:[#allocation2 + $0x1b] sm:$0xff] %vm215_vm1, %v1975_v8  ;;  %v178_v15 = vld [vmem:[%s2138_s26 + $0x20] sm:$0xff]  ;;  %v211_v16 = vmax.f32 %v207_v7, %v210_v12  ;;  %v180_v17 = vld [vmem:[%s2138_s26 + $0x30] sm:$0xff]  ;;  %v183_v18 = vsel %vm182_vm0, %v174_v13, 0.0  ;;  %v194_v21 = vadd.f32 %v193_v6, %v192_v9 }
  0x62   : > { %222 = vst.msk [vmem:[#allocation2 + $0x23] sm:$0xff] %vm215_vm1, %v1975_v8  ;;  %v184_v19 = vsel %vm182_vm0, %v176_v14, 0.0  ;;  %v186_v20 = vsel %vm182_vm0, %v178_v15, 0.0  ;;  %v188_v23 = vsel %vm182_vm0, %v180_v17, 0.0  ;;  %v199_v24 = vsel %vm182_vm0, %v174_v13, -inf  ;;  %s1976_s20 = smov 3  }
  0x63   : > { %v185_v22 = vadd.f32 %v184_v19, %v183_v18  ;;  %v200_v25 = vsel %vm182_vm0, %v176_v14, -inf  ;;  %v201_v26 = vsel %vm182_vm0, %v178_v15, -inf  ;;  %v203_v27 = vsel %vm182_vm0, %v180_v17, -inf  ;;  %s1977_s23 = smov 2   ;;  %s1978_s19 = smov 1  }
  0x64   : > { %v206_v28 = vsel %vm182_vm0, %v175_v0, -inf  ;;  %v196_v29 = vadd.f32 %v195_v10, %v194_v21  ;;  %v202_v31 = vmax.f32 %v199_v24, %v201_v26  ;;  %v204_v32 = vmax.f32 %v200_v25, %v203_v27  ;;  %s1688_s29 = sld [smem:[#allocation3 + $0x26]]  ;;  %s1689_s30 = sld [smem:[#allocation3 + $0x2d]] }
  0x65   : > { %v187_v30 = vadd.f32 %v186_v20, %v185_v22  ;;  %v209_v33 = vmax.f32 %v206_v28, %v208_v11  ;;  %s1979_s4 = smov 127   ;;  %s1980_s5 = smov 126   ;;  %vm263_vm2 = vcmask 1043456   ;;  %vm1488_vm3 = vcmask 1046528  }
  0x66   : > { %v198_v34 = vmul.f32 0.25, %v196_v29  ;;  %v205_v36 = vmax.f32 %v202_v31, %v204_v32  ;;  %s1687_s6 = sld [smem:[#allocation3 + $0x1f]]  ;;  %s1981_s7 = smov 125   ;;  %vm1515_vm4 = vcmask 1045504  }
  0x67   : > { %v189_v35 = vadd.f32 %v188_v23, %v187_v30  ;;  %v212_v37 = vmax.f32 %v209_v33, %v211_v16  ;;  %s2289_s24 = sld [smem:[#allocation3 + $0x7]]  ;;  %s2291_s27 = sld [smem:[#allocation3 + $0xe]] }
  0x68   : > { %224 = vst.msk [vmem:[#allocation2 + $0xb] sm:$0xff] %vm182_vm0, %v198_v34  ;;  %225 = vst.msk [vmem:[#allocation2 + $0x1b] sm:$0xff] %vm182_vm0, %v205_v36  ;;  %s2293_s8 = sld [smem:[#allocation3 + $0x15]]  ;;  %s2297_s14 = sld [smem:[#allocation3 + $0x1c]] }
  0x69   : > { %v197_v38 = vmul.f32 0.25, %v189_v35  ;;  %226 = vst.msk [vmem:[#allocation2 + $0x23] sm:$0xff] %vm182_vm0, %v212_v37  ;;  %s2299_s16 = sld [smem:[#allocation3 + $0x23]]  ;;  %s2301_s17 = sld [smem:[#allocation3 + $0x2a]] }
  0x6a   : > { %v541_v42 = vstv %s1688_s29  ;;  %v560_v43 = vstv %s1689_s30  ;;  %s2303_s25 = sld [smem:[#allocation3]]  ;;  %s2313_s29 = sld [smem:[#allocation3 + $0x16]] }
  0x6b   : > { %223 = vst.msk [vmem:[#allocation2 + $0x3] sm:$0xff] %vm182_vm0, %v197_v38  ;;  %s2315_s30 = sld [smem:[#allocation3 + $0x1d]]  ;;  %s2323_s3 = sld [smem:[#allocation3 + $0x9]] }
  0x6c   : > { %v524_v57 = vstv %s1687_s6  ;;  %s2321_s6 = sld [smem:[#allocation3 + $0x2]]  ;;  %s2325_s0 = sld [smem:[#allocation3 + $0x10]] }
  0x6d   : > { %s2329_s1 = sld [smem:[#allocation3 + $0x1e]]  ;;  %s2331_s18 = sld [smem:[#allocation3 + $0x4]]  ;;  %v2384_v8 = vstv %s2289_s24  ;;  %v2387_v9 = vstv %s2291_s27 }
  0x6e   : > { %s2333_s11 = sld [smem:[#allocation3 + $0x25]]  ;;  %s2335_s10 = sld [smem:[#allocation3 + $0x2c]]  ;;  %v2390_v10 = vstv %s2293_s8  ;;  %v2393_v11 = vstv %s2297_s14 }
  0x6f   : > { %v2172_v39 = vld [vmem:[#allocation2 + $0x10] sm:$0xff]  ;;  %v2236_v62 = vld [vmem:[#allocation2 + $0x18] sm:$0xff]  ;;  %s2337_s15 = sld [smem:[#allocation3 + $0x18]]  ;;  %s2339_s12 = sld [smem:[#allocation3 + $0x3]]  ;;  %v2400_v12 = vstv %s2299_s16  ;;  %v2403_v13 = vstv %s2301_s17 }
  0x70   : > { %234 = vrot.lane.b32.xlu1 %v2172_v39, %s1976_s20  ;;  %v2215_v50 = vmul.f32 %v541_v42, %v2172_v39  ;;  %v2218_v51 = vmul.f32 %v560_v43, %v2172_v39  ;;  %v2222_v54 = vld [vmem:[#allocation2 + $0x20] sm:$0xff]  ;;  %v527_v1 = vmul.f32 %v524_v57, %v2172_v39  ;;  %v2256_v5 = vld [vmem:[#allocation2 + $0x28] sm:$0xff]  ;;  %3549 = sst [smem:[#allocation31_spill]] %s2303_s25  ;;  %s2341_s22 = sld [smem:[#allocation3 + $0xa]]  ;;  %v2418_v18 = vstv %s2313_s29 }
  0x71   : > { %s2343_s9 = sld [smem:[#allocation3 + $0x11]]  ;;  %s2345_s21 = sld [smem:[#allocation3 + $0xb]]  ;;  %v2421_v19 = vstv %s2315_s30  ;;  %v2435_v23 = vstv %s2323_s3 }
  0x72   : > { %v2176_v40 = vld [vmem:[#allocation2] sm:$0xff]  ;;  %v2180_v41 = vld [vmem:[#allocation2 + $0x8] sm:$0xff]  ;;  %3541 = vst [vmem:[#allocation23_spill] sm:$0xff] %v2215_v50  ;;  %3542 = vst [vmem:[#allocation24_spill] sm:$0xff] %v2218_v51  ;;  %v3469_v58 = vrot.slane %v2215_v50, 4  ;;  %v3468_v59 = vrot.slane %v2218_v51, 4  ;;  %v2442_v24 = vstv %s2325_s0 }
  0x73   : > { %230 = vrot.lane.b32.xlu0 %v2176_v40, %s1976_s20  ;;  %v543_v44 = vmul.f32 %v541_v42, %v2180_v41  ;;  %v562_v45 = vmul.f32 %v560_v43, %v2180_v41  ;;  %v542_v48 = vmul.f32 %v541_v42, %v2176_v40  ;;  %v561_v49 = vmul.f32 %v560_v43, %v2176_v40  ;;  %3551 = sst [smem:[#allocation33_spill]] %s2321_s6  ;;  %s2347_s2 = sld [smem:[#allocation3 + $0x12]] }
  0x74   : > { %311 = vrot.lane.b32.xlu1 %v2176_v40, %s1977_s23  ;;  %v526_v60 = vmul.f32 %v524_v57, %v2180_v41  ;;  %v525_v61 = vmul.f32 %v524_v57, %v2176_v40  ;;  %v534_v6 = vrot.slane %v527_v1, 4  ;;  %3552 = sst [smem:[#allocation34_spill]] %s2331_s18  ;;  %s2349_s26 = sld [smem:[#allocation3 + $0x19]]  ;;  %v2448_v26 = vstv %s2329_s1 }
  0x75   : > { %v549_v46 = vrot.slane %v543_v44, 4  ;;  %v568_v47 = vrot.slane %v562_v45, 4  ;;  %v548_v52 = vrot.slane %v542_v48, 4  ;;  %v567_v53 = vrot.slane %v561_v49, 4  ;;  %3553 = sst [smem:[#allocation35_spill]] %s2335_s10  ;;  %s2351_s28 = sld [smem:[#allocation3 + $0x20]] }
  0x76   : > { %v532_v63 = vrot.slane %v526_v60, 4  ;;  %v531_v0 = vrot.slane %v525_v61, 4  ;;  %3554 = sst [smem:[#allocation36_spill]] %s2337_s15  ;;  %s2353_s13 = sld [smem:[#allocation3 + $0x27]]  ;;  %v494_v27 = vstv %s2339_s12  ;;  %v2457_v29 = vstv %s2333_s11 }
  0x77   : > { %232 = vrot.lane.b32.xlu0 %v2180_v41, %s1976_s20  ;;  %v2225_v55 = vsel %vm263_vm2, %v548_v52, %v549_v46  ;;  %v2228_v56 = vsel %vm263_vm2, %v567_v53, %v568_v47  ;;  %v2246_v2 = vsel %vm263_vm2, %v549_v46, %v3469_v58  ;;  %v2251_v3 = vsel %vm263_vm2, %v568_v47, %v3468_v59  ;;  %3555 = sst [smem:[#allocation37_spill]] %s2341_s22  ;;  %s2355_s10 = sld [smem:[#allocation3 + $0x2e]] }
  0x78   : > { %315 = vrot.lane.b32.xlu1 %v2172_v39, %s1977_s23  ;;  %3543 = vst [vmem:[#allocation25_spill] sm:$0xff] %v2225_v55  ;;  %3544 = vst [vmem:[#allocation26_spill] sm:$0xff] %v2228_v56  ;;  %v2254_v4 = vsel %vm263_vm2, %v531_v0, %v532_v63  ;;  %v2263_v7 = vsel %vm263_vm2, %v532_v63, %v534_v6  ;;  %3556 = sst [smem:[#allocation38_spill]] %s2343_s9  ;;  %s2357_s15 = sld [smem:[#allocation3 + $0x5]]  ;;  %v2468_v32 = vmul.f32 %v494_v27, %v2180_v41 }
  0x79   : > { %3545 = vst [vmem:[#allocation27_spill] sm:$0xff] %v2246_v2  ;;  %3546 = vst [vmem:[#allocation28_spill] sm:$0xff] %v2251_v3  ;;  %3557 = sst [smem:[#allocation39_spill]] %s2345_s21  ;;  %s2359_s22 = sld [smem:[#allocation3 + $0xc]]  ;;  %v2489_v42 = vmul.f32 %v494_v27, %v2176_v40 }
  0x7a   : > { %3547 = vst [vmem:[#allocation29_spill] sm:$0xff] %v2254_v4  ;;  %3548 = vst [vmem:[#allocation30_spill] sm:$0xff] %v2263_v7  ;;  %3558 = sst [smem:[#allocation40_spill]] %s2347_s2  ;;  %s2361_s9 = sld [smem:[#allocation3 + $0x13]] }
  0x7b   : > { %313 = vrot.lane.b32.xlu0 %v2180_v41, %s1977_s23  ;;  %3559 = sst [smem:[#allocation41_spill]] %s2349_s26  ;;  %s2363_s21 = sld [smem:[#allocation3 + $0x1a]]  ;;  %3578 = vst [vmem:[#allocation52_spill] sm:$0xff] %v2468_v32 }
  0x7c   : > { %404 = vrot.lane.b32.xlu1 %v2180_v41, %s1978_s19  ;;  %3560 = sst [smem:[#allocation42_spill]] %s2351_s28  ;;  %s2365_s26 = sld [smem:[#allocation3 + $0x21]] }
  0x7d   : > { %3561 = sst [smem:[#allocation43_spill]] %s2353_s13  ;;  %s2367_s28 = sld [smem:[#allocation3 + $0x28]] }
  0x7e   : > { %3562 = sst [smem:[#allocation44_spill]] %s2355_s10  ;;  %s2369_s13 = sld [smem:[#allocation3 + $0x2f]] }
  0x7f   : > { %402 = vrot.lane.b32.xlu0 %v2176_v40, %s1978_s19  ;;  %3563 = sst [smem:[#allocation45_spill]] %s2357_s15  ;;  %s2371_s10 = sld [smem:[#allocation3 + $0x6]]  ;;  %v2542_v61 = vstv %s2359_s22 }
  0x80   : > { %578 = vrot.lane.b32.xlu1 %v2176_v40, %s1979_s4  ;;  %3564 = sst [smem:[#allocation46_spill]] %s2361_s9  ;;  %s2373_s15 = sld [smem:[#allocation3 + $0xd]]  ;;  %3601 = vst [vmem:[#allocation62_spill] sm:$0xff] %v2542_v61 }
  0x81   : > { %3565 = sst [smem:[#allocation47_spill]] %s2363_s21  ;;  %s2375_s2 = sld [smem:[#allocation3 + $0x14]] }
  0x82   : > { %3566 = sst [smem:[#allocation48_spill]] %s2365_s26  ;;  %s2377_s9 = sld [smem:[#allocation3 + $0x1b]] }
  0x83   : > { %406 = vrot.lane.b32.xlu0 %v2172_v39, %s1978_s19  ;;  %s2379_s21 = sld [smem:[#allocation3 + $0x22]]  ;;  %s2381_s26 = sld [smem:[#allocation3 + $0x29]]  ;;  %v2559_v1 = vstv %s2367_s28 }
  0x84   : > { %582 = vrot.lane.b32.xlu1 %v2172_v39, %s1979_s4  ;;  %s2407_s24 = sld [smem:[#allocation3 + $0x38]]  ;;  %s2409_s27 = sld [smem:[#allocation3 + $0x3f]]  ;;  %3605 = vst [vmem:[#allocation66_spill] sm:$0xff] %v2559_v1  ;;  %v2562_v6 = vstv %s2369_s13 }
  0x85   : > { %3567 = sst [smem:[#allocation49_spill]] %s2371_s10  ;;  %s2423_s8 = sld [smem:[#allocation3 + $0x46]]  ;;  %3606 = vst [vmem:[#allocation67_spill] sm:$0xff] %v2562_v6 }
  0x86   : > { %s3570_s14 = sld [smem:[#allocation35_spill]]  ;;  %s2425_s16 = sld [smem:[#allocation3 + $0x4d]]  ;;  %v2565_v27 = vstv %s2373_s15 }
  0x87   : > { %580 = vrot.lane.b32.xlu0 %v2180_v41, %s1979_s4  ;;  %3568 = sst [smem:[#allocation50_spill]] %s2375_s2  ;;  %s2395_s2 = sld [smem:[#allocation3 + $0x30]]  ;;  %3607 = vst [vmem:[#allocation68_spill] sm:$0xff] %v2565_v27 }
  0x88   : > { %671 = vrot.lane.b32.xlu1 %v2180_v41, %s1980_s5  ;;  %3569 = sst [smem:[#allocation51_spill]] %s2377_s9  ;;  %s2397_s9 = sld [smem:[#allocation3 + $0x31]] }
  0x89   : > { %s3571_s17 = sld [smem:[#allocation37_spill]]  ;;  %s2439_s29 = sld [smem:[#allocation3 + $0x5b]] }
  0x8a   : > { %s3573_s30 = sld [smem:[#allocation36_spill]]  ;;  %s3574_s3 = sld [smem:[#allocation39_spill]]  ;;  %v2592_v58 = vstv %s2407_s24  ;;  %v2595_v28 = vstv %s2409_s27 }
  0x8b   : > { %669 = vrot.lane.b32.xlu0 %v2176_v40, %s1980_s5  ;;  %s2463_s6 = sld [smem:[#allocation3 + $0x40]]  ;;  %s3575_s0 = sld [smem:[#allocation40_spill]]  ;;  %3617 = vst [vmem:[#allocation74_spill] sm:$0xff] %v2592_v58  ;;  %3618 = vst [vmem:[#allocation75_spill] sm:$0xff] %v2595_v28  ;;  %v2600_v22 = vstv %s2423_s8 }
  0x8c   : > { %760 = vrot.lane.b32.xlu1 %v2176_v40, %s1981_s7  ;;  %v2460_v30 = vstv %s3570_s14  ;;  %s3577_s1 = sld [smem:[#allocation41_spill]]  ;;  %s3580_s12 = sld [smem:[#allocation42_spill]]  ;;  %3619 = vst [vmem:[#allocation76_spill] sm:$0xff] %v2600_v22  ;;  %v2603_v15 = vstv %s2425_s16 }
  0x8d   : > { %s3581_s11 = sld [smem:[#allocation43_spill]]  ;;  %s3583_s14 = sld [smem:[#allocation44_spill]]  ;;  %v2588_v60 = vstv %s2395_s2  ;;  %3620 = vst [vmem:[#allocation77_spill] sm:$0xff] %v2603_v15 }
  0x8e   : > { %s3592_s25 = sld [smem:[#allocation46_spill]]  ;;  %s2567_s22 = sld [smem:[#allocation3 + $0x57]]  ;;  %3616 = vst [vmem:[#allocation73_spill] sm:$0xff] %v2588_v60 }
  0x8f   : > { %673 = vrot.lane.b32.xlu0 %v2172_v39, %s1980_s5  ;;  %v500_v31 = vstv %s3571_s17  ;;  %s2477_s17 = sld [smem:[#allocation3 + $0x55]]  ;;  %s2555_s18 = sld [smem:[#allocation3 + $0x42]] }
  0x90   : > { %764 = vrot.lane.b32.xlu1 %v2172_v39, %s1981_s7  ;;  %v2471_v33 = vmul.f32 %v500_v31, %v2180_v41  ;;  %v516_v35 = vstv %s3573_s30  ;;  %v2480_v36 = vmul.f32 %v500_v31, %v2172_v39  ;;  %s2493_s30 = sld [smem:[#allocation3 + $0x33]]  ;;  %v2499_v44 = vstv %s3574_s3  ;;  %s2523_s3 = sld [smem:[#allocation3 + $0x48]] }
  0x91   : > { %v2496_v43 = vmul.f32 %v516_v35, %v2172_v39  ;;  %3589 = vst [vmem:[#allocation56_spill] sm:$0xff] %v2499_v44  ;;  %v2502_v45 = vstv %s3575_s0  ;;  %v2521_v49 = vmul.f32 %v516_v35, %v2176_v40  ;;  %s2525_s0 = sld [smem:[#allocation3 + $0x4f]]  ;;  %v2528_v52 = vmul.f32 %v500_v31, %v2176_v40  ;;  %s2583_s28 = sld [smem:[#allocation3 + $0x5d]] }
  0x92   : > { %3579 = vst [vmem:[#allocation53_spill] sm:$0xff] %v2471_v33  ;;  %3590 = vst [vmem:[#allocation57_spill] sm:$0xff] %v2502_v45  ;;  %v2505_v46 = vstv %s3577_s1  ;;  %v2512_v47 = vstv %s3580_s12  ;;  %v2534_v57 = vmul.f32 %v516_v35, %v2180_v41  ;;  %s3599_s1 = sld [smem:[#allocation50_spill]]  ;;  %s3600_s12 = sld [smem:[#allocation51_spill]]  ;;  %v2578_v35 = vstv %s2379_s21 }
  0x93   : > { %762 = vrot.lane.b32.xlu0 %v2180_v41, %s1981_s7  ;;  %3588 = vst [vmem:[#allocation55_spill] sm:$0xff] %v2496_v43  ;;  %3591 = vst [vmem:[#allocation58_spill] sm:$0xff] %v2505_v46  ;;  %v2515_v48 = vstv %s3581_s11  ;;  %s2537_s11 = sld [smem:[#allocation3 + $0x56]]  ;;  %s2597_s21 = sld [smem:[#allocation3 + $0x35]]  ;;  %v2616_v28 = vstv %s2463_s6 }
  0x94   : > { %856 = vrot.lane.b32.xlu1 %v2222_v54, %s1976_s20  ;;  %3595 = vst [vmem:[#allocation59_spill] sm:$0xff] %v2521_v49  ;;  %3598 = vst [vmem:[#allocation61_spill] sm:$0xff] %v2534_v57  ;;  %v2545_v63 = vstv %s3592_s25  ;;  %s2569_s25 = sld [smem:[#allocation3 + $0x5e]]  ;;  %s2633_s24 = sld [smem:[#allocation3 + $0x43]] }
  0x95   : > { %3602 = vst [vmem:[#allocation63_spill] sm:$0xff] %v2545_v63  ;;  %3610 = vst [vmem:[#allocation71_spill] sm:$0xff] %v2578_v35  ;;  %s2645_s6 = sld [smem:[#allocation3 + $0x4a]]  ;;  %s2665_s27 = sld [smem:[#allocation3 + $0x5f]] }
  0x96   : > { %3625 = vst [vmem:[#allocation81_spill] sm:$0xff] %v2616_v28  ;;  %s3666_s16 = sld [smem:[#allocation33_spill]] }
  0x97   : > { %854 = vrot.lane.b32.xlu0 %v2236_v62, %s1976_s20  ;;  %3596 = sst [smem:[#allocation39_spill]] %s2525_s0 }
  0x98   : > { %945 = vrot.lane.b32.xlu1 %v2236_v62, %s1977_s23  ;;  %s2553_s0 = sld [smem:[#allocation3 + $0x3b]]  ;;  %v2572_v31 = vstv %s3599_s1  ;;  %s3220_s1 = sld [smem:[#allocation3 + $0x60]] }
  0x99   : > { %3608 = vst [vmem:[#allocation69_spill] sm:$0xff] %v2572_v31  ;;  %s3623_s2 = sld [smem:[#allocation39_spill]] }
  0x9a   : > { %v1194_v27 = vstv %s2569_s25  ;;  %s3267_s25 = sld [smem:[#allocation3 + $0x5a]] }
  0x9b   : > { %858 = vrot.lane.b32.xlu0 %v2256_v5, %s1976_s20  ;;  %s2307_s20 = sld [smem:[#allocation3 + $0x1]] }
  0x9c   : > { %949 = vrot.lane.b32.xlu1 %v2256_v5, %s1977_s23 }
  0x9f   : > { %947 = vrot.lane.b32.xlu0 %v2222_v54, %s1977_s23  ;;  %s2309_s23 = sld [smem:[#allocation3 + $0x8]] }
  0xa0   : > { %1038 = vrot.lane.b32.xlu1 %v2222_v54, %s1978_s19 }
  0xa1   : > { %3550 = sst [smem:[#allocation32_spill]] %s2307_s20  ;;  %s2465_s20 = sld [smem:[#allocation3 + $0x47]] }
  0xa2   : > { %s3659_s8 = sld [smem:[#allocation32_spill]] }
  0xa3   : > { %1036 = vrot.lane.b32.xlu0 %v2236_v62, %s1978_s19 }
  0xa4   : > { %1212 = vrot.lane.b32.xlu1 %v2236_v62, %s1979_s4 }
  0xa5   : > { %v2412_v16 = vstv %s2309_s23  ;;  %s2437_s23 = sld [smem:[#allocation3 + $0x54]] }
  0xa7   : > { %1040 = vrot.lane.b32.xlu0 %v2256_v5, %s1978_s19  ;;  %s2311_s19 = sld [smem:[#allocation3 + $0xf]] }
  0xa8   : > { %1216 = vrot.lane.b32.xlu1 %v2256_v5, %s1979_s4  ;;  %3576 = sst [smem:[#allocation35_spill]] %s2465_s20  ;;  %s2509_s20 = sld [smem:[#allocation3 + $0x41]]  ;;  %v3665_v45 = vstv %s3659_s8 }
  0xa9   : > { %s3611_s13 = sld [smem:[#allocation35_spill]] }
  0xab   : > { %1214 = vrot.lane.b32.xlu0 %v2222_v54, %s1979_s4  ;;  %s2317_s4 = sld [smem:[#allocation3 + $0x24]]  ;;  %v2606_v14 = vstv %s2437_s23  ;;  %s3669_s23 = sld [smem:[#allocation34_spill]] }
  0xac   : > { %1305 = vrot.lane.b32.xlu1 %v2222_v54, %s1980_s5  ;;  %3621 = vst [vmem:[#allocation78_spill] sm:$0xff] %v2606_v14  ;;  %v2650_v14 = vstv %s3623_s2 }
  0xad   : > { %v2415_v17 = vstv %s2311_s19  ;;  %s3572_s19 = sld [smem:[#allocation38_spill]]  ;;  %3633 = vst [vmem:[#allocation89_spill] sm:$0xff] %v2650_v14  ;;  %v1195_v14 = vmul.f32 %v1194_v27, %v2236_v62 }
  0xae   : > { %3584 = sst [smem:[#allocation38_spill]] %s2477_s17  ;;  %v2639_v28 = vstv %s2509_s20  ;;  %s2663_s20 = sld [smem:[#allocation3 + $0x58]] }
  0xaf   : > { %1303 = vrot.lane.b32.xlu0 %v2236_v62, %s1980_s5  ;;  %s2507_s17 = sld [smem:[#allocation3 + $0x3a]]  ;;  %v2619_v58 = vstv %s3611_s13  ;;  %3631 = vst [vmem:[#allocation87_spill] sm:$0xff] %v2639_v28  ;;  %s3269_s13 = sld [smem:[#allocation3 + $0x61]] }
  0xb0   : > { %1394 = vrot.lane.b32.xlu1 %v2236_v62, %s1981_s7  ;;  %3626 = vst [vmem:[#allocation82_spill] sm:$0xff] %v2619_v58  ;;  %v2642_v58 = vstv %s2523_s3  ;;  %s3213_s3 = sld [smem:[#allocation3 + $0x44]] }
  0xb1   : > { %v2428_v20 = vstv %s2317_s4  ;;  %s2451_s4 = sld [smem:[#allocation3 + $0x32]]  ;;  %3632 = vst [vmem:[#allocation88_spill] sm:$0xff] %v2642_v58  ;;  %v2668_v58 = vstv %s2583_s28  ;;  %s3322_s28 = sld [smem:[#allocation3 + $0x37]] }
  0xb2   : > { %3636 = vst [vmem:[#allocation92_spill] sm:$0xff] %v2668_v58 }
  0xb3   : > { %1307 = vrot.lane.b32.xlu0 %v2256_v5, %s1980_s5  ;;  %s2319_s5 = sld [smem:[#allocation3 + $0x2b]]  ;;  %v508_v34 = vstv %s3572_s19  ;;  %s2491_s19 = sld [smem:[#allocation3 + $0x5c]] }
  0xb4   : > { %1398 = vrot.lane.b32.xlu1 %v2256_v5, %s1981_s7  ;;  %v2483_v37 = vmul.f32 %v508_v34, %v2180_v41  ;;  %v2486_v38 = vmul.f32 %v508_v34, %v2172_v39  ;;  %v2518_v39 = vstv %s3583_s14  ;;  %v2531_v53 = vmul.f32 %v508_v34, %v2176_v40  ;;  %s2539_s14 = sld [smem:[#allocation3 + $0x34]] }
  0xb5   : > { %v2575_v34 = vstv %s3600_s12  ;;  %v2581_v41 = vstv %s2381_s26  ;;  %s2631_s26 = sld [smem:[#allocation3 + $0x3c]]  ;;  %v2636_v60 = vstv %s2507_s17  ;;  %s3199_s17 = sld [smem:[#allocation3 + $0x3d]] }
  0xb6   : > { %3585 = vst [vmem:[#allocation54_spill] sm:$0xff] %v2483_v37  ;;  %3597 = vst [vmem:[#allocation60_spill] sm:$0xff] %v2531_v53  ;;  %s3224_s12 = sld [smem:[#allocation3 + $0x4b]] }
  0xb7   : > { %1396 = vrot.lane.b32.xlu0 %v2222_v54, %s1981_s7  ;;  %s2327_s7 = sld [smem:[#allocation3 + $0x17]]  ;;  %3609 = vst [vmem:[#allocation70_spill] sm:$0xff] %v2575_v34  ;;  %3612 = vst [vmem:[#allocation72_spill] sm:$0xff] %v2581_v41  ;;  %v2609_v34 = vstv %s2439_s29  ;;  %s3691_s29 = sld [smem:[#allocation45_spill]] }
  0xb8   : > { %3622 = vst [vmem:[#allocation79_spill] sm:$0xff] %v2609_v34  ;;  %3630 = vst [vmem:[#allocation86_spill] sm:$0xff] %v2636_v60  ;;  %v1142_v34 = vstv %s2555_s18  ;;  %s3653_s18 = sld [smem:[#allocation31_spill]] }
  0xb9   : > { %v2431_v21 = vstv %s2319_s5  ;;  %s2453_s5 = sld [smem:[#allocation3 + $0x39]]  ;;  %3586 = sst [smem:[#allocation36_spill]] %s2491_s19  ;;  %v2692_v35 = vmul.f32 %v1142_v34, %v2236_v62 }
  0xba   : > { %s3594_s19 = sld [smem:[#allocation48_spill]]  ;;  %s3615_s10 = sld [smem:[#allocation36_spill]] }
  0xbb   : > { %3643 = vst [vmem:[#allocation99_spill] sm:$0xff] %v2692_v35  ;;  %v2727_v35 = vmul.f32 %v1194_v27, %v2256_v5 }
  0xbd   : > { %v2445_v25 = vstv %s2327_s7  ;;  %s2475_s7 = sld [smem:[#allocation3 + $0x4e]] }
  0xbe   : > { %v3664_v56 = vstv %s3653_s18 }
  0xbf   : > { %v2613_v59 = vstv %s2453_s5  ;;  %s3692_s5 = sld [smem:[#allocation49_spill]] }
  0xc0   : > { %v2551_v40 = vstv %s3594_s19  ;;  %s2585_s19 = sld [smem:[#allocation3 + $0x49]]  ;;  %3624 = vst [vmem:[#allocation80_spill] sm:$0xff] %v2613_v59  ;;  %v2628_v31 = vstv %s3615_s10  ;;  %v1175_v59 = vstv %s2567_s22  ;;  %s3262_s22 = sld [smem:[#allocation3 + $0x53]] }
  0xc1   : > { %3604 = vst [vmem:[#allocation65_spill] sm:$0xff] %v2551_v40  ;;  %3629 = vst [vmem:[#allocation85_spill] sm:$0xff] %v2628_v31  ;;  %s2647_s10 = sld [smem:[#allocation3 + $0x51]]  ;;  %v2653_v31 = vstv %s2537_s11  ;;  %v1176_v60 = vmul.f32 %v1175_v59, %v2236_v62  ;;  %v2660_v28 = vmul.f32 %v1175_v59, %v2222_v54  ;;  %v2709_v40 = vstv %s2631_s26  ;;  %s3253_s11 = sld [smem:[#allocation3 + $0x3e]] }
  0xc2   : > { %3634 = vst [vmem:[#allocation90_spill] sm:$0xff] %v2653_v31  ;;  %v2673_v31 = vmul.f32 %v1194_v27, %v2222_v54  ;;  %3648 = vst [vmem:[#allocation104_spill] sm:$0xff] %v2709_v40 }
  0xc3   : > { %3582 = sst [smem:[#allocation37_spill]] %s2475_s7  ;;  %s3593_s7 = sld [smem:[#allocation47_spill]]  ;;  %3635 = vst [vmem:[#allocation91_spill] sm:$0xff] %v2660_v28  ;;  %v3654_v40 = vrot.slane %v2660_v28, 4 }
  0xc4   : > { %s3613_s15 = sld [smem:[#allocation37_spill]]  ;;  %3637 = vst [vmem:[#allocation93_spill] sm:$0xff] %v2673_v31  ;;  %v3660_v27 = vrot.slane %v2673_v31, 4 }
  0xc6   : > { %v1150_v41 = vstv %s2585_s19  ;;  %s3763_s19 = sld [smem:[#allocation21_spill]] }
  0xc9   : > { %v2548_v0 = vstv %s3593_s7  ;;  %s3614_s7 = sld [smem:[#allocation38_spill]] }
  0xca   : > { %3603 = vst [vmem:[#allocation64_spill] sm:$0xff] %v2548_v0  ;;  %v2622_v22 = vstv %s3613_s15  ;;  %s3285_s15 = sld [smem:[#allocation3 + $0x4c]] }
  0xcb   : > { %3627 = vst [vmem:[#allocation83_spill] sm:$0xff] %v2622_v22  ;;  %v1134_v22 = vstv %s2553_s0  ;;  %s3218_s0 = sld [smem:[#allocation3 + $0x59]] }
  0xcc   : > { %v2683_v1 = vmul.f32 %v1134_v22, %v2236_v62  ;;  %v2686_v58 = vmul.f32 %v1134_v22, %v2222_v54  ;;  %v2689_v0 = vmul.f32 %v1134_v22, %v2256_v5  ;;  %v2705_v22 = vmul.f32 %v1175_v59, %v2256_v5  ;;  %s3765_s26 = sshll.u32 %s3763_s19, 6 }
  0xce   : > { %3640 = vst [vmem:[#allocation96_spill] sm:$0xff] %v2683_v1  ;;  %3641 = vst [vmem:[#allocation97_spill] sm:$0xff] %v2686_v58  ;;  %v1182_v1 = vrot.slane %v1176_v60, 4  ;;  %v2721_v60 = vstv %s2647_s10 }
  0xcf   : > { %v2625_v15 = vstv %s3614_s7  ;;  %3642 = vst [vmem:[#allocation98_spill] sm:$0xff] %v2689_v0  ;;  %3647 = vst [vmem:[#allocation103_spill] sm:$0xff] %v2705_v22  ;;  %v1201_v0 = vrot.slane %v1195_v14, 4  ;;  %s3762_s7 = sld [smem:[#allocation16_spill]] }
  0xd0   : > { %3628 = vst [vmem:[#allocation84_spill] sm:$0xff] %v2625_v15  ;;  %v1128_v15 = vstv %s2539_s14  ;;  %3652 = vst [vmem:[#allocation108_spill] sm:$0xff] %v2721_v60  ;;  %s3260_s14 = sld [smem:[#allocation3 + $0x45]] }
  0xd1   : > { %v2677_v6 = vmul.f32 %v1128_v15, %v2236_v62  ;;  %v2680_v63 = vmul.f32 %v1128_v15, %v2222_v54  ;;  %v2698_v15 = vmul.f32 %v1142_v34, %v2256_v5  ;;  %v2748_v28 = vsel %vm263_vm2, %v1201_v0, %v3660_v27 }
  0xd2   : > { %3661 = vst [vmem:[#allocation113_spill] sm:$0xff] %v2748_v28  ;;  %v3663_v27 = vstv %s3659_s8  ;;  %s3767_s8 = sld [smem:[#allocation19_spill]] }
  0xd3   : > { %3638 = vst [vmem:[#allocation94_spill] sm:$0xff] %v2677_v6  ;;  %3639 = vst [vmem:[#allocation95_spill] sm:$0xff] %v2680_v63  ;;  %v2695_v6 = vmul.f32 %v1142_v34, %v2222_v54  ;;  %v2701_v63 = vmul.f32 %v1150_v41, %v2236_v62  ;;  %v2712_v34 = vmul.f32 %v1150_v41, %v2256_v5  ;;  %v2718_v62 = vstv %s2645_s6 }
  0xd4   : > { %3645 = vst [vmem:[#allocation101_spill] sm:$0xff] %v2698_v15  ;;  %3651 = vst [vmem:[#allocation107_spill] sm:$0xff] %v2718_v62  ;;  %v2738_v62 = vstv %s2665_s27  ;;  %v2741_v15 = vmul.f32 %v1150_v41, %v2222_v54  ;;  %s3766_s27 = sld [smem:[#allocation116_spill]] }
  0xd5   : > { %3644 = vst [vmem:[#allocation100_spill] sm:$0xff] %v2695_v6  ;;  %3646 = vst [vmem:[#allocation102_spill] sm:$0xff] %v2701_v63  ;;  %v2715_v6 = vstv %s2633_s24  ;;  %s1768_s2 = sshll.u32 %s3762_s7, 10  ;;  %s173_s24 = scalar_lea.vmem [#allocation8], %s3765_s26 }
  0xd6   : > { %3649 = vst [vmem:[#allocation105_spill] sm:$0xff] %v2712_v34  ;;  %3650 = vst [vmem:[#allocation106_spill] sm:$0xff] %v2715_v6  ;;  %v2732_v34 = vsel %vm263_vm2, %v1182_v1, %v3654_v40  ;;  %v2735_v6 = vstv %s2663_s20  ;;  %s1567_s6 = sshll.u32 %s173_s24, 4  ;;  %s3379_s6 = int_to_ptr.vmem [resolvable:$true] %s1567_s6 }
  0xd7   : > { %3655 = vst [vmem:[#allocation109_spill] sm:$0xff] %v2732_v34  ;;  %3656 = vst [vmem:[#allocation110_spill] sm:$0xff] %v2735_v6 }
  0xd8   : > { %3657 = vst [vmem:[#allocation111_spill] sm:$0xff] %v2738_v62  ;;  %3658 = vst [vmem:[#allocation112_spill] sm:$0xff] %v2741_v15  ;;  %v3662_v15 = vstv %s3653_s18  ;;  %p3768_p13 = scmp.ne.s32.totalorder %s3767_s8, 0 }
  0xda   : > { %s3377_s18 = scalar_lea.hbm %s3766_s27, %s1768_s2 }
  0xe2   : > { %v235_v58 = vpop.permute.xlu1 %234 }
  0xe3   : > { %v259_v61 = vmul.f32 %v2393_v11, %v235_v58  ;;  %v277_v63 = vmul.f32 %v2400_v12, %v235_v58  ;;  %v296_v59 = vmul.f32 %v2403_v13, %v235_v58  ;;  %v244_v60 = vmul.f32 %v2384_v8, %v235_v58 }
  0xe4   : > { %v249_v40 = vmul.f32 %v2387_v9, %v235_v58  ;;  %v2752_v1 = vmul.f32 %v2390_v10, %v235_v58 }
  0xe5   : > { %v231_v14 = vpop.permute.xlu0 %230  ;;  %v284_v4 = vrot.slane %v277_v63, 4  ;;  %v303_v34 = vrot.slane %v296_v59, 4  ;;  %v267_v41 = vrot.slane %v259_v61, 4 }
  0xe6   : > { %v312_v57 = vpop.permute.xlu1 %311  ;;  %v257_v54 = vmul.f32 %v2393_v11, %v231_v14  ;;  %v238_v63 = vmul.f32 %v3662_v15, %v231_v14  ;;  %v242_v62 = vmul.f32 %v2384_v8, %v231_v14  ;;  %v275_v5 = vmul.f32 %v2400_v12, %v231_v14 }
  0xe7   : > { %v247_v31 = vmul.f32 %v2387_v9, %v231_v14  ;;  %v2761_v0 = vmul.f32 %v2390_v10, %v231_v14  ;;  %v294_v58 = vmul.f32 %v2403_v13, %v231_v14  ;;  %v2766_v59 = vmul.f32 %v3663_v27, %v312_v57 }
  0xe8   : > { %v291_v28 = vadd.f32 %v284_v4, %v244_v60  ;;  %v325_v6 = vmul.f32 %v2412_v16, %v312_v57  ;;  %v310_v3 = vadd.f32 %v303_v34, %v249_v40  ;;  %v264_v2 = vrot.slane %v257_v54, 4 }
  0xe9   : > { %v233_v22 = vpop.permute.xlu0 %232  ;;  %v333_v51 = vmul.f32 %v2415_v17, %v312_v57  ;;  %v281_v43 = vrot.slane %v275_v5, 4  ;;  %v349_v14 = vmul.f32 %v2421_v19, %v312_v57  ;;  %v300_v27 = vrot.slane %v294_v58, 4 }
  0xea   : > { %v258_v61 = vmul.f32 %v2393_v11, %v233_v22  ;;  %v276_v15 = vmul.f32 %v2400_v12, %v233_v22  ;;  %v295_v7 = vmul.f32 %v2403_v13, %v233_v22  ;;  %v239_v60 = vmul.f32 %v3664_v56, %v233_v22  ;;  %v316_v12 = vpop.permute.xlu1 %315 }
  0xeb   : > { %v366_v11 = vmul.f32 %v2428_v20, %v312_v57  ;;  %v243_v37 = vmul.f32 %v2384_v8, %v233_v22  ;;  %v248_v40 = vmul.f32 %v2387_v9, %v233_v22  ;;  %v2780_v13 = vmul.f32 %v2390_v10, %v233_v22 }
  0xec   : > { %v265_v50 = vrot.slane %v258_v61, 4  ;;  %v282_v49 = vrot.slane %v276_v15, 4  ;;  %v301_v55 = vrot.slane %v295_v7, 4  ;;  %v385_v56 = vmul.f32 %v2431_v21, %v312_v57 }
  0xed   : > { %v341_v7 = vmul.f32 %v2418_v18, %v312_v57  ;;  %v355_v15 = vrot.slane %v349_v14, 4  ;;  %v327_v8 = vmul.f32 %v2412_v16, %v316_v12  ;;  %v335_v9 = vmul.f32 %v2415_v17, %v316_v12  ;;  %v314_v10 = vpop.permute.xlu0 %313 }
  0xee   : > { %v266_v5 = vsel %vm263_vm2, %v264_v2, %v265_v50  ;;  %v268_v54 = vsel %vm263_vm2, %v265_v50, %v267_v41  ;;  %v283_v61 = vsel %vm263_vm2, %v281_v43, %v282_v49  ;;  %v285_v58 = vsel %vm263_vm2, %v282_v49, %v284_v4 }
  0xef   : > { %v271_v22 = vadd.f32 %v266_v5, %v238_v63  ;;  %v302_v2 = vsel %vm263_vm2, %v300_v27, %v301_v55  ;;  %v304_v50 = vsel %vm263_vm2, %v301_v55, %v303_v34  ;;  %v372_v41 = vrot.slane %v366_v11, 4 }
  0xf0   : > { %v272_v43 = vadd.f32 %v268_v54, %v239_v60  ;;  %v290_v33 = vadd.f32 %v285_v58, %v243_v37  ;;  %v289_v4 = vadd.f32 %v283_v61, %v242_v62  ;;  %v351_v49 = vmul.f32 %v2421_v19, %v316_v12 }
  0xf1   : > { %v391_v46 = vrot.slane %v385_v56, 4  ;;  %v368_v57 = vmul.f32 %v2428_v20, %v316_v12  ;;  %v387_v14 = vmul.f32 %v2431_v21, %v316_v12  ;;  %v320_v44 = vmul.f32 %v3665_v45, %v314_v10 }
  0xf2   : > { %v309_v32 = vadd.f32 %v304_v50, %v248_v40  ;;  %v308_v53 = vadd.f32 %v302_v2, %v247_v31  ;;  %v330_v63 = vadd.f32 %v327_v8, %v291_v28  ;;  %v338_v5 = vadd.f32 %v335_v9, %v310_v3  ;;  %v405_v28 = vpop.permute.xlu1 %404 }
  0xf3   : > { %v343_v27 = vmul.f32 %v2418_v18, %v316_v12  ;;  %v358_v55 = vrot.slane %v351_v49, 4  ;;  %v326_v34 = vmul.f32 %v2412_v16, %v314_v10  ;;  %v350_v37 = vmul.f32 %v2421_v19, %v314_v10  ;;  %v403_v12 = vpop.permute.xlu0 %402 }
  0xf4   : > { %v328_v62 = vadd.f32 %v325_v6, %v289_v4  ;;  %v375_v60 = vrot.slane %v368_v57, 4  ;;  %v334_v11 = vmul.f32 %v2415_v17, %v314_v10  ;;  %v367_v54 = vmul.f32 %v2428_v20, %v314_v10 }
  0xf5   : > { %v394_v61 = vrot.slane %v387_v14, 4  ;;  %v322_v45 = vadd.f32 %v320_v44, %v272_v43  ;;  %v356_v31 = vrot.slane %v350_v37, 4  ;;  %v386_v3 = vmul.f32 %v2431_v21, %v314_v10 }
  0xf6   : > { %v336_v40 = vadd.f32 %v333_v51, %v308_v53  ;;  %v342_v16 = vmul.f32 %v2418_v18, %v314_v10  ;;  %v373_v58 = vrot.slane %v367_v54, 4  ;;  %v321_v19 = vadd.f32 %v2766_v59, %v271_v22 }
  0xf7   : > { %v329_v6 = vadd.f32 %v326_v34, %v290_v33  ;;  %v392_v56 = vrot.slane %v386_v3, 4  ;;  %v359_v17 = vsel %vm263_vm2, %v356_v31, %v358_v55  ;;  %v357_v20 = vsel %vm263_vm2, %v355_v15, %v356_v31 }
  0xf8   : > { %v337_v8 = vadd.f32 %v334_v11, %v309_v32  ;;  %v376_v44 = vsel %vm263_vm2, %v373_v58, %v375_v60  ;;  %v3667_v9 = vstv %s3666_s16  ;;  %v374_v51 = vsel %vm263_vm2, %v372_v41, %v373_v58  ;;  %s1554_s16 = scalar_lea.sflag [#allocation5], %s3763_s19 }
  0xf9   : > { %v411_v2 = vmul.f32 %v3667_v9, %v405_v28  ;;  %v3668_v21 = vmov %v3667_v9  ;;  %v395_v18 = vsel %vm263_vm2, %v392_v56, %v394_v61  ;;  %v363_v53 = vadd.f32 %v359_v17, %v322_v45 }
  0xfa   : > { %v410_v50 = vmul.f32 %v3668_v21, %v403_v12  ;;  %v362_v10 = vadd.f32 %v357_v20, %v321_v19  ;;  %v344_v33 = vadd.f32 %v341_v7, %v2761_v0  ;;  %v346_v59 = vadd.f32 %v343_v27, %v2752_v1  ;;  %v407_v7 = vpop.permute.xlu0 %406 }
  0xfb   : > { %v393_v22 = vsel %vm263_vm2, %v391_v46, %v392_v56  ;;  %v1204_v32 = vrot.slane %v2727_v35, 4  ;;  %v382_v15 = vadd.f32 %v375_v60, %v330_v63  ;;  %v401_v43 = vadd.f32 %v394_v61, %v338_v5 }
  0xfc   : > { %v345_v4 = vadd.f32 %v342_v16, %v2780_v13  ;;  %v381_v49 = vadd.f32 %v376_v44, %v329_v6  ;;  %v400_v57 = vadd.f32 %v395_v18, %v337_v8  ;;  %v380_v14 = vadd.f32 %v374_v51, %v328_v62 }
  0xfd   : > { %v440_v41 = vmul.f32 %v2448_v26, %v403_v12  ;;  %v441_v55 = vmul.f32 %v2448_v26, %v405_v28  ;;  %v413_v34 = vadd.f32 %v411_v2, %v363_v53  ;;  %v412_v37 = vadd.f32 %v410_v50, %v362_v10 }
  0xfe   : > { %v399_v0 = vadd.f32 %v393_v22, %v336_v40  ;;  %v416_v1 = vmul.f32 %v2435_v23, %v403_v12  ;;  %v417_v46 = vmul.f32 %v2435_v23, %v405_v28  ;;  %v424_v63 = vmul.f32 %v2442_v24, %v403_v12 }
  0xff   : > { %v446_v5 = vrot.slane %v440_v41, 4  ;;  %v447_v27 = vrot.slane %v441_v55, 4  ;;  %v457_v13 = vmul.f32 %v2457_v29, %v403_v12  ;;  %v458_v62 = vmul.f32 %v2457_v29, %v405_v28 }
 0x100   : > { %v476_v60 = vmul.f32 %v2460_v30, %v403_v12  ;;  %v477_v11 = vmul.f32 %v2460_v30, %v405_v28  ;;  %v425_v54 = vmul.f32 %v2442_v24, %v405_v28  ;;  %v432_v61 = vmul.f32 %v2445_v25, %v403_v12 }
 0x101   : > { %v418_v45 = vmul.f32 %v2435_v23, %v407_v7  ;;  %v426_v31 = vmul.f32 %v2442_v24, %v407_v7  ;;  %v419_v3 = vadd.f32 %v416_v1, %v380_v14  ;;  %v463_v40 = vrot.slane %v457_v13, 4  ;;  %v579_v23 = vpop.permute.xlu1 %578 }
 0x102   : > { %v464_v16 = vrot.slane %v458_v62, 4  ;;  %v482_v58 = vrot.slane %v476_v60, 4  ;;  %v427_v19 = vadd.f32 %v424_v63, %v399_v0  ;;  %v448_v6 = vsel %vm263_vm2, %v446_v5, %v447_v27  ;;  %v3672_v62 = vld [vmem:[#allocation52_spill] sm:$0xff] }
 0x103   : > { %v483_v56 = vrot.slane %v477_v11, 4  ;;  %v421_v17 = vadd.f32 %v418_v45, %v382_v15  ;;  %v442_v8 = vmul.f32 %v2448_v26, %v407_v7  ;;  %v459_v44 = vmul.f32 %v2457_v29, %v407_v7  ;;  %v3673_v60 = vld [vmem:[#allocation56_spill] sm:$0xff]  ;;  %v3674_v11 = vld [vmem:[#allocation57_spill] sm:$0xff] }
 0x104   : > { %v465_v20 = vsel %vm263_vm2, %v463_v40, %v464_v16  ;;  %v478_v12 = vmul.f32 %v2460_v30, %v407_v7  ;;  %v420_v9 = vadd.f32 %v417_v46, %v381_v49  ;;  %v433_v24 = vmul.f32 %v2445_v25, %v405_v28  ;;  %v3677_v40 = vld [vmem:[#allocation54_spill] sm:$0xff] }
 0x105   : > { %v484_v2 = vsel %vm263_vm2, %v482_v58, %v483_v56  ;;  %v429_v21 = vadd.f32 %v426_v31, %v401_v43  ;;  %v434_v50 = vmul.f32 %v2445_v25, %v407_v7  ;;  %v449_v51 = vrot.slane %v442_v8, 4  ;;  %v3676_v31 = vld [vmem:[#allocation53_spill] sm:$0xff]  ;;  %v3681_v8 = vld [vmem:[#allocation23_spill] sm:$0xff] }
 0x106   : > { %v466_v18 = vrot.slane %v459_v44, 4  ;;  %v485_v53 = vrot.slane %v478_v12, 4  ;;  %v428_v10 = vadd.f32 %v425_v54, %v400_v57  ;;  %v453_v22 = vadd.f32 %v448_v6, %v412_v37 }
 0x107   : > { %v471_v26 = vadd.f32 %v465_v20, %v419_v3  ;;  %v490_v15 = vadd.f32 %v484_v2, %v427_v19  ;;  %v450_v29 = vsel %vm263_vm2, %v447_v27, %v449_v51  ;;  %v3670_v28 = vstv %s3669_s23  ;;  %v583_v27 = vpop.permute.xlu1 %582  ;;  %v3679_v19 = vld [vmem:[#allocation26_spill] sm:$0xff]  ;;  %v3684_v2 = vld [vmem:[#allocation24_spill] sm:$0xff] }
 0x108   : > { %v467_v30 = vsel %vm263_vm2, %v464_v16, %v466_v18  ;;  %v473_v49 = vadd.f32 %v466_v18, %v421_v17  ;;  %v486_v14 = vsel %vm263_vm2, %v483_v56, %v485_v53  ;;  %v2845_v41 = vmul.f32 %v3670_v28, %v579_v23  ;;  %v3680_v17 = vld [vmem:[#allocation59_spill] sm:$0xff] }
 0x109   : > { %v435_v43 = vadd.f32 %v432_v61, %v344_v33  ;;  %v454_v55 = vadd.f32 %v450_v29, %v413_v34  ;;  %v492_v25 = vadd.f32 %v485_v53, %v429_v21  ;;  %v436_v0 = vadd.f32 %v433_v24, %v345_v4  ;;  %v3671_v4 = vld [vmem:[#allocation60_spill] sm:$0xff]  ;;  %v3675_v61 = vld [vmem:[#allocation58_spill] sm:$0xff] }
 0x10a   : > { %v437_v1 = vadd.f32 %v434_v50, %v346_v59  ;;  %v472_v7 = vadd.f32 %v467_v30, %v420_v9  ;;  %v491_v57 = vadd.f32 %v486_v14, %v428_v10  ;;  %v497_v37 = vadd.f32 %v2489_v42, %v453_v22  ;;  %v3686_v30 = vld [vmem:[#allocation30_spill] sm:$0xff]  ;;  %v3687_v14 = vld [vmem:[#allocation27_spill] sm:$0xff] }
 0x10b   : > { %v506_v46 = vadd.f32 %v2480_v36, %v473_v49  ;;  %v2850_v63 = vmul.f32 %v2512_v47, %v579_v23  ;;  %v2853_v5 = vmul.f32 %v2515_v48, %v579_v23  ;;  %v514_v13 = vadd.f32 %v2486_v38, %v492_v25  ;;  %v3678_v38 = vld [vmem:[#allocation25_spill] sm:$0xff] }
 0x10c   : > { %v2857_v33 = vmul.f32 %v2518_v39, %v579_v23  ;;  %v504_v59 = vadd.f32 %v2528_v52, %v471_v26  ;;  %v512_v34 = vadd.f32 %v3671_v4, %v490_v15  ;;  %v498_v42 = vadd.f32 %v3672_v62, %v454_v55  ;;  %v581_v26 = vpop.permute.xlu0 %580  ;;  %v2883_v15 = vpop.permute.xlu1 %671 }
 0x10d   : > { %v592_v36 = vmul.f32 %v3673_v60, %v579_v23  ;;  %v600_v54 = vmul.f32 %v3674_v11, %v579_v23  ;;  %v608_v45 = vmul.f32 %v3675_v61, %v579_v23  ;;  %v505_v3 = vadd.f32 %v3676_v31, %v472_v7  ;;  %v3683_v23 = vld [vmem:[#allocation55_spill] sm:$0xff] }
 0x10e   : > { %v513_v16 = vadd.f32 %v3677_v40, %v491_v57  ;;  %v556_v58 = vadd.f32 %v3678_v38, %v504_v59  ;;  %v575_v6 = vadd.f32 %v3679_v19, %v512_v34  ;;  %v622_v52 = vrot.slane %v2850_v63, 4  ;;  %v3693_v40 = vld [vmem:[#allocation29_spill] sm:$0xff] }
 0x10f   : > { %v639_v56 = vrot.slane %v2853_v5, 4  ;;  %v520_v20 = vadd.f32 %v3680_v17, %v435_v43  ;;  %v3682_v44 = vrot.slane %v3681_v8, 4  ;;  %v658_v9 = vrot.slane %v2857_v33, 4  ;;  %v3688_v43 = vld [vmem:[#allocation28_spill] sm:$0xff] }
 0x110   : > { %v522_v24 = vadd.f32 %v3683_v23, %v437_v1  ;;  %v3685_v21 = vrot.slane %v3684_v2, 4  ;;  %v618_v51 = vmul.f32 %v2512_v47, %v583_v27  ;;  %v594_v18 = vmul.f32 %v3673_v60, %v583_v27  ;;  %v2903_v38 = vpop.permute.xlu1 %760 }
 0x111   : > { %v558_v12 = vadd.f32 %v3682_v44, %v506_v46  ;;  %v602_v53 = vmul.f32 %v3674_v11, %v583_v27  ;;  %v610_v10 = vmul.f32 %v3675_v61, %v583_v27  ;;  %v635_v22 = vmul.f32 %v2515_v48, %v583_v27 }
 0x112   : > { %v577_v50 = vadd.f32 %v3685_v21, %v514_v13  ;;  %v654_v29 = vmul.f32 %v2518_v39, %v583_v27  ;;  %v539_v49 = vadd.f32 %v3686_v30, %v498_v42  ;;  %v557_v28 = vadd.f32 %v3687_v14, %v505_v3  ;;  %v3690_v42 = vld [vmem:[#allocation61_spill] sm:$0xff]  ;;  %v670_v3 = vpop.permute.xlu0 %669  ;;  %v3699_v14 = vld [vmem:[#allocation64_spill] sm:$0xff] }
 0x113   : > { %v576_v55 = vadd.f32 %v3688_v43, %v513_v16  ;;  %v595_v25 = vadd.f32 %v592_v36, %v556_v58  ;;  %v597_v1 = vadd.f32 %v594_v18, %v558_v12  ;;  %v2889_v7 = vadd.f32 %v600_v54, %v575_v6 }
 0x114   : > { %v2891_v57 = vadd.f32 %v608_v45, %v520_v20  ;;  %v605_v46 = vadd.f32 %v602_v53, %v577_v50  ;;  %v625_v63 = vrot.slane %v618_v51, 4  ;;  %v617_v5 = vmul.f32 %v2512_v47, %v581_v26 }
 0x115   : > { %v634_v13 = vmul.f32 %v2515_v48, %v581_v26  ;;  %v642_v33 = vrot.slane %v635_v22, 4  ;;  %v3689_v27 = vstv %s3669_s23  ;;  %v609_v4 = vmul.f32 %v3675_v61, %v581_v26  ;;  %s1899_s23 = scalar_lea.vmem %s3379_s6, 1024 }
 0x116   : > { %v587_v59 = vmul.f32 %v3689_v27, %v581_v26  ;;  %v653_v34 = vmul.f32 %v2518_v39, %v581_v26  ;;  %v661_v62 = vrot.slane %v654_v29, 4  ;;  %v521_v36 = vadd.f32 %v3690_v42, %v436_v0  ;;  %p1900_p12 = scmp.ne.s32.totalorder %s3379_s6, %s1899_s23 }
 0x117   : > { %v593_v54 = vmul.f32 %v3673_v60, %v581_v26  ;;  %v623_v45 = vrot.slane %v617_v5, 4  ;;  %v601_v47 = vmul.f32 %v3674_v11, %v581_v26  ;;  %v640_v48 = vrot.slane %v634_v13, 4  ;;  %v3698_v26 = vld [vmem:[#allocation62_spill] sm:$0xff]  ;;  %v3702_v13 = vld [vmem:[#allocation67_spill] sm:$0xff] }
 0x118   : > { %v589_v31 = vadd.f32 %v587_v59, %v539_v49  ;;  %v538_v16 = vadd.f32 %v3693_v40, %v497_v37  ;;  %v2905_v61 = vadd.f32 %v610_v10, %v522_v24  ;;  %v649_v39 = vadd.f32 %v642_v33, %v597_v1  ;;  %v3697_v10 = vld [vmem:[#allocation65_spill] sm:$0xff]  ;;  %p1901_p7 = pnand %p1900_p12, %p3768_p13 }
 0x119   : > { %v596_v58 = vadd.f32 %v593_v54, %v557_v28  ;;  %v659_v0 = vrot.slane %v653_v34, 4  ;;  %v668_v19 = vadd.f32 %v661_v62, %v605_v46  ;;  %v604_v6 = vadd.f32 %v601_v47, %v576_v55  ;;  %v3700_v28 = vld [vmem:[#allocation66_spill] sm:$0xff]  ;;  %v674_v55 = vpop.permute.xlu0 %673  ;;  %v3701_v46 = vld [vmem:[#allocation63_spill] sm:$0xff] }
 0x11a   : > { %v612_v60 = vadd.f32 %v609_v4, %v521_v36  ;;  %v3694_v17 = vstv %s3691_s29  ;;  %v626_v11 = vsel %vm263_vm2, %v623_v45, %v625_v63  ;;  %v588_v8 = vadd.f32 %v2845_v41, %v538_v16  ;;  %p1902_p3 = pneg %p1901_p7  ;;  %s1982_s29 = smov [#allocation8]  }
 0x11b   : > { %v678_v20 = vmul.f32 %v3694_v17, %v2883_v15  ;;  %v3695_v44 = vmov %v3694_v17  ;;  %v3696_v37 = vstv %s3692_s5  ;;  %v641_v24 = vsel %vm263_vm2, %v639_v56, %v640_v48 }
 0x11c   : > { %v677_v12 = vmul.f32 %v3695_v44, %v670_v3  ;;  %v2917_v23 = vmul.f32 %v3696_v37, %v2903_v38  ;;  %v643_v2 = vsel %vm263_vm2, %v640_v48, %v642_v33  ;;  %v630_v21 = vadd.f32 %v626_v11, %v589_v31  ;;  %v3704_v37 = vld [vmem:[#allocation72_spill] sm:$0xff] }
 0x11d   : > { %v624_v50 = vsel %vm263_vm2, %v622_v52, %v623_v45  ;;  %v648_v51 = vadd.f32 %v643_v2, %v596_v58  ;;  %v660_v18 = vsel %vm263_vm2, %v658_v9, %v659_v0  ;;  %v662_v53 = vsel %vm263_vm2, %v659_v0, %v661_v62 }
 0x11e   : > { %v707_v41 = vmul.f32 %v3697_v10, %v670_v3  ;;  %v667_v22 = vadd.f32 %v662_v53, %v604_v6  ;;  %v683_v29 = vmul.f32 %v3698_v26, %v670_v3  ;;  %v684_v30 = vmul.f32 %v3698_v26, %v2883_v15 }
 0x11f   : > { %v708_v56 = vmul.f32 %v3697_v10, %v2883_v15  ;;  %v629_v49 = vadd.f32 %v624_v50, %v588_v8  ;;  %v700_v52 = vmul.f32 %v3699_v14, %v2883_v15  ;;  %v724_v43 = vmul.f32 %v3700_v28, %v670_v3 }
 0x120   : > { %v725_v9 = vmul.f32 %v3700_v28, %v2883_v15  ;;  %v680_v1 = vadd.f32 %v678_v20, %v630_v21  ;;  %v691_v63 = vmul.f32 %v3701_v46, %v670_v3  ;;  %v692_v5 = vmul.f32 %v3701_v46, %v2883_v15 }
 0x121   : > { %v743_v33 = vmul.f32 %v3702_v13, %v670_v3  ;;  %v687_v27 = vadd.f32 %v684_v30, %v648_v51  ;;  %v699_v59 = vmul.f32 %v3699_v14, %v670_v3  ;;  %v713_v4 = vrot.slane %v707_v41, 4 }
 0x122   : > { %v714_v34 = vrot.slane %v708_v56, 4  ;;  %v695_v62 = vadd.f32 %v692_v5, %v667_v22  ;;  %v744_v42 = vmul.f32 %v3702_v13, %v2883_v15  ;;  %v647_v36 = vadd.f32 %v641_v24, %v595_v25  ;;  %v765_v22 = vpop.permute.xlu1 %764 }
 0x123   : > { %v685_v54 = vmul.f32 %v3698_v26, %v674_v55  ;;  %v679_v45 = vadd.f32 %v677_v12, %v629_v49  ;;  %v2943_v31 = vadd.f32 %v700_v52, %v612_v60  ;;  %v730_v47 = vrot.slane %v724_v43, 4  ;;  %v763_v43 = vpop.permute.xlu0 %762 }
 0x124   : > { %v731_v48 = vrot.slane %v725_v9, 4  ;;  %v749_v40 = vrot.slane %v743_v33, 4  ;;  %v666_v16 = vadd.f32 %v660_v18, %v2889_v7  ;;  %v693_v58 = vmul.f32 %v3701_v46, %v674_v55  ;;  %v3703_v7 = vld [vmem:[#allocation71_spill] sm:$0xff] }
 0x125   : > { %v709_v3 = vmul.f32 %v3697_v10, %v674_v55  ;;  %v715_v0 = vsel %vm263_vm2, %v713_v4, %v714_v34  ;;  %v701_v6 = vmul.f32 %v3699_v14, %v674_v55  ;;  %v726_v15 = vmul.f32 %v3700_v28, %v674_v55  ;;  %v3705_v10 = vld [vmem:[#allocation68_spill] sm:$0xff] }
 0x126   : > { %v745_v25 = vmul.f32 %v3702_v13, %v674_v55  ;;  %v750_v17 = vrot.slane %v744_v42, 4  ;;  %v686_v60 = vadd.f32 %v683_v29, %v647_v36  ;;  %v688_v20 = vadd.f32 %v685_v54, %v649_v39  ;;  %v3706_v29 = vld [vmem:[#allocation69_spill] sm:$0xff] }
 0x127   : > { %v716_v11 = vrot.slane %v709_v3, 4  ;;  %v733_v8 = vrot.slane %v726_v15, 4  ;;  %v798_v12 = vmul.f32 %v3703_v7, %v2903_v38  ;;  %v2956_v24 = vmul.f32 %v3704_v37, %v2903_v38 }
 0x128   : > { %v752_v44 = vrot.slane %v745_v25, 4  ;;  %v694_v2 = vadd.f32 %v691_v63, %v666_v16  ;;  %v696_v21 = vadd.f32 %v693_v58, %v668_v19  ;;  %v702_v50 = vadd.f32 %v699_v59, %v2891_v57  ;;  %v3707_v19 = vld [vmem:[#allocation70_spill] sm:$0xff]  ;;  %v3708_v57 = vld [vmem:[#allocation73_spill] sm:$0xff] }
 0x129   : > { %v732_v51 = vsel %vm263_vm2, %v730_v47, %v731_v48  ;;  %v704_v18 = vadd.f32 %v701_v6, %v2905_v61  ;;  %v717_v39 = vsel %vm263_vm2, %v714_v34, %v716_v11  ;;  %v720_v53 = vadd.f32 %v715_v0, %v679_v45 }
 0x12a   : > { %v774_v41 = vmul.f32 %v3705_v10, %v2903_v38  ;;  %v734_v26 = vsel %vm263_vm2, %v731_v48, %v733_v8  ;;  %v782_v30 = vmul.f32 %v3706_v29, %v2903_v38  ;;  %v790_v56 = vmul.f32 %v3707_v19, %v2903_v38  ;;  %v857_v48 = vpop.permute.xlu1 %856 }
 0x12b   : > { %v2971_v49 = vmul.f32 %v3708_v57, %v2903_v38  ;;  %v753_v61 = vsel %vm263_vm2, %v750_v17, %v752_v44  ;;  %v804_v14 = vrot.slane %v798_v12, 4  ;;  %v821_v52 = vrot.slane %v2956_v24, 4 }
 0x12c   : > { %v738_v28 = vadd.f32 %v732_v51, %v686_v60  ;;  %v721_v9 = vadd.f32 %v717_v39, %v680_v1  ;;  %v740_v55 = vadd.f32 %v733_v8, %v688_v20  ;;  %v751_v46 = vsel %vm263_vm2, %v749_v40, %v750_v17 }
 0x12d   : > { %v800_v63 = vmul.f32 %v3703_v7, %v765_v22  ;;  %v739_v5 = vadd.f32 %v734_v26, %v687_v27  ;;  %v776_v13 = vmul.f32 %v3705_v10, %v765_v22  ;;  %v817_v38 = vmul.f32 %v3704_v37, %v765_v22 }
 0x12e   : > { %v836_v33 = vmul.f32 %v3708_v57, %v765_v22  ;;  %v758_v59 = vadd.f32 %v753_v61, %v695_v62  ;;  %v759_v4 = vadd.f32 %v752_v44, %v696_v21  ;;  %v840_v34 = vrot.slane %v2971_v49, 4 }
 0x12f   : > { %v3709_v42 = vstv %s3692_s5  ;;  %v757_v54 = vadd.f32 %v751_v46, %v694_v2  ;;  %v777_v1 = vadd.f32 %v774_v41, %v738_v28  ;;  %v784_v45 = vmul.f32 %v3706_v29, %v765_v22  ;;  %v855_v2 = vpop.permute.xlu0 %854  ;;  %s1903_s5 = sshll.u32 %s1982_s29, 4  ;;  %s1904_s5 = int_to_ptr.vmem [resolvable:$false] %s1903_s5 }
 0x130   : > { %v769_v36 = vmul.f32 %v3709_v42, %v763_v43  ;;  %v792_v47 = vmul.f32 %v3707_v19, %v765_v22  ;;  %v807_v27 = vrot.slane %v800_v63, 4  ;;  %v775_v40 = vmul.f32 %v3705_v10, %v763_v43  ;;  %v3715_v63 = vld [vmem:[#allocation77_spill] sm:$0xff]  ;;  %p1906_p6 = scmp.lt.s32.totalorder %s3379_s6, %s1904_s5 }
 0x131   : > { %v799_v16 = vmul.f32 %v3703_v7, %v763_v43  ;;  %v816_v58 = vmul.f32 %v3704_v37, %v763_v43  ;;  %v779_v62 = vadd.f32 %v776_v13, %v740_v55  ;;  %v824_v3 = vrot.slane %v817_v38, 4  ;;  %v3714_v55 = vld [vmem:[#allocation75_spill] sm:$0xff] }
 0x132   : > { %v843_v0 = vrot.slane %v836_v33, 4  ;;  %v783_v6 = vmul.f32 %v3706_v29, %v763_v43  ;;  %v771_v15 = vadd.f32 %v769_v36, %v721_v9  ;;  %v835_v60 = vmul.f32 %v3708_v57, %v763_v43  ;;  %v3717_v36 = vld [vmem:[#allocation78_spill] sm:$0xff] }
 0x133   : > { %v805_v25 = vrot.slane %v799_v16, 4  ;;  %v822_v17 = vrot.slane %v816_v58, 4  ;;  %v785_v20 = vadd.f32 %v782_v30, %v757_v54  ;;  %v787_v11 = vadd.f32 %v784_v45, %v759_v4 }
 0x134   : > { %v2990_v8 = vadd.f32 %v790_v56, %v702_v50  ;;  %v791_v44 = vmul.f32 %v3707_v19, %v763_v43  ;;  %v2993_v7 = vadd.f32 %v792_v47, %v704_v18  ;;  %v778_v12 = vadd.f32 %v775_v40, %v739_v5  ;;  %v2999_v50 = vpop.permute.xlu1 %945  ;;  %v859_v47 = vpop.permute.xlu0 %858 }
 0x135   : > { %v841_v37 = vrot.slane %v835_v60, 4  ;;  %v808_v24 = vsel %vm263_vm2, %v805_v25, %v807_v27  ;;  %v786_v21 = vadd.f32 %v783_v6, %v758_v59  ;;  %v825_v51 = vsel %vm263_vm2, %v822_v17, %v824_v3 }
 0x136   : > { %v806_v39 = vsel %vm263_vm2, %v804_v14, %v805_v25  ;;  %v770_v10 = vadd.f32 %v2917_v23, %v720_v53  ;;  %v831_v41 = vadd.f32 %v824_v3, %v779_v62  ;;  %v812_v22 = vadd.f32 %v808_v24, %v771_v15  ;;  %v3713_v53 = vld [vmem:[#allocation74_spill] sm:$0xff] }
 0x137   : > { %v844_v18 = vsel %vm263_vm2, %v841_v37, %v843_v0  ;;  %v3710_v26 = vstv %s2397_s9  ;;  %v850_v30 = vadd.f32 %v843_v0, %v787_v11  ;;  %v794_v19 = vadd.f32 %v791_v44, %v2943_v31  ;;  %s3133_s9 = sld [smem:[#allocation3 + $0x50]] }
 0x138   : > { %v863_v29 = vmul.f32 %v3710_v26, %v857_v48  ;;  %v811_v56 = vadd.f32 %v806_v39, %v770_v10  ;;  %v3711_v57 = vmov %v3710_v26  ;;  %v823_v61 = vsel %vm263_vm2, %v821_v52, %v822_v17  ;;  %v3716_v52 = vld [vmem:[#allocation76_spill] sm:$0xff] }
 0x139   : > { %v862_v49 = vmul.f32 %v3711_v57, %v855_v2  ;;  %v830_v28 = vadd.f32 %v825_v51, %v778_v12  ;;  %v3712_v14 = vstv %s2451_s4  ;;  %v869_v43 = vmul.f32 %v3713_v53, %v857_v48  ;;  %v3719_v57 = vld [vmem:[#allocation83_spill] sm:$0xff] }
 0x13a   : > { %v3011_v23 = vmul.f32 %v3712_v14, %v2999_v50  ;;  %v849_v9 = vadd.f32 %v844_v18, %v786_v21  ;;  %v877_v46 = vmul.f32 %v3714_v55, %v857_v48  ;;  %v892_v5 = vmul.f32 %v3715_v63, %v855_v2 }
 0x13b   : > { %v893_v13 = vmul.f32 %v3715_v63, %v857_v48  ;;  %v842_v31 = vsel %vm263_vm2, %v840_v34, %v841_v37  ;;  %v865_v38 = vadd.f32 %v863_v29, %v812_v22  ;;  %v868_v33 = vmul.f32 %v3713_v53, %v855_v2  ;;  %v3718_v34 = vld [vmem:[#allocation79_spill] sm:$0xff] }
 0x13c   : > { %v885_v59 = vmul.f32 %v3716_v52, %v857_v48  ;;  %v864_v4 = vadd.f32 %v862_v49, %v811_v56  ;;  %v876_v42 = vmul.f32 %v3714_v55, %v855_v2  ;;  %v909_v54 = vmul.f32 %v3717_v36, %v855_v2 }
 0x13d   : > { %v910_v45 = vmul.f32 %v3717_v36, %v857_v48  ;;  %v872_v27 = vadd.f32 %v869_v43, %v830_v28  ;;  %v884_v40 = vmul.f32 %v3716_v52, %v855_v2  ;;  %v898_v16 = vrot.slane %v892_v5, 4  ;;  %v3721_v43 = vld [vmem:[#allocation84_spill] sm:$0xff]  ;;  %v3724_v5 = vld [vmem:[#allocation85_spill] sm:$0xff] }
 0x13e   : > { %v899_v58 = vrot.slane %v893_v13, 4  ;;  %v880_v62 = vadd.f32 %v877_v46, %v849_v9  ;;  %v928_v3 = vmul.f32 %v3718_v34, %v855_v2  ;;  %v929_v0 = vmul.f32 %v3718_v34, %v857_v48  ;;  %v3723_v46 = vld [vmem:[#allocation82_spill] sm:$0xff] }
 0x13f   : > { %v829_v6 = vadd.f32 %v823_v61, %v777_v1  ;;  %v3026_v15 = vadd.f32 %v885_v59, %v794_v19  ;;  %v848_v25 = vadd.f32 %v842_v31, %v785_v20  ;;  %v870_v17 = vmul.f32 %v3713_v53, %v859_v47  ;;  %v950_v61 = vpop.permute.xlu1 %949  ;;  %v3720_v53 = vld [vmem:[#allocation80_spill] sm:$0xff] }
 0x140   : > { %v894_v60 = vmul.f32 %v3715_v63, %v859_v47  ;;  %v915_v11 = vrot.slane %v909_v54, 4  ;;  %v916_v44 = vrot.slane %v910_v45, 4  ;;  %v878_v12 = vmul.f32 %v3714_v55, %v859_v47 }
 0x141   : > { %v911_v37 = vmul.f32 %v3717_v36, %v859_v47  ;;  %v900_v24 = vsel %vm263_vm2, %v898_v16, %v899_v58  ;;  %v886_v2 = vmul.f32 %v3716_v52, %v859_v47  ;;  %v930_v1 = vmul.f32 %v3718_v34, %v859_v47  ;;  %v948_v36 = vpop.permute.xlu0 %947 }
 0x142   : > { %v901_v21 = vrot.slane %v894_v60, 4  ;;  %v934_v48 = vrot.slane %v928_v3, 4  ;;  %v935_v51 = vrot.slane %v929_v0, 4  ;;  %v871_v20 = vadd.f32 %v868_v33, %v829_v6 }
 0x143   : > { %v918_v39 = vrot.slane %v911_v37, 4  ;;  %v873_v10 = vadd.f32 %v870_v17, %v831_v41  ;;  %v879_v18 = vadd.f32 %v876_v42, %v848_v25  ;;  %v937_v26 = vrot.slane %v930_v1, 4  ;;  %v3061_v3 = vpop.permute.xlu1 %1038 }
 0x144   : > { %v902_v22 = vsel %vm263_vm2, %v899_v58, %v901_v21  ;;  %v881_v29 = vadd.f32 %v878_v12, %v850_v30  ;;  %v887_v19 = vadd.f32 %v884_v40, %v2990_v8  ;;  %v3037_v56 = vadd.f32 %v900_v24, %v864_v4  ;;  %v3722_v30 = vld [vmem:[#allocation81_spill] sm:$0xff] }
 0x145   : > { %v983_v49 = vmul.f32 %v3719_v57, %v2999_v50  ;;  %v889_v28 = vadd.f32 %v886_v2, %v2993_v7  ;;  %v919_v14 = vsel %vm263_vm2, %v916_v44, %v918_v39  ;;  %v959_v41 = vmul.f32 %v3720_v53, %v2999_v50 }
 0x146   : > { %v1000_v9 = vmul.f32 %v3721_v43, %v2999_v50  ;;  %v906_v55 = vadd.f32 %v902_v22, %v865_v38  ;;  %v967_v8 = vmul.f32 %v3722_v30, %v2999_v50  ;;  %v975_v63 = vmul.f32 %v3723_v46, %v2999_v50 }
 0x147   : > { %v1019_v13 = vmul.f32 %v3724_v5, %v2999_v50  ;;  %v925_v31 = vadd.f32 %v918_v39, %v873_v10  ;;  %v938_v7 = vsel %vm263_vm2, %v935_v51, %v937_v26  ;;  %v917_v33 = vsel %vm263_vm2, %v915_v11, %v916_v44 }
 0x148   : > { %v961_v52 = vmul.f32 %v3720_v53, %v950_v61  ;;  %v924_v59 = vadd.f32 %v919_v14, %v872_v27  ;;  %v989_v4 = vrot.slane %v983_v49, 4  ;;  %v936_v38 = vsel %vm263_vm2, %v934_v48, %v935_v51  ;;  %v1037_v49 = vpop.permute.xlu0 %1036 }
 0x149   : > { %v1002_v42 = vmul.f32 %v3721_v43, %v950_v61  ;;  %v944_v54 = vadd.f32 %v937_v26, %v881_v29  ;;  %v1006_v45 = vrot.slane %v1000_v9, 4  ;;  %v969_v47 = vmul.f32 %v3722_v30, %v950_v61 }
 0x14a   : > { %v985_v50 = vmul.f32 %v3719_v57, %v950_v61  ;;  %v943_v40 = vadd.f32 %v938_v7, %v880_v62  ;;  %v1025_v16 = vrot.slane %v1019_v13, 4  ;;  %v923_v58 = vadd.f32 %v917_v33, %v871_v20 }
 0x14b   : > { %v1021_v34 = vmul.f32 %v3724_v5, %v950_v61  ;;  %v942_v27 = vadd.f32 %v936_v38, %v879_v18  ;;  %v964_v0 = vadd.f32 %v961_v52, %v925_v31  ;;  %v977_v6 = vmul.f32 %v3723_v46, %v950_v61  ;;  %v3077_v61 = vpop.permute.xlu1 %1212  ;;  %v3729_v52 = vld [vmem:[#allocation86_spill] sm:$0xff]  ;;  %v3730_v38 = vld [vmem:[#allocation89_spill] sm:$0xff] }
 0x14c   : > { %v960_v25 = vmul.f32 %v3720_v53, %v948_v36  ;;  %v1009_v17 = vrot.slane %v1002_v42, 4  ;;  %v3725_v60 = vstv %s2451_s4  ;;  %v984_v44 = vmul.f32 %v3719_v57, %v948_v36  ;;  %s3180_s4 = sld [smem:[#allocation3 + $0x36]] }
 0x14d   : > { %v954_v11 = vmul.f32 %v3725_v60, %v948_v36  ;;  %v1001_v12 = vmul.f32 %v3721_v43, %v948_v36  ;;  %v972_v62 = vadd.f32 %v969_v47, %v944_v54  ;;  %v992_v37 = vrot.slane %v985_v50, 4  ;;  %v3732_v47 = vld [vmem:[#allocation92_spill] sm:$0xff] }
 0x14e   : > { %v968_v24 = vmul.f32 %v3722_v30, %v948_v36  ;;  %v976_v2 = vmul.f32 %v3723_v46, %v948_v36  ;;  %v1028_v21 = vrot.slane %v1021_v34, 4  ;;  %v990_v1 = vrot.slane %v984_v44, 4 }
 0x14f   : > { %v1007_v48 = vrot.slane %v1001_v12, 4  ;;  %v1020_v51 = vmul.f32 %v3724_v5, %v948_v36  ;;  %v962_v20 = vadd.f32 %v959_v41, %v923_v58  ;;  %v970_v39 = vadd.f32 %v967_v8, %v942_v27 }
 0x150   : > { %v3072_v10 = vadd.f32 %v975_v63, %v887_v19  ;;  %v963_v18 = vadd.f32 %v960_v25, %v924_v59  ;;  %v3074_v22 = vadd.f32 %v977_v6, %v889_v28  ;;  %v956_v26 = vadd.f32 %v954_v11, %v906_v55  ;;  %v3733_v6 = vld [vmem:[#allocation87_spill] sm:$0xff] }
 0x151   : > { %v1010_v29 = vsel %vm263_vm2, %v1007_v48, %v1009_v17  ;;  %v1026_v57 = vrot.slane %v1020_v51, 4  ;;  %v1016_v14 = vadd.f32 %v1009_v17, %v964_v0  ;;  %v971_v53 = vadd.f32 %v968_v24, %v943_v40 }
 0x152   : > { %v979_v43 = vadd.f32 %v976_v2, %v3026_v15  ;;  %v993_v41 = vsel %vm263_vm2, %v990_v1, %v992_v37  ;;  %v1035_v19 = vadd.f32 %v1028_v21, %v972_v62  ;;  %v3726_v9 = vstv %s2493_s30  ;;  %s3205_s30 = sld [smem:[#allocation3 + $0x52]] }
 0x153   : > { %v1045_v28 = vmul.f32 %v3726_v9, %v3061_v3  ;;  %v991_v30 = vsel %vm263_vm2, %v989_v4, %v990_v1  ;;  %v955_v55 = vadd.f32 %v3011_v23, %v3037_v56  ;;  %v1008_v8 = vsel %vm263_vm2, %v1006_v45, %v1007_v48  ;;  %v3731_v56 = vld [vmem:[#allocation90_spill] sm:$0xff]  ;;  %v3734_v48 = vld [vmem:[#allocation88_spill] sm:$0xff] }
 0x154   : > { %v1015_v46 = vadd.f32 %v1010_v29, %v963_v18  ;;  %v3727_v63 = vmov %v3726_v9  ;;  %v3728_v13 = vstv %s2597_s21  ;;  %v1027_v15 = vsel %vm263_vm2, %v1025_v16, %v1026_v57  ;;  %v1041_v16 = vpop.permute.xlu0 %1040 }
 0x155   : > { %v1044_v5 = vmul.f32 %v3727_v63, %v1037_v49  ;;  %v3093_v31 = vmul.f32 %v3728_v13, %v3077_v61  ;;  %v1029_v7 = vsel %vm263_vm2, %v1026_v57, %v1028_v21  ;;  %v997_v33 = vadd.f32 %v993_v41, %v956_v26 }
 0x156   : > { %v1050_v59 = vmul.f32 %v3729_v52, %v1037_v49  ;;  %v996_v4 = vadd.f32 %v991_v30, %v955_v55  ;;  %v1074_v42 = vmul.f32 %v3730_v38, %v1037_v49  ;;  %v1075_v23 = vmul.f32 %v3730_v38, %v3061_v3 }
 0x157   : > { %v1091_v36 = vmul.f32 %v3731_v56, %v1037_v49  ;;  %v1051_v54 = vmul.f32 %v3729_v52, %v3061_v3  ;;  %v1092_v45 = vmul.f32 %v3731_v56, %v3061_v3  ;;  %v1110_v50 = vmul.f32 %v3732_v47, %v1037_v49 }
 0x158   : > { %v1111_v40 = vmul.f32 %v3732_v47, %v3061_v3  ;;  %v1034_v58 = vadd.f32 %v1029_v7, %v971_v53  ;;  %v1080_v34 = vrot.slane %v1074_v42, 4  ;;  %v1081_v27 = vrot.slane %v1075_v23, 4 }
 0x159   : > { %v1014_v0 = vadd.f32 %v1008_v8, %v962_v20  ;;  %v1058_v25 = vmul.f32 %v3733_v6, %v1037_v49  ;;  %v1097_v17 = vrot.slane %v1091_v36, 4  ;;  %v1098_v60 = vrot.slane %v1092_v45, 4 }
 0x15a   : > { %v1033_v11 = vadd.f32 %v1027_v15, %v970_v39  ;;  %v1116_v44 = vrot.slane %v1110_v50, 4  ;;  %v1117_v12 = vrot.slane %v1111_v40, 4  ;;  %v1052_v62 = vmul.f32 %v3729_v52, %v1041_v16  ;;  %v3739_v40 = vld [vmem:[#allocation111_spill] sm:$0xff] }
 0x15b   : > { %v1060_v37 = vmul.f32 %v3733_v6, %v1041_v16  ;;  %v1047_v24 = vadd.f32 %v1045_v28, %v997_v33  ;;  %v1046_v2 = vadd.f32 %v1044_v5, %v996_v4  ;;  %v1054_v21 = vadd.f32 %v1051_v54, %v1015_v46  ;;  %v3737_v54 = vld [vmem:[#allocation98_spill] sm:$0xff] }
 0x15c   : > { %v1059_v1 = vmul.f32 %v3733_v6, %v3061_v3  ;;  %v1067_v51 = vmul.f32 %v3734_v48, %v3061_v3  ;;  %v1082_v20 = vsel %vm263_vm2, %v1080_v34, %v1081_v27  ;;  %v1053_v18 = vadd.f32 %v1050_v59, %v1014_v0  ;;  %v3741_v0 = vld [vmem:[#allocation94_spill] sm:$0xff] }
 0x15d   : > { %v1076_v39 = vmul.f32 %v3730_v38, %v1041_v16  ;;  %v1099_v26 = vsel %vm263_vm2, %v1097_v17, %v1098_v60  ;;  %v1055_v29 = vadd.f32 %v1052_v62, %v1016_v14  ;;  %v1061_v57 = vadd.f32 %v1058_v25, %v1033_v11  ;;  %v3743_v25 = vld [vmem:[#allocation99_spill] sm:$0xff] }
 0x15e   : > { %v1093_v53 = vmul.f32 %v3731_v56, %v1041_v16  ;;  %v1118_v41 = vsel %vm263_vm2, %v1116_v44, %v1117_v12  ;;  %v1063_v9 = vadd.f32 %v1060_v37, %v1035_v19  ;;  %v1112_v30 = vmul.f32 %v3732_v47, %v1041_v16  ;;  %v3736_v56 = vld [vmem:[#allocation110_spill] sm:$0xff]  ;;  %v3738_v47 = vld [vmem:[#allocation101_spill] sm:$0xff]  ;;  %v3746_v62 = vld [vmem:[#allocation107_spill] sm:$0xff] }
 0x15f   : > { %v1083_v28 = vrot.slane %v1076_v39, 4  ;;  %v1062_v55 = vadd.f32 %v1059_v1, %v1034_v58  ;;  %v1066_v3 = vmul.f32 %v3734_v48, %v1037_v49  ;;  %v1068_v8 = vmul.f32 %v3734_v48, %v1041_v16  ;;  %v3735_v49 = vld [vmem:[#allocation108_spill] sm:$0xff]  ;;  %v3745_v44 = vld [vmem:[#allocation106_spill] sm:$0xff] }
 0x160   : > { %v1100_v46 = vrot.slane %v1093_v53, 4  ;;  %v3124_v63 = vadd.f32 %v1067_v51, %v979_v43  ;;  %v1105_v14 = vadd.f32 %v1099_v26, %v1053_v18  ;;  %v1119_v13 = vrot.slane %v1112_v30, 4  ;;  %v3740_v58 = vld [vmem:[#allocation96_spill] sm:$0xff]  ;;  %v3748_v51 = vld [vmem:[#allocation102_spill] sm:$0xff]  ;;  %v3749_v18 = vld [vmem:[#allocation109_spill] sm:$0xff] }
 0x161   : > { %v1084_v5 = vsel %vm263_vm2, %v1081_v27, %v1083_v28  ;;  %v1087_v15 = vadd.f32 %v1082_v20, %v1046_v2  ;;  %v1124_v19 = vadd.f32 %v1118_v41, %v1061_v57  ;;  %v3131_v38 = vmul.f32 %v3735_v49, %v3077_v61  ;;  %v1217_v2 = vpop.permute.xlu1 %1216  ;;  %v3752_v41 = vld [vmem:[#allocation113_spill] sm:$0xff]  ;;  %v3753_v28 = vld [vmem:[#allocation100_spill] sm:$0xff] }
 0x162   : > { %v1101_v7 = vsel %vm263_vm2, %v1098_v60, %v1100_v46  ;;  %v1107_v33 = vadd.f32 %v1100_v46, %v1055_v29  ;;  %v1088_v52 = vadd.f32 %v1084_v5, %v1047_v24  ;;  %v1120_v59 = vsel %vm263_vm2, %v1117_v12, %v1119_v13  ;;  %v3744_v60 = vld [vmem:[#allocation95_spill] sm:$0xff] }
 0x163   : > { %v1126_v4 = vadd.f32 %v1119_v13, %v1063_v9  ;;  %v1069_v43 = vadd.f32 %v1066_v3, %v3072_v10  ;;  %v1071_v42 = vadd.f32 %v1068_v8, %v3074_v22  ;;  %v1106_v23 = vadd.f32 %v1101_v7, %v1054_v21  ;;  %v3742_v22 = vld [vmem:[#allocation104_spill] sm:$0xff]  ;;  %v3747_v21 = vld [vmem:[#allocation97_spill] sm:$0xff]  ;;  %v3750_v29 = vld [vmem:[#allocation103_spill] sm:$0xff] }
 0x164   : > { %v3139_v36 = vmul.f32 %v3736_v56, %v3077_v61  ;;  %v1140_v45 = vadd.f32 %v3737_v54, %v1107_v33  ;;  %v3145_v16 = vmul.f32 %v3739_v40, %v3077_v61  ;;  %v1138_v34 = vadd.f32 %v3740_v58, %v1105_v14 }
 0x165   : > { %v1148_v50 = vadd.f32 %v3738_v47, %v1126_v4  ;;  %v1125_v27 = vadd.f32 %v1120_v59, %v1062_v55  ;;  %v3149_v10 = vadd.f32 %v3741_v0, %v1087_v15  ;;  %v1226_v6 = vmul.f32 %v3742_v22, %v3077_v61  ;;  %v3754_v55 = vld [vmem:[#allocation105_spill] sm:$0xff]  ;;  %v1846_v59 = vld [vmem:[#allocation2 + $0x28] sm:$0xff] }
 0x166   : > { %v1146_v17 = vadd.f32 %v3743_v25, %v1124_v19  ;;  %v1132_v11 = vadd.f32 %v3744_v60, %v1088_v52  ;;  %v1234_v12 = vmul.f32 %v3745_v44, %v3077_v61  ;;  %v1242_v37 = vmul.f32 %v3746_v62, %v3077_v61  ;;  %v1845_v19 = vld [vmem:[#allocation2 + $0x20] sm:$0xff] }
 0x167   : > { %v1256_v24 = vrot.slane %v3131_v38, 4  ;;  %v1139_v1 = vadd.f32 %v3747_v21, %v1106_v23  ;;  %v1273_v48 = vrot.slane %v3139_v36, 4  ;;  %v1154_v20 = vadd.f32 %v3748_v51, %v1069_v43  ;;  %v1215_v43 = vpop.permute.xlu0 %1214  ;;  %v3760_v21 = vld [vmem:[#allocation112_spill] sm:$0xff] }
 0x168   : > { %v1190_v39 = vadd.f32 %v3749_v18, %v1138_v34  ;;  %v1292_v26 = vrot.slane %v3145_v16, 4  ;;  %v3751_v57 = vrot.slane %v3750_v29, 4  ;;  %v1209_v9 = vadd.f32 %v3752_v41, %v1146_v17  ;;  %v3756_v34 = vld [vmem:[#allocation91_spill] sm:$0xff] }
 0x169   : > { %v1211_v61 = vadd.f32 %v1204_v32, %v1148_v50  ;;  %v1147_v30 = vadd.f32 %v3753_v28, %v1125_v27  ;;  %v1156_v3 = vadd.f32 %v3754_v55, %v1071_v42  ;;  %v1228_v8 = vmul.f32 %v3742_v22, %v1217_v2 }
 0x16a   : > { %v1192_v53 = vadd.f32 %v3751_v57, %v1140_v45  ;;  %v1236_v46 = vmul.f32 %v3745_v44, %v1217_v2  ;;  %v1244_v5 = vmul.f32 %v3746_v62, %v1217_v2  ;;  %v3176_v14 = vmul.f32 %v3735_v49, %v1217_v2 }
 0x16b   : > { %v1269_v13 = vmul.f32 %v3736_v56, %v1217_v2  ;;  %v1158_v15 = vstv %s3133_s9  ;;  %v3182_v7 = vadd.f32 %v1226_v6, %v1190_v39  ;;  %v3184_v33 = vadd.f32 %v1242_v37, %v1154_v20  ;;  %v3758_v6 = vld [vmem:[#allocation93_spill] sm:$0xff]  ;;  %v1304_v28 = vpop.permute.xlu0 %1303  ;;  %s1905_s9 = scalar_lea.vmem %s1904_s5, 2048 }
 0x16c   : > { %v1160_v52 = vmul.f32 %v1845_v19, %v1158_v15  ;;  %v1161_v4 = vmul.f32 %v1846_v59, %v1158_v15  ;;  %v1231_v42 = vadd.f32 %v1228_v8, %v1192_v53  ;;  %v3186_v23 = vadd.f32 %v1234_v12, %v1209_v9  ;;  %p1907_p4 = scmp.lt.s32.totalorder %s1905_s9, %s1899_s23 }
 0x16d   : > { %v1239_v54 = vadd.f32 %v1236_v46, %v1211_v61  ;;  %v1288_v45 = vmul.f32 %v3739_v40, %v1217_v2  ;;  %v3755_v58 = vmov %v3751_v57  ;;  %v3757_v27 = vrot.slane %v3756_v34, 4  ;;  %v1847_v61 = vld [vmem:[#allocation2 + $0x18] sm:$0xff] }
 0x16e   : > { %v1166_v47 = vrot.slane %v1160_v52, 4  ;;  %v1168_v50 = vrot.slane %v1161_v4, 4  ;;  %v3759_v25 = vrot.slane %v3758_v6, 4  ;;  %v3201_v60 = vadd.f32 %v1244_v5, %v1156_v3  ;;  %p1908_p5 = por %p1907_p4, %p1906_p6 }
 0x16f   : > { %v1186_v0 = vsel %vm263_vm2, %v3757_v27, %v3755_v58  ;;  %v1259_v12 = vrot.slane %v3176_v14, 4  ;;  %v1276_v37 = vrot.slane %v1269_v13, 4  ;;  %v1251_v2 = vmul.f32 %v3735_v49, %v1215_v43 }
 0x170   : > { %v1205_v17 = vsel %vm263_vm2, %v3759_v25, %v1204_v32  ;;  %v1155_v51 = vadd.f32 %v3760_v21, %v3124_v63  ;;  %v1169_v35 = vsel %vm263_vm2, %v1166_v47, %v1168_v50  ;;  %v1268_v32 = vmul.f32 %v3736_v56, %v1215_v43  ;;  %v1308_v25 = vpop.permute.xlu0 %1307  ;;  %p1909_p0 = pnand %p1908_p5, %p1902_p3 }
 0x171   : > { %v1287_v20 = vmul.f32 %v3739_v40, %v1215_v43  ;;  %v1173_v18 = vadd.f32 %v1169_v35, %v1132_v11  ;;  %v1191_v39 = vadd.f32 %v1186_v0, %v1139_v1  ;;  %v1210_v29 = vadd.f32 %v1205_v17, %v1147_v30  ;;  %v1306_v1 = vpop.permute.xlu1 %1305 }
 0x172   : > { %v1243_v57 = vmul.f32 %v3746_v62, %v1215_v43  ;;  %v1295_v49 = vrot.slane %v1288_v45, 4  ;;  %v3761_v53 = vstv %s2597_s21  ;;  %v1227_v9 = vmul.f32 %v3742_v22, %v1215_v43  ;;  %s3764_s21 = sld [smem:[#allocation22_spill]] }
 0x173   : > { %v1221_v41 = vmul.f32 %v3761_v53, %v1215_v43  ;;  %v1274_v63 = vrot.slane %v1268_v32, 4  ;;  %v1235_v56 = vmul.f32 %v3745_v44, %v1215_v43  ;;  %v1257_v40 = vrot.slane %v1251_v2, 4 }
 0x174   : > { %v1310_v11 = vstv %s3180_s4  ;;  %v1159_v62 = vmul.f32 %v1847_v61, %v1158_v15  ;;  %v3226_v30 = vadd.f32 %v1276_v37, %v1231_v42  ;;  %v3228_v22 = vadd.f32 %v1295_v49, %v1239_v54 }
 0x175   : > { %v1223_v55 = vadd.f32 %v1221_v41, %v1173_v18  ;;  %v1293_v3 = vrot.slane %v1287_v20, 4  ;;  %v1230_v8 = vadd.f32 %v1227_v9, %v1191_v39  ;;  %v1238_v46 = vadd.f32 %v1235_v56, %v1210_v29  ;;  %v3280_v35 = vpop.permute.xlu1 %1394 }
 0x176   : > { %v3230_v5 = vadd.f32 %v1243_v57, %v1155_v51  ;;  %v1165_v44 = vrot.slane %v1159_v62, 4  ;;  %v1275_v14 = vsel %vm263_vm2, %v1273_v48, %v1274_v63  ;;  %v1312_v13 = vmul.f32 %v1310_v11, %v1306_v1 }
 0x177   : > { %v1311_v15 = vmul.f32 %v1310_v11, %v1304_v28  ;;  %v1316_v19 = vstv %s3199_s17  ;;  %v1277_v52 = vsel %vm263_vm2, %v1274_v63, %v1276_v37  ;;  %v1260_v59 = vsel %vm263_vm2, %v1257_v40, %v1259_v12 }
 0x178   : > { %v1167_v4 = vsel %vm263_vm2, %v1165_v44, %v1166_v47  ;;  %v1340_v43 = vstv %s3205_s30  ;;  %v1294_v42 = vsel %vm263_vm2, %v1292_v26, %v1293_v3  ;;  %v1296_v36 = vsel %vm263_vm2, %v1293_v3, %v1295_v49 }
 0x179   : > { %v1264_v48 = vadd.f32 %v1260_v59, %v1223_v55  ;;  %v1172_v54 = vadd.f32 %v1167_v4, %v3149_v10  ;;  %v3245_v45 = vadd.f32 %v1277_v52, %v1230_v8  ;;  %v3247_v50 = vadd.f32 %v1296_v36, %v1238_v46 }
 0x17a   : > { %v1258_v58 = vsel %vm263_vm2, %v1256_v24, %v1257_v40  ;;  %v1324_v47 = vstv %s3213_s3  ;;  %v3256_v26 = vmul.f32 %v1340_v43, %v1304_v28  ;;  %v1357_v34 = vstv %s3218_s0 }
 0x17b   : > { %v1222_v16 = vadd.f32 %v3093_v31, %v1172_v54  ;;  %v1376_v27 = vstv %s3220_s1  ;;  %v1317_v10 = vmul.f32 %v1316_v19, %v1304_v28  ;;  %v1332_v0 = vstv %s3224_s12 }
 0x17c   : > { %v3265_v6 = vmul.f32 %v1340_v43, %v1306_v1  ;;  %v1358_v38 = vmul.f32 %v1357_v34, %v1304_v28  ;;  %v3271_v24 = vadd.f32 %v1312_v13, %v1264_v48  ;;  %v3273_v31 = vmul.f32 %v1316_v19, %v1306_v1 }
 0x17d   : > { %v1325_v17 = vmul.f32 %v1324_v47, %v1304_v28  ;;  %v3275_v12 = vmul.f32 %v1357_v34, %v1306_v1  ;;  %v1263_v37 = vadd.f32 %v1258_v58, %v1222_v16  ;;  %v3277_v2 = vmul.f32 %v1324_v47, %v1306_v1 }
 0x17e   : > { %v1377_v21 = vmul.f32 %v1376_v27, %v1304_v28  ;;  %v1281_v51 = vadd.f32 %v1275_v14, %v3182_v7  ;;  %v1333_v32 = vmul.f32 %v1332_v0, %v1304_v28  ;;  %v3282_v20 = vmul.f32 %v1332_v0, %v1306_v1 }
 0x17f   : > { %v1347_v18 = vrot.slane %v3256_v26, 4  ;;  %v1319_v39 = vmul.f32 %v1316_v19, %v1308_v25  ;;  %v1348_v29 = vrot.slane %v3265_v6, 4  ;;  %v1364_v57 = vrot.slane %v1358_v38, 4  ;;  %v1399_v19 = vpop.permute.xlu1 %1398 }
 0x180   : > { %v3288_v49 = vmul.f32 %v1376_v27, %v1306_v1  ;;  %v1300_v7 = vadd.f32 %v1294_v42, %v3186_v23  ;;  %v1365_v53 = vrot.slane %v3275_v12, 4  ;;  %v1327_v41 = vmul.f32 %v1324_v47, %v1308_v25 }
 0x181   : > { %v1360_v9 = vmul.f32 %v1357_v34, %v1308_v25  ;;  %v1379_v63 = vmul.f32 %v1376_v27, %v1308_v25  ;;  %v3292_v56 = vadd.f32 %v1311_v15, %v1263_v37  ;;  %v1383_v40 = vrot.slane %v1377_v21, 4 }
 0x182   : > { %v1320_v11 = vadd.f32 %v1317_v10, %v1281_v51  ;;  %v1343_v61 = vmul.f32 %v1340_v43, %v1308_v25  ;;  %v1322_v62 = vadd.f32 %v1319_v39, %v3226_v30  ;;  %v1335_v28 = vmul.f32 %v1332_v0, %v1308_v25 }
 0x183   : > { %v1407_v55 = vstv %s3253_s11  ;;  %v3297_v1 = vstv %s3260_s14  ;;  %v1367_v3 = vrot.slane %v1360_v9, 4  ;;  %v1431_v23 = vstv %s3262_s22 }
 0x184   : > { %v1448_v8 = vstv %s3267_s25  ;;  %v3302_v46 = vstv %s3269_s13  ;;  %v1384_v44 = vrot.slane %v3288_v49, 4  ;;  %v1328_v14 = vadd.f32 %v1325_v17, %v1300_v7 }
 0x185   : > { %v1330_v13 = vadd.f32 %v1327_v41, %v3228_v22  ;;  %v1386_v15 = vrot.slane %v1379_v63, 4  ;;  %v1350_v52 = vrot.slane %v1343_v61, 4  ;;  %v1408_v30 = vmul.f32 %v1407_v55, %v3280_v35  ;;  %v1397_v61 = vpop.permute.xlu0 %1396 }
 0x186   : > { %v3308_v59 = vmul.f32 %v1431_v23, %v3280_v35  ;;  %v1366_v4 = vsel %vm263_vm2, %v1364_v57, %v1365_v53  ;;  %v1416_v43 = vmul.f32 %v3297_v1, %v3280_v35  ;;  %v1423_v42 = vstv %s3285_s15 }
 0x187   : > { %v3315_v36 = vmul.f32 %v1448_v8, %v3280_v35  ;;  %v3319_v22 = vmul.f32 %v3302_v46, %v3280_v35  ;;  %v1338_v48 = vadd.f32 %v1335_v28, %v3201_v60  ;;  %v1374_v54 = vadd.f32 %v1367_v3, %v1322_v62 }
 0x188   : > { %v1410_v58 = vmul.f32 %v1407_v55, %v1399_v19  ;;  %v1426_v47 = vmul.f32 %v1423_v42, %v1399_v19  ;;  %v1372_v16 = vadd.f32 %v1366_v4, %v1320_v11  ;;  %v1393_v34 = vadd.f32 %v1386_v15, %v1330_v13 }
 0x189   : > { %v1418_v27 = vmul.f32 %v3297_v1, %v1399_v19  ;;  %v1451_v10 = vmul.f32 %v1448_v8, %v1399_v19  ;;  %v1424_v0 = vmul.f32 %v1423_v42, %v3280_v35  ;;  %v1438_v38 = vrot.slane %v3308_v59, 4 }
 0x18a   : > { %v1336_v25 = vadd.f32 %v1333_v32, %v3184_v33  ;;  %v1385_v17 = vsel %vm263_vm2, %v1383_v40, %v1384_v44  ;;  %v1455_v60 = vrot.slane %v3315_v36, 4  ;;  %v3330_v12 = vadd.f32 %v1426_v47, %v1338_v48 }
 0x18b   : > { %v1434_v37 = vmul.f32 %v1431_v23, %v1399_v19  ;;  %v1470_v21 = vmul.f32 %v3302_v46, %v1399_v19  ;;  %v1474_v51 = vrot.slane %v3319_v22, 4  ;;  %v1413_v39 = vadd.f32 %v1410_v58, %v1374_v54 }
 0x18c   : > { %v1458_v57 = vrot.slane %v1451_v10, 4  ;;  %v1321_v49 = vadd.f32 %v3273_v31, %v3245_v45  ;;  %v1391_v7 = vadd.f32 %v1385_v17, %v1328_v14  ;;  %v1411_v41 = vadd.f32 %v1408_v30, %v1372_v16 }
 0x18d   : > { %v1421_v33 = vadd.f32 %v1418_v27, %v1393_v34  ;;  %v1477_v32 = vrot.slane %v1470_v21, 4  ;;  %v1427_v9 = vadd.f32 %v1424_v0, %v1336_v25  ;;  %v1329_v63 = vadd.f32 %v3277_v2, %v3247_v50 }
 0x18e   : > { %v1351_v40 = vsel %vm263_vm2, %v1348_v29, %v1350_v52  ;;  %v1368_v11 = vsel %vm263_vm2, %v1365_v53, %v1367_v3  ;;  %v1441_v62 = vrot.slane %v1434_v37, 4  ;;  %v1504_v28 = vrot.slane %v3330_v12, 1 }
 0x18f   : > { %v1373_v45 = vadd.f32 %v1368_v11, %v1321_v49  ;;  %v1387_v31 = vsel %vm263_vm2, %v1384_v44, %v1386_v15  ;;  %v1465_v14 = vadd.f32 %v1458_v57, %v1413_v39  ;;  %v1337_v13 = vadd.f32 %v3282_v20, %v3230_v5 }
 0x190   : > { %v1349_v50 = vsel %vm263_vm2, %v1347_v18, %v1348_v29  ;;  %v1401_v2 = vstv %s3322_s28  ;;  %v1484_v19 = vadd.f32 %v1477_v32, %v1421_v33  ;;  %v1355_v53 = vadd.f32 %v1351_v40, %v3271_v24 }
 0x191   : > { %v1403_v3 = vmul.f32 %v1401_v2, %v1397_v61  ;;  %v1409_v52 = vmul.f32 %v1407_v55, %v1397_v61  ;;  %v1392_v30 = vadd.f32 %v1387_v31, %v1329_v63  ;;  %v1425_v59 = vmul.f32 %v1423_v42, %v1397_v61 }
 0x192   : > { %v1433_v4 = vmul.f32 %v1431_v23, %v1397_v61  ;;  %v1450_v44 = vmul.f32 %v1448_v8, %v1397_v61  ;;  %v1402_v15 = vmul.f32 %v1401_v2, %v3280_v35  ;;  %v1354_v5 = vadd.f32 %v1349_v50, %v3292_v56  ;;  %v1848_v50 = vld [vmem:[%s3764_s21] sm:$0xff] }
 0x193   : > { %v1412_v20 = vadd.f32 %v1409_v52, %v1373_v45  ;;  %v1417_v6 = vmul.f32 %v3297_v1, %v1397_v61  ;;  %v1428_v26 = vadd.f32 %v1425_v59, %v1337_v13  ;;  %v1469_v29 = vmul.f32 %v3302_v46, %v1397_v61 }
 0x194   : > { %v1439_v36 = vrot.slane %v1433_v4, 4  ;;  %v1456_v18 = vrot.slane %v1450_v44, 4  ;;  %v1419_v22 = vadd.f32 %v1416_v43, %v1391_v7  ;;  %v1492_v24 = vrot.slane %v1465_v14, 1  ;;  %v1852_v4 = vld [vmem:[%s3764_s21 + $0x8] sm:$0xff] }
 0x195   : > { %v1405_v55 = vadd.f32 %v1403_v3, %v1355_v53  ;;  %v1404_v8 = vadd.f32 %v1402_v15, %v1354_v5  ;;  %v1420_v48 = vadd.f32 %v1417_v6, %v1392_v30  ;;  %v1501_v58 = vrot.slane %v1427_v9, 1  ;;  %v1850_v3 = vld [vmem:[%s3764_s21 + $0x20] sm:$0xff]  ;;  %v1851_v30 = vld [vmem:[%s3764_s21 + $0x30] sm:$0xff]  ;;  %v1853_v15 = vld [vmem:[%s3764_s21 + $0x18] sm:$0xff] }
 0x196   : > { %v1440_v42 = vsel %vm263_vm2, %v1438_v38, %v1439_v36  ;;  %v1442_v23 = vsel %vm263_vm2, %v1439_v36, %v1441_v62  ;;  %v1457_v35 = vsel %vm263_vm2, %v1455_v60, %v1456_v18  ;;  %v1459_v56 = vsel %vm263_vm2, %v1456_v18, %v1458_v57 }
 0x197   : > { %v1463_v1 = vadd.f32 %v1457_v35, %v1411_v41  ;;  %v1464_v54 = vadd.f32 %v1459_v56, %v1412_v20  ;;  %v1511_v47 = vadd.f32 %v1504_v28, %v1484_v19  ;;  %v1475_v16 = vrot.slane %v1469_v29, 4  ;;  %v1849_v19 = vld [vmem:[%s3764_s21 + $0x10] sm:$0xff]  ;;  %v1854_v20 = vld [vmem:[%s3764_s21 + $0x28] sm:$0xff] }
 0x198   : > { %v1502_v46 = vrot.slane %v1428_v26, 1  ;;  %v1445_v43 = vadd.f32 %v1440_v42, %v1404_v8  ;;  %v1446_v34 = vadd.f32 %v1442_v23, %v1405_v55  ;;  %v1855_v26 = vld [vmem:[%s3764_s21 + $0x38] sm:$0xff] }
 0x199   : > { %v1489_v27 = vrot.slane %v1463_v1, 1  ;;  %v1490_v10 = vrot.slane %v1464_v54, 1  ;;  %v1476_v0 = vsel %vm263_vm2, %v1474_v51, %v1475_v16  ;;  %v1478_v38 = vsel %vm263_vm2, %v1475_v16, %v1477_v32 }
 0x19a   : > { %v1503_v25 = vsel %vm1488_vm3, %v1501_v58, %v1502_v46  ;;  %v1505_v17 = vsel %vm1488_vm3, %v1502_v46, %v1504_v28  ;;  %v1482_v60 = vadd.f32 %v1476_v0, %v1419_v22  ;;  %v1483_v12 = vadd.f32 %v1478_v38, %v1420_v48 }
 0x19b   : > { %v1491_v37 = vsel %vm1488_vm3, %v1489_v27, %v1490_v10  ;;  %v1493_v21 = vsel %vm1488_vm3, %v1490_v10, %v1492_v24  ;;  %v1519_v49 = vrot.slane %v1511_v47, 2 }
 0x19c   : > { %v1496_v39 = vadd.f32 %v1491_v37, %v1445_v43  ;;  %v1497_v57 = vadd.f32 %v1493_v21, %v1446_v34  ;;  %v1509_v7 = vadd.f32 %v1503_v25, %v1482_v60  ;;  %v1510_v41 = vadd.f32 %v1505_v17, %v1483_v12 }
 0x19e   : > { %v1516_v33 = vrot.slane %v1509_v7, 2  ;;  %v1517_v51 = vrot.slane %v1510_v41, 2 }
 0x1a0   : > { %v1518_v32 = vsel %vm1515_vm4, %v1516_v33, %v1517_v51  ;;  %v1520_v9 = vsel %vm1515_vm4, %v1517_v51, %v1519_v49 }
 0x1a1   : > { %v1523_v63 = vadd.f32 %v1518_v32, %v1496_v39  ;;  %v1524_v40 = vadd.f32 %v1520_v9, %v1497_v57 }
 0x1a3   : > { %v1760_v11 = vmul.f32 -1.442695, %v1523_v63  ;;  %v1761_v61 = vmul.f32 -1.442695, %v1524_v40 }
 0x1a5   : > { %1837 = vpow2.f32 %v1760_v11 }
 0x1a6   : > { %1839 = vpow2.f32 %v1761_v61 }
 0x1af   : > { %v1838_v62 = vpop.eup %1837 }
 0x1b0   : > { %v1840_v28 = vpop.eup %1839  ;;  %v1531_v45 = vadd.f32 1.0, %v1838_v62 }
 0x1b1   : > { %v1532_v31 = vadd.f32 1.0, %v1840_v28 }
 0x1b2   : > { %1841 = vrcp.f32 %v1531_v45 }
 0x1b3   : > { %1843 = vrcp.f32 %v1532_v31 }
 0x1bc   : > { %v1842_v14 = vpop.eup %1841 }
 0x1bd   : > { %v1844_v13 = vpop.eup %1843  ;;  %v1537_v2 = vmul.f32 %v1848_v50, %v1842_v14  ;;  %v1539_v53 = vmul.f32 %v1849_v19, %v1842_v14  ;;  %v1541_v52 = vmul.f32 %v1850_v3, %v1842_v14  ;;  %v1543_v59 = vmul.f32 %v1851_v30, %v1842_v14 }
 0x1be   : > { %v1538_v44 = vmul.f32 %v1852_v4, %v1844_v13  ;;  %v1540_v5 = vmul.f32 %v1853_v15, %v1844_v13  ;;  %v1542_v6 = vmul.f32 %v1854_v20, %v1844_v13  ;;  %v1544_v36 = vmul.f32 %v1855_v26, %v1844_v13 }
 0x1bf   : > { %1545 = vst.msk [vmem:[%s173_s24] sm:$0xff] %vm182_vm0, %v1537_v2  ;;  %1547 = vst.msk [vmem:[%s173_s24 + $0x10] sm:$0xff] %vm182_vm0, %v1539_v53 }
 0x1c0   : > { %1549 = vst.msk [vmem:[%s173_s24 + $0x20] sm:$0xff] %vm182_vm0, %v1541_v52  ;;  %1551 = vst.msk [vmem:[%s173_s24 + $0x30] sm:$0xff] %vm182_vm0, %v1543_v59 }
 0x1c1   : > { %1546 = vst.msk [vmem:[%s173_s24 + $0x8] sm:$0xff] %vm182_vm0, %v1538_v44  ;;  %1548 = vst.msk [vmem:[%s173_s24 + $0x18] sm:$0xff] %vm182_vm0, %v1540_v5 }
 0x1c2   : > { %1550 = vst.msk [vmem:[%s173_s24 + $0x28] sm:$0xff] %vm182_vm0, %v1542_v6  ;;  %1552 = vst.msk [vmem:[%s173_s24 + $0x38] sm:$0xff] %vm182_vm0, %v1544_v36 }
 0x1c3   : > { %1912 = shalt.err (!%p1909_p0)
}
 0x1c4   : > { %s1913_s4 = scalar_lea.hbm %s3377_s18, 1024  ;;  %s1917_s3 = scalar_lea.hbm %s3766_s27, 2048 }
 0x1c5   : > { %p1914_p8 = scmp.ne.s32.totalorder %s3377_s18, %s1913_s4  ;;  %p1918_p1 = scmp.lt.u32.totalorder %s3377_s18, %s3766_s27 }
 0x1c6   : > { %p1919_p2 = scmp.lt.u32.totalorder %s1917_s3, %s1913_s4  ;;  %p1921_p12 = scmp.lt.u32.totalorder %s1913_s4, %s3377_s18 }
 0x1c7   : > { %p1915_p9 = pnand %p1914_p8, %p3768_p13 }
 0x1c8   : > { %p1920_p11 = por %p1919_p2, %p1918_p1 }
 0x1c9   : > { %p1916_p10 = pneg %p1915_p9 }
 0x1ca   : > { %p1922_p7 = por %p1921_p12, %p1920_p11 }
 0x1cc   : > { %p1923_p3 = pnand %p1922_p7, %p1916_p10 }
 0x1ce   : > { %1926 = shalt.err (!%p1923_p3)
}
 0x1cf   : > { %s1983_s12 = smov 128   ;;  %s1984_s11 = smov 8  }
 0x1d0   : > { %1775 = dma.vmem_to_hbm [thread:$0]  (%p3768_p13), %s3379_s6, 1024, %s3377_s18, %s1554_s16, %s1983_s12, %s1983_s12, %s1984_s11  }
 0x1d1 PF: > { %s3769_s14 = sld [smem:[#allocation12_spill]]  ;;  %s3770_s22 = sld [smem:[#allocation20_spill]] }
 0x1d2   : > { %s3771_s25 = sld [smem:[#allocation15_spill]] }
 0x1d7   : > { %s1582_s13 = sand.u32 1, %s3769_s14   ;;  %p3772_p6 = scmp.ne.s32.totalorder %s3770_s22, 0 }
 0x1d8   : > { %p3773_p4 = scmp.ge.s32.totalorder %s3771_s25, 2  ;;  %s1583_s15 = scalar_lea.sflag [#allocation5], %s1582_s13 }
 0x1da   : > { %p1786_p5 = pnand %p3773_p4, %p3772_p6 }
 0x1dc   : > { %1952 = dma.done.wait (!%p1786_p5), %s1583_s15, 1024  }
 0x1dd   : > { %1954 = vsyncadd (!%p1786_p5), %s1583_s15, 4294966272  ;;  %s3774_s12 = sld [smem:[#allocation17_spill]]  ;;  %s3775_s9 = sld [smem:[#allocation13_spill]] }
 0x1de   : > { %s3776_s10 = sld [smem:[#allocation14_spill]]  ;;  %s3777_s11 = sld [smem:[#allocation18_spill]] }
 0x1e3   : > { %p16_p0 = scmp.ge.s32.totalorder %s3774_s12, 4  }
 0x1e5   :  { %18 = sbr.rel (!%p16_p0) target bundleno = 10 (0xa), region = 79 }
 0x1ec   :  { %1588 = vsyncpa [#allocation4], 1 }
 0x1ed   :  { %1590 = vsyncpa [#allocation4 + $0x1], 1 }
 0x1ee   :  { %1591 = vsyncpa [#allocation5], 1 }
 0x1ef   :  { %1593 = vsyncpa [#allocation5 + $0x1], 1 }
 0x1f0   :  { %1594 = vsyncpa [#allocation6], 1 }
 0x1f1   :  { %1596 = vsyncpa [#allocation6 + $0x1], 1 }

</bundles_post_ra>
